<compile_context>
chip_gen: v6e
topology: v6e:2x2x1
jax: 0.10.0
libtpu: 0.0.40
codegen_flags: <defaults>
</compile_context>

<pallas_src>
import jax
import jax.numpy as jnp
from jax import lax
from jax.experimental import pallas as pl
from jax.experimental.pallas import tpu as pltpu

IN_FEATURES = 196608   # fixed by the module definition
OUT_FEATURES = 10

NUM_SPLITS = 2                                   # parallel K-split (uses both TCs on v7x)
TK = 32768                                       # lane-dense K tile; 196608 = 2 * 3 * 32768
STEPS_PER_SPLIT = IN_FEATURES // (NUM_SPLITS * TK)   # = 3 pipelined steps per split


def linear_kernel(x_ref, w_ref, o_ref):
    """One K-tile partial of y = x @ W.T, accumulated into the resident output block.

    x_ref: (B, TK) f32, w_ref: (N, TK) f32 (both lane-dense), o_ref: (B, N) f32.
    """
    k = pl.program_id(1)

    partial = lax.dot_general(
        x_ref[...], w_ref[...],
        dimension_numbers=(((1,), (1,)), ((), ())),   # contract over the last dim of both
        preferred_element_type=jnp.float32,
    )

    @pl.when(k == 0)
    def _():
        o_ref[...] = partial

    @pl.when(k != 0)
    def _():
        o_ref[...] += partial


def pallas_linear(x, w, b):
    """x: (B, K) f32, w: (N, K) f32 (PyTorch Linear layout), b: (N,) f32 -> (B, N) f32."""
    B, K = x.shape
    N, K2 = w.shape
    assert K == K2 == IN_FEATURES and N == OUT_FEATURES
    assert K % (NUM_SPLITS * TK) == 0
    steps = K // (NUM_SPLITS * TK)

    partials = pl.pallas_call(
        linear_kernel,
        out_shape=jax.ShapeDtypeStruct((NUM_SPLITS, B, N), jnp.float32),
        grid_spec=pltpu.PrefetchScalarGridSpec(
            num_scalar_prefetch=0,
            grid=(NUM_SPLITS, steps),
            in_specs=[
                # x tile: (B, TK), walk K across both grid axes.
                pl.BlockSpec((B, TK), lambda p, k: (0, p * steps + k)),
                # weight tile: (N, TK) -- K is the lane dim, contiguous HBM reads.
                pl.BlockSpec((N, TK), lambda p, k: (0, p * steps + k)),
            ],
            # One (B, N) partial-sum block per split; resident across the k axis.
            out_specs=pl.BlockSpec((None, B, N), lambda p, k: (p, 0, 0)),
        ),
        compiler_params=pltpu.CompilerParams(
            dimension_semantics=("parallel", "arbitrary"),
            vmem_limit_bytes=32 * 1024 * 1024,   # ~6 MB actual footprint; ample headroom everywhere
        ),
    )(x, w)

    # Combine the per-split partials and add the bias (tiny (2, B, 10) op, negligible).
    return partials.sum(axis=0) + b[None, :]


if __name__ == "__main__":
    key = jax.random.PRNGKey(0)
    kx, kw, kb = jax.random.split(key, 3)

    B = 2  # small batch; input already flattened to 196608 features per row
    x = jax.random.normal(kx, (B, IN_FEATURES), dtype=jnp.float32)

    # PyTorch Linear default init: U(-1/sqrt(K), 1/sqrt(K)), weight in (N, K) layout.
    bound = 1.0 / jnp.sqrt(jnp.float32(IN_FEATURES))
    w = jax.random.uniform(
        kw, (OUT_FEATURES, IN_FEATURES), minval=-bound, maxval=bound, dtype=jnp.float32
    )
    b = jax.random.uniform(
        kb, (OUT_FEATURES,), minval=-bound, maxval=bound, dtype=jnp.float32
    )

    y = pallas_linear(x, w, b)
    jax.block_until_ready(y)

    # Reference check against plain JAX.
    y_ref = x @ w.T + b[None, :]
    assert y.shape == (B, OUT_FEATURES)
    assert jnp.allclose(y, y_ref, atol=1e-3, rtol=1e-3)

    print("KERNEL_OK")
</pallas_src>

<mosaic_0001>
module attributes {stable_mosaic.version = 11 : i64} {
  func.func @linear_kernel(%arg0: i32, %arg1: i32, %arg2: memref<2x32768xf32, #tpu.memory_space<vmem>>, %arg3: memref<10x32768xf32, #tpu.memory_space<vmem>>, %arg4: memref<1x2x10xf32, #tpu.memory_space<vmem>>) attributes {dimension_semantics = [#tpu.dimension_semantics<parallel>, #tpu.dimension_semantics<arbitrary>], iteration_bounds = array<i64: 2, 3>, scalar_prefetch = 0 : i64, scratch_operands = 0 : i64, tpu.core_type = #tpu.core_type<tc>, window_params = [{transform_indices = @transform_0, window_bounds = array<i64: 2, 32768>}, {transform_indices = @transform_1, window_bounds = array<i64: 10, 32768>}, {transform_indices = @transform_2, window_bounds = array<i64: 1, 2, 10>}]} {
    %c0 = arith.constant 0 : index
    %c0_0 = arith.constant 0 : index
    %0 = vector.load %arg2[%c0, %c0_0] : memref<2x32768xf32, #tpu.memory_space<vmem>>, vector<2x32768xf32>
    %c0_1 = arith.constant 0 : index
    %c0_2 = arith.constant 0 : index
    %1 = vector.load %arg3[%c0_1, %c0_2] : memref<10x32768xf32, #tpu.memory_space<vmem>>, vector<10x32768xf32>
    %cst = arith.constant dense<0.000000e+00> : vector<2x10xf32>
    %2 = tpu.matmul %0, %1, %cst {dimension_numbers = #tpu.dot_dimension_numbers<[1], [1], [0], [0], [0, 0, 1, 0], [], []>} : vector<2x32768xf32>, vector<10x32768xf32>, vector<2x10xf32> -> vector<2x10xf32>
    %c0_i32 = arith.constant 0 : i32
    %3 = arith.cmpi eq, %arg1, %c0_i32 : i32
    %4 = arith.extui %3 : i1 to i32
    %c0_i32_3 = arith.constant 0 : i32
    %5 = arith.cmpi ne, %4, %c0_i32_3 : i32
    scf.if %5 {
      %c0_6 = arith.constant 0 : index
      %c0_7 = arith.constant 0 : index
      %c0_8 = arith.constant 0 : index
      %9 = vector.load %arg4[%c0_6, %c0_7, %c0_8] : memref<1x2x10xf32, #tpu.memory_space<vmem>>, vector<1x2x10xf32>
      %10 = vector.shape_cast %9 : vector<1x2x10xf32> to vector<2x10xf32>
      %11 = vector.shape_cast %2 : vector<2x10xf32> to vector<1x2x10xf32>
      tpu.vector_store %arg4[%c0_6, %c0_7, %c0_8], %11 {strides = array<i32>} : memref<1x2x10xf32, #tpu.memory_space<vmem>>, vector<1x2x10xf32>,
    } else {
    }
    %c0_i32_4 = arith.constant 0 : i32
    %6 = arith.cmpi ne, %arg1, %c0_i32_4 : i32
    %7 = arith.extui %6 : i1 to i32
    %c0_i32_5 = arith.constant 0 : i32
    %8 = arith.cmpi ne, %7, %c0_i32_5 : i32
    scf.if %8 {
      %c0_6 = arith.constant 0 : index
      %c0_7 = arith.constant 0 : index
      %c0_8 = arith.constant 0 : index
      %9 = vector.load %arg4[%c0_6, %c0_7, %c0_8] : memref<1x2x10xf32, #tpu.memory_space<vmem>>, vector<1x2x10xf32>
      %10 = vector.shape_cast %9 : vector<1x2x10xf32> to vector<2x10xf32>
      %11 = arith.addf %10, %2 : vector<2x10xf32>
      %c0_9 = arith.constant 0 : index
      %c0_10 = arith.constant 0 : index
      %c0_11 = arith.constant 0 : index
      %12 = vector.load %arg4[%c0_9, %c0_10, %c0_11] : memref<1x2x10xf32, #tpu.memory_space<vmem>>, vector<1x2x10xf32>
      %13 = vector.shape_cast %12 : vector<1x2x10xf32> to vector<2x10xf32>
      %14 = vector.shape_cast %11 : vector<2x10xf32> to vector<1x2x10xf32>
      tpu.vector_store %arg4[%c0_9, %c0_10, %c0_11], %14 {strides = array<i32>} : memref<1x2x10xf32, #tpu.memory_space<vmem>>, vector<1x2x10xf32>,
    } else {
    }
    return
  }
  func.func @transform_0(%arg0: i32, %arg1: i32) -> (i32, i32) {
    %c3_i32 = arith.constant 3 : i32
    %0 = arith.muli %arg0, %c3_i32 : i32
    %1 = arith.addi %0, %arg1 : i32
    %c0_i32 = arith.constant 0 : i32
    %c0_i32_0 = arith.constant 0 : i32
    return %c0_i32, %1 : i32, i32
  }
  func.func @transform_1(%arg0: i32, %arg1: i32) -> (i32, i32) {
    %c3_i32 = arith.constant 3 : i32
    %0 = arith.muli %arg0, %c3_i32 : i32
    %1 = arith.addi %0, %arg1 : i32
    %c0_i32 = arith.constant 0 : i32
    %c0_i32_0 = arith.constant 0 : i32
    return %c0_i32, %1 : i32, i32
  }
  func.func @transform_2(%arg0: i32, %arg1: i32) -> (i32, i32, i32) {
    %c0_i32 = arith.constant 0 : i32
    %c0_i32_0 = arith.constant 0 : i32
    %c0_i32_1 = arith.constant 0 : i32
    return %arg0, %c0_i32, %c0_i32_0 : i32, i32, i32
  }
}

</mosaic_0001>

<bundles_post_ra>
// kernel: tpu_custom_call.1
= control target key start
LH: loop header
LB: loop body
LE: loop exit
PB: predicated region body
PF: predicated region fallthrough
CT: control target
= control target key end

     0   :  { %s12640_s0 = inlined_call_operand.hbm [shape: f32[2,196608], index: 0, kind: input, shape index: {}]   ;;  %s12641_s1 = inlined_call_operand.hbm [shape: f32[10,196608], index: 1, kind: input, shape index: {}]   ;;  %s12642_s2 = inlined_call_operand.hbm [shape: f32[2,2,10], index: 2, kind: output, shape index: {}]  }
   0x1   :  { %12647 = sst [smem:[#allocation15_spill]] %s12640_s0 }
   0x2   :  { %7 = vsyncpa [#allocation3], 0 }
   0x3   :  { %9 = vsyncpa [#allocation3 + $0x1], 0 }
   0x4   :  { %10 = vsyncpa [#allocation6], 0 }
   0x5   :  { %12 = vsyncpa [#allocation6 + $0x1], 0 }
   0x6   :  { %13 = vsyncpa [#allocation4], 0 }
   0x7   :  { %15 = vsyncpa [#allocation4 + $0x1], 0  ;;  %s11711_s9 = smov 0   ;;  %s11713_s10 = smov 0  }
   0x8   :  { %s11715_s11 = smov 0   ;;  %s11717_s12 = smov 0  }
   0x9   :  { %s11719_s13 = smov 0   ;;  %s11721_s14 = smov 0  }
   0xa   :  { %s11723_s15 = smov 0   ;;  %s11725_s16 = smov 0  }
   0xb   :  { %s11727_s17 = smov 0   ;;  %s11729_s18 = smov 0  }
   0xc   :  { %s11731_s19 = smov 0  }
   0xd LB: > { %12648 = sst [smem:[#allocation11_spill]] %s11679_s17  ;;  %s11310_s20 = sadd.s32 4294967295, %s11687_s19   ;;  %s11687_s19 = sphi %s11731_s19, %s21_s19   ;;  %s11683_s18 = sphi %s11729_s18, %s12663_s18   ;;  %s11679_s17 = sphi %s11727_s17, %s12662_s17   ;;  %s11675_s16 = sphi %s11725_s16, %s12661_s16   ;;  %s11671_s15 = sphi %s11723_s15, %s12660_s15   ;;  %s11667_s14 = sphi %s11721_s14, %s12669_s14   ;;  %s11663_s13 = sphi %s11719_s13, %s12668_s13   ;;  %s11659_s12 = sphi %s11717_s12, %s12667_s12   ;;  %s11655_s11 = sphi %s11715_s11, %s12666_s11   ;;  %s11651_s10 = sphi %s11713_s10, %s12665_s10   ;;  %s11647_s9 = sphi %s11711_s9, %s12664_s9  }
   0xe   : > { %12649 = sst [smem:[#allocation12_spill]] %s11683_s18  ;;  %s11311_s21 = sadd.s32 4294967294, %s11687_s19  }
   0xf   : > { %s30_s22 = sadd.s32 1, %s11679_s17  ;;  %s33_s23 = sadd.s32 1, %s11683_s18 }
  0x10   : > { %p31_p0 = scmp.ge.s32.totalorder %s30_s22, 3  ;;  %s37_s24 = smul.u32 3, %s11683_s18 }
  0x11   : > { %s44_s25 = sadd.s32 1, %s11667_s14  ;;  %p51_p1 = scmp.ne.s32.totalorder %s11667_s14, %s11663_s13 }
  0x12   : > { %s12671_s22 = smov (%p31_p0, %s30_s22), 0  ;;  %s12673_s23 = smov (!%p31_p0, %s33_s23), %s11683_s18 }
  0x13   : > { %12650 = sst [smem:[#allocation13_spill]] %s12671_s22  ;;  %s11776_s26 = sadd.s32 %s11679_s17, %s37_s24 }
  0x14   : > { %p52_p2 = scmp.eq.s32.totalorder %s11687_s19, 0  ;;  %p35_p3 = scmp.ge.s32.totalorder %s12673_s23, 2 }
  0x15   : > { %p57_p4 = scmp.ne.s32.totalorder %s11663_s13, %s11659_s12  ;;  %p58_p6 = scmp.eq.s32.totalorder %s11310_s20, 0 }
  0x16   : > { %p11780_p5 = por %p52_p2, %p51_p1  ;;  %s12675_s23 = smov (%p35_p3, %s12673_s23), 0 }
  0x17   : > { %12652 = sst [smem:[#allocation14_spill]] %s12675_s23  ;;  %p11786_p7 = por %p58_p6, %p57_p4 }
  0x18   : > { %s100_s29 = sadd.s32 1, %s11655_s11  ;;  %s39_s30 = smul.u32 3, %s12675_s23 }
  0x19   : > { %s97_s3 = ssub.s32 %s11683_s18, %s12675_s23  ;;  %p110_p9 = scmp.ne.s32.totalorder %s11655_s11, %s11651_s10 }
  0x1a   : > { %p98_p8 = scmp.eq.s32.totalorder %s97_s3, 0  ;;  %s40_s4 = sadd.s32 %s39_s30, %s12671_s22 }
  0x1b   : > { %p111_p10 = scmp.eq.s32.totalorder %s11310_s20, 5  ;;  %s41_s5 = ssub.s32 %s11776_s26, %s40_s4 }
  0x1c   : > { %p116_p11 = scmp.ne.s32.totalorder %s11651_s10, %s11647_s9  ;;  %p42_p12 = scmp.eq.s32.totalorder %s41_s5, 0 }
  0x1d   : > { %p11800_p13 = por %p111_p10, %p110_p9  ;;  %p117_p0 = scmp.eq.s32.totalorder %s11311_s21, 5 }
  0x1e   : > { %s11805_s7 = scalar_select %p98_p8, %s11655_s11, %s100_s29  }
  0x1f   : > { %s11808_s8 = scalar_select %p42_p12, %s11667_s14, %s44_s25  }
  0x20   : > { %p11349_p1 = scmp.lt.s32.totalorder %s11687_s19, 6  ;;  %s11814_s12 = sand.u32 1, %s11667_s14  }
  0x21   : > { %p11816_p2 = por %p117_p0, %p116_p11  ;;  %s11314_s24 = sshll.u32 %s11814_s12, 9 }
  0x22   : > { %s11330_s30 = sshll.u32 %s11776_s26, 13  ;;  %s12656_s0 = sld [smem:[#allocation15_spill]] }
  0x23   : > { %s12655_s20 = scalar_select %p11816_p2, 1, 0 }
  0x24   : > { %s141_s25 = scalar_lea.vmem [#allocation2], %s11314_s24  ;;  %p11827_p3 = pnand %p11349_p1, %p11780_p5 }
  0x25   : > { %s151_s5 = sshll.u32 %s141_s25, 4  ;;  %s11317_s23 = sshll.u32 %s11814_s12, 12  ;;  %s152_s5 = int_to_ptr.vmem [resolvable:$true] %s151_s5 }
  0x26   : > { %s138_s22 = scalar_lea.sflag [#allocation3], %s11814_s12  ;;  %p11509_p4 = pneg %p11827_p3 }
  0x27   : > { %s11520_s18 = scalar_lea.vmem %s152_s5, 8192  ;;  %s11689_s24 = smov [#allocation2]  }
  0x28   : > { %s149_s29 = scalar_lea.hbm %s12656_s0, %s11330_s30  ;;  %p11521_p6 = scmp.ne.s32.totalorder %s152_s5, %s11520_s18 }
  0x29   : > { %s11525_s30 = sshll.u32 %s11689_s24, 4  ;;  %s11526_s30 = int_to_ptr.vmem [resolvable:$false] %s11525_s30 }
  0x2a   : > { %p11523_p8 = pnand %p11521_p6, %p11509_p4  ;;  %s11527_s27 = scalar_lea.vmem %s11526_s30, 16384 }
  0x2b   : > { %p11528_p5 = scmp.lt.s32.totalorder %s152_s5, %s11526_s30  ;;  %p11529_p10 = scmp.lt.s32.totalorder %s11527_s27, %s11520_s18 }
  0x2c   : > { %p11524_p9 = pneg %p11523_p8 }
  0x2d   : > { %p11530_p11 = por %p11529_p10, %p11528_p5 }
  0x2f   : > { %p11531_p12 = pnand %p11530_p11, %p11524_p9 }
  0x31   : > { %11534 = shalt.err (!%p11531_p12)
}
  0x32   : > { %11341 = dma.hbm_to_vmem [thread:$0]  (!%p11827_p3), %s149_s29, 8192, %s152_s5, %s138_s22  }
  0x33   : > { %s11331_s3 = sshll.u32 %s11776_s26, 15  ;;  %p11320_p0 = scmp.ge.s32.totalorder %s11687_s19, 1 }
  0x34   : > { %s170_s24 = scalar_lea.hbm %s12641_s1, %s11331_s3  ;;  %p179_p1 = scmp.lt.s32.totalorder %s11687_s19, 7 }
  0x35   : > { %s162_s30 = scalar_lea.vmem [#allocation5], %s11317_s23  ;;  %s159_s0 = scalar_lea.sflag [#allocation6], %s11814_s12 }
  0x36   : > { %s171_s18 = sshll.u32 %s162_s30, 4  ;;  %p11846_p6 = pnand %p11320_p0, %p179_p1  ;;  %s172_s18 = int_to_ptr.vmem [resolvable:$true] %s171_s18 }
  0x37   : > { %s11548_s17 = scalar_lea.vmem %s172_s18, 65536  ;;  %s11690_s22 = smov [#allocation5]  }
  0x38   : > { %p11549_p8 = scmp.ne.s32.totalorder %s172_s18, %s11548_s17  ;;  %s11553_s26 = sshll.u32 %s11690_s22, 4  ;;  %s11554_s26 = int_to_ptr.vmem [resolvable:$false] %s11553_s26 }
  0x39   : > { %s11555_s29 = scalar_lea.vmem %s11554_s26, 131072  ;;  %p11556_p10 = scmp.lt.s32.totalorder %s172_s18, %s11554_s26 }
  0x3a   : > { %p11551_p9 = pnand %p11549_p8, %p11509_p4  ;;  %p11557_p11 = scmp.lt.s32.totalorder %s11555_s29, %s11548_s17 }
  0x3c   : > { %p11552_p5 = pneg %p11551_p9  ;;  %p11558_p12 = por %p11557_p11, %p11556_p10 }
  0x3e   : > { %p11559_p2 = pnand %p11558_p12, %p11552_p5 }
  0x40   : > { %11562 = shalt.err (!%p11559_p2)
}
  0x41   : > { %s11691_s23 = smov 196608   ;;  %s11692_s5 = smov 32768  }
  0x42   : > { %s11693_s3 = smov 2048   ;;  %183 = sbr.rel (%p11846_p6) target bundleno = 823 (0x337), region = 28 }
  0x43   : > { %11344 = dma.hbm_to_vmem [thread:$0]  (!%p11827_p3), %s170_s24, 65536, %s172_s18, %s159_s0, %s11691_s23, %s11692_s5, %s11693_s3  }
  0x44   : > { %s185_s12 = sand.u32 (!%p11846_p6), 1, %s11663_s13  }
  0x45   : > { %s11321_s4 = sshll.u32 (!%p11846_p6), %s185_s12, 9  ;;  %s186_s25 = scalar_lea.sflag (!%p11846_p6), [#allocation3], %s185_s12 }
  0x46   : > { %s11859_s30 = scalar_lea.vmem (!%p11846_p6), [#allocation2], %s11321_s4 }
  0x47   : > { %11634 = dma.done.wait (%p11786_p7), %s186_s25, 8192  }
  0x48   : > { %11636 = vsyncadd (%p11786_p7), %s186_s25, 4294959104  ;;  %s11322_s17 = sshll.u32 %s185_s12, 12  ;;  %s195_s22 = scalar_lea.sflag [#allocation6], %s185_s12 }
  0x49   : > { %s11865_s21 = scalar_lea.vmem [#allocation5], %s11322_s17 }
  0x4a   : > { %11638 = dma.done.wait (%p11786_p7), %s195_s22, 65536  }
  0x4b   : > { %11640 = vsyncadd (%p11786_p7), %s195_s22, 4294901760  ;;  %s221_s0 = sand.u32 1, %s11651_s10   ;;  %v874_v0 = vlaneseq  ;;  %v11694_v1 = vmov 1983009808   ;;  %v551_v6 = vld [vmem:[%s11865_s21 + $0x808] sm:$0x3] }
  0x4c   : > { %s11874_s24 = sshll.u32 %s221_s0, 1  ;;  %v872_v2 = vunpack.c.l.s4 %v11694_v1  ;;  %v553_v7 = vld [vmem:[%s11865_s21 + $0x818] sm:$0x3]  ;;  %v550_v8 = vld [vmem:[%s11865_s21 + $0x800] sm:$0x3]  ;;  %2242 = vmatprep.subr.mxu0 %v551_v6  ;;  %v295_v10 = vld [vmem:[%s11865_s21 + $0x8] sm:$0xff] }
  0x4d   : > { %v875_v3 = vshrl.u32 %v874_v0, 7  ;;  %2312 = vmatprep.subr.mxu1 %v553_v7  ;;  %v552_v9 = vld [vmem:[%s11865_s21 + $0x810] sm:$0x3]  ;;  %v297_v11 = vld [vmem:[%s11865_s21 + $0x18] sm:$0xff]  ;;  %2243 = vmatpush1.xpose.msra.mxu0 %v550_v8  ;;  %v230_v12 = vld [vmem:[%s11859_s30] sm:$0xff]  ;;  %s223_s28 = scalar_lea.vmem [#allocation7], %s11874_s24 }
  0x4e   : > { %v873_v4 = vunpack.c.0.s8 %v872_v2  ;;  %2313 = vmatpush1.xpose.msra.mxu1 %v552_v9  ;;  %2244 = vmatprep.subr.mxu0 %v295_v10  ;;  %v294_v13 = vld [vmem:[%s11865_s21] sm:$0xff]  ;;  %v296_v14 = vld [vmem:[%s11865_s21 + $0x10] sm:$0xff]  ;;  %v870_v16 = vcombine.high %v230_v12, %v230_v12  ;;  %v555_v17 = vld [vmem:[%s11865_s21 + $0x828] sm:$0x3]  ;;  %p11324_p7 = scmp.ne.s32.totalorder %s11671_s15, 0 }
  0x4f   : > { %2314 = vmatprep.subr.mxu1 %v297_v11  ;;  %v557_v20 = vld [vmem:[%s11865_s21 + $0x838] sm:$0x3]  ;;  %v231_v21 = vld [vmem:[%s11859_s30 + $0x8] sm:$0xff]  ;;  %v554_v25 = vld [vmem:[%s11865_s21 + $0x820] sm:$0x3] }
  0x50   : > { %v11876_v5 = vsub.s32 %v873_v4, %v875_v3  ;;  %v887_v23 = vcombine.high %v231_v21, %v231_v21  ;;  %v556_v26 = vld [vmem:[%s11865_s21 + $0x830] sm:$0x3]  ;;  %v299_v27 = vld [vmem:[%s11865_s21 + $0x28] sm:$0xff]  ;;  %v301_v31 = vld [vmem:[%s11865_s21 + $0x38] sm:$0xff] }
  0x51   : > { %2245 = vmatpush1.xpose.msra.mxu0 %v294_v13  ;;  %v232_v30 = vld [vmem:[%s11859_s30 + $0x10] sm:$0xff]  ;;  %v298_v34 = vld [vmem:[%s11865_s21 + $0x20] sm:$0xff]  ;;  %v559_v36 = vld [vmem:[%s11865_s21 + $0x848] sm:$0x3] }
  0x52   : > { %v877_v15 = vrot.slane %v230_v12, %v11876_v5  ;;  %v884_v19 = vrot.slane %v870_v16, %v11876_v5  ;;  %2315 = vmatpush1.xpose.msra.mxu1 %v296_v14  ;;  %v894_v22 = vrot.slane %v231_v21, %v11876_v5  ;;  %2382 = vmatprep.subr.mxu0 %v555_v17  ;;  %v300_v35 = vld [vmem:[%s11865_s21 + $0x30] sm:$0xff]  ;;  %v561_v38 = vld [vmem:[%s11865_s21 + $0x858] sm:$0x3]  ;;  %v558_v41 = vld [vmem:[%s11865_s21 + $0x840] sm:$0x3] }
  0x53   : > { %2452 = vmatprep.subr.mxu1 %v557_v20  ;;  %v901_v29 = vrot.slane %v887_v23, %v11876_v5  ;;  %v904_v32 = vcombine.high %v232_v30, %v232_v30  ;;  %v911_v37 = vrot.slane %v232_v30, %v11876_v5  ;;  %v233_v40 = vld [vmem:[%s11859_s30 + $0x18] sm:$0xff]  ;;  %v560_v42 = vld [vmem:[%s11865_s21 + $0x850] sm:$0x3]  ;;  %v303_v43 = vld [vmem:[%s11865_s21 + $0x48] sm:$0xff] }
  0x54   : > { %v885_v18 = vcombine.high %v877_v15, %v877_v15  ;;  %v886_v24 = vcombine.high %v884_v19, %v884_v19  ;;  %v902_v28 = vcombine.high %v894_v22, %v894_v22  ;;  %v305_v45 = vld [vmem:[%s11865_s21 + $0x58] sm:$0xff]  ;;  %v921_v47 = vcombine.high %v233_v40, %v233_v40  ;;  %v302_v48 = vld [vmem:[%s11865_s21 + $0x40] sm:$0xff]  ;;  %v304_v49 = vld [vmem:[%s11865_s21 + $0x50] sm:$0xff] }
  0x55   : > { %v903_v33 = vcombine.high %v901_v29, %v901_v29  ;;  %v918_v39 = vrot.slane %v904_v32, %v11876_v5  ;;  %v919_v44 = vcombine.high %v911_v37, %v911_v37  ;;  %v563_v50 = vld [vmem:[%s11865_s21 + $0x868] sm:$0x3]  ;;  %v928_v51 = vrot.slane %v233_v40, %v11876_v5  ;;  %v565_v52 = vld [vmem:[%s11865_s21 + $0x878] sm:$0x3]  ;;  %v234_v54 = vld [vmem:[%s11859_s30 + $0x20] sm:$0xff] }
  0x56   : > { %2278 = vmatprep.mubr.f32.mxu0 %v885_v18  ;;  %2348 = vmatprep.mubr.f32.mxu1 %v886_v24  ;;  %v935_v53 = vrot.slane %v921_v47, %v11876_v5  ;;  %v562_v55 = vld [vmem:[%s11865_s21 + $0x860] sm:$0x3]  ;;  %v564_v56 = vld [vmem:[%s11865_s21 + $0x870] sm:$0x3]  ;;  %v307_v57 = vld [vmem:[%s11865_s21 + $0x68] sm:$0xff]  ;;  %v938_v61 = vcombine.high %v234_v54, %v234_v54  ;;  %v945_v1 = vrot.slane %v234_v54, %v11876_v5 }
  0x57   : > { %2279 = vmatmul.mubr.f32.vlgmr.msra.gmra.mxu0 %v877_v15  ;;  %2349 = vmatmul.mubr.f32.vlgmr.msra.gmra.mxu1 %v884_v19  ;;  %v920_v46 = vcombine.high %v918_v39, %v918_v39  ;;  %v936_v58 = vcombine.high %v928_v51, %v928_v51  ;;  %v309_v59 = vld [vmem:[%s11865_s21 + $0x78] sm:$0xff]  ;;  %v306_v62 = vld [vmem:[%s11865_s21 + $0x60] sm:$0xff]  ;;  %v308_v63 = vld [vmem:[%s11865_s21 + $0x70] sm:$0xff] }
  0x58   : > { %2383 = vmatpush1.xpose.msra.mxu0 %v554_v25  ;;  %2453 = vmatpush1.xpose.msra.mxu1 %v556_v26  ;;  %v937_v60 = vcombine.high %v935_v53, %v935_v53  ;;  %v567_v0 = vld [vmem:[%s11865_s21 + $0x888] sm:$0x3]  ;;  %v569_v2 = vld [vmem:[%s11865_s21 + $0x898] sm:$0x3]  ;;  %v952_v3 = vrot.slane %v938_v61, %v11876_v5  ;;  %v566_v6 = vld [vmem:[%s11865_s21 + $0x880] sm:$0x3]  ;;  %v953_v9 = vcombine.high %v945_v1, %v945_v1 }
  0x59   : > { %2384 = vmatprep.subr.mxu0 %v299_v27  ;;  %2454 = vmatprep.subr.mxu1 %v301_v31  ;;  %v235_v4 = vld [vmem:[%s11859_s30 + $0x28] sm:$0xff]  ;;  %v568_v7 = vld [vmem:[%s11865_s21 + $0x890] sm:$0x3]  ;;  %v313_v10 = vld [vmem:[%s11865_s21 + $0x98] sm:$0xff] }
  0x5a   : > { %2418 = vmatprep.mubr.f32.mxu0 %v902_v28  ;;  %2488 = vmatprep.mubr.f32.mxu1 %v903_v33  ;;  %v311_v8 = vld [vmem:[%s11865_s21 + $0x88] sm:$0xff]  ;;  %v954_v11 = vcombine.high %v952_v3, %v952_v3  ;;  %v955_v12 = vcombine.high %v235_v4, %v235_v4  ;;  %v310_v13 = vld [vmem:[%s11865_s21 + $0x80] sm:$0xff]  ;;  %v312_v14 = vld [vmem:[%s11865_s21 + $0x90] sm:$0xff]  ;;  %v962_v16 = vrot.slane %v235_v4, %v11876_v5 }
  0x5b   : > { %v571_v15 = vld [vmem:[%s11865_s21 + $0x8a8] sm:$0x3]  ;;  %v573_v17 = vld [vmem:[%s11865_s21 + $0x8b8] sm:$0x3]  ;;  %v236_v19 = vld [vmem:[%s11859_s30 + $0x30] sm:$0xff] }
  0x5c   : > { %2385 = vmatpush1.xpose.msra.mxu0 %v298_v34  ;;  %2455 = vmatpush1.xpose.msra.mxu1 %v300_v35  ;;  %v969_v18 = vrot.slane %v955_v12, %v11876_v5  ;;  %v570_v20 = vld [vmem:[%s11865_s21 + $0x8a0] sm:$0x3]  ;;  %v572_v21 = vld [vmem:[%s11865_s21 + $0x8b0] sm:$0x3]  ;;  %v970_v23 = vcombine.high %v962_v16, %v962_v16  ;;  %v317_v24 = vld [vmem:[%s11865_s21 + $0xb8] sm:$0xff]  ;;  %v972_v26 = vcombine.high %v236_v19, %v236_v19 }
  0x5d   : > { %2522 = vmatprep.subr.mxu0 %v559_v36  ;;  %2592 = vmatprep.subr.mxu1 %v561_v38  ;;  %v314_v27 = vld [vmem:[%s11865_s21 + $0xa0] sm:$0xff]  ;;  %v316_v28 = vld [vmem:[%s11865_s21 + $0xb0] sm:$0xff]  ;;  %v979_v30 = vrot.slane %v236_v19, %v11876_v5  ;;  %v577_v31 = vld [vmem:[%s11865_s21 + $0x8d8] sm:$0x3] }
  0x5e   : > { %v971_v25 = vcombine.high %v969_v18, %v969_v18  ;;  %v986_v32 = vrot.slane %v972_v26, %v11876_v5  ;;  %v237_v33 = vld [vmem:[%s11859_s30 + $0x38] sm:$0xff]  ;;  %v574_v34 = vld [vmem:[%s11865_s21 + $0x8c0] sm:$0x3]  ;;  %v576_v35 = vld [vmem:[%s11865_s21 + $0x8d0] sm:$0x3] }
  0x5f   : > { %2419 = vmatmul.mubr.f32.vlgmr.msra.gmra.mxu0 %v894_v22  ;;  %2489 = vmatmul.mubr.f32.vlgmr.msra.gmra.mxu1 %v901_v29  ;;  %v315_v22 = vld [vmem:[%s11865_s21 + $0xa8] sm:$0xff]  ;;  %v321_v38 = vld [vmem:[%s11865_s21 + $0xd8] sm:$0xff]  ;;  %v989_v40 = vcombine.high %v237_v33, %v237_v33  ;;  %v238_v47 = vld [vmem:[%s11859_s30 + $0x40] sm:$0xff] }
  0x60   : > { %2523 = vmatpush1.xpose.msra.mxu0 %v558_v41  ;;  %2593 = vmatpush1.xpose.msra.mxu1 %v560_v42  ;;  %v575_v29 = vld [vmem:[%s11865_s21 + $0x8c8] sm:$0x3]  ;;  %v318_v41 = vld [vmem:[%s11865_s21 + $0xc0] sm:$0xff]  ;;  %v320_v42 = vld [vmem:[%s11865_s21 + $0xd0] sm:$0xff]  ;;  %v1006_v54 = vcombine.high %v238_v47, %v238_v47 }
  0x61   : > { %2524 = vmatprep.subr.mxu0 %v303_v43  ;;  %2594 = vmatprep.subr.mxu1 %v305_v45  ;;  %v319_v36 = vld [vmem:[%s11865_s21 + $0xc8] sm:$0xff]  ;;  %v581_v45 = vld [vmem:[%s11865_s21 + $0x8f8] sm:$0x3]  ;;  %v240_v12 = vld [vmem:[%s11859_s30 + $0x50] sm:$0xff] }
  0x62   : > { %2558 = vmatprep.mubr.f32.mxu0 %v919_v44  ;;  %2628 = vmatprep.mubr.f32.mxu1 %v920_v46  ;;  %v579_v43 = vld [vmem:[%s11865_s21 + $0x8e8] sm:$0x3]  ;;  %v996_v44 = vrot.slane %v237_v33, %v11876_v5  ;;  %v1003_v46 = vrot.slane %v989_v40, %v11876_v5  ;;  %v1040_v19 = vcombine.high %v240_v12, %v240_v12  ;;  %v241_v26 = vld [vmem:[%s11859_s30 + $0x58] sm:$0xff]  ;;  %v242_v40 = vld [vmem:[%s11859_s30 + $0x60] sm:$0xff] }
  0x63   : > { %v239_v61 = vld [vmem:[%s11859_s30 + $0x48] sm:$0xff]  ;;  %v1057_v33 = vcombine.high %v241_v26, %v241_v26 }
  0x64   : > { %2525 = vmatpush1.xpose.msra.mxu0 %v302_v48  ;;  %2595 = vmatpush1.xpose.msra.mxu1 %v304_v49  ;;  %v578_v48 = vld [vmem:[%s11865_s21 + $0x8e0] sm:$0x3]  ;;  %v580_v49 = vld [vmem:[%s11865_s21 + $0x8f0] sm:$0x3]  ;;  %v1023_v4 = vcombine.high %v239_v61, %v239_v61 }
  0x65   : > { %2662 = vmatprep.subr.mxu0 %v563_v50  ;;  %2732 = vmatprep.subr.mxu1 %v565_v52  ;;  %v323_v50 = vld [vmem:[%s11865_s21 + $0xe8] sm:$0xff]  ;;  %v325_v52 = vld [vmem:[%s11865_s21 + $0xf8] sm:$0xff] }
  0x67   : > { %2559 = vmatmul.mubr.f32.vlgmr.msra.gmra.mxu0 %v911_v37  ;;  %2629 = vmatmul.mubr.f32.vlgmr.msra.gmra.mxu1 %v918_v39  ;;  %v987_v37 = vcombine.high %v979_v30, %v979_v30  ;;  %v988_v39 = vcombine.high %v986_v32, %v986_v32 }
  0x68   : > { %2663 = vmatpush1.xpose.msra.mxu0 %v562_v55  ;;  %2733 = vmatpush1.xpose.msra.mxu1 %v564_v56  ;;  %v322_v55 = vld [vmem:[%s11865_s21 + $0xe0] sm:$0xff]  ;;  %v324_v56 = vld [vmem:[%s11865_s21 + $0xf0] sm:$0xff] }
  0x69   : > { %2664 = vmatprep.subr.mxu0 %v307_v57  ;;  %2734 = vmatprep.subr.mxu1 %v309_v59  ;;  %v583_v57 = vld [vmem:[%s11865_s21 + $0x908] sm:$0x3]  ;;  %v585_v59 = vld [vmem:[%s11865_s21 + $0x918] sm:$0x3] }
  0x6a   : > { %2698 = vmatprep.mubr.f32.mxu0 %v936_v58  ;;  %2768 = vmatprep.mubr.f32.mxu1 %v937_v60  ;;  %v1013_v58 = vrot.slane %v238_v47, %v11876_v5  ;;  %v1020_v60 = vrot.slane %v1006_v54, %v11876_v5  ;;  %v1074_v47 = vcombine.high %v242_v40, %v242_v40  ;;  %v243_v54 = vld [vmem:[%s11859_s30 + $0x68] sm:$0xff] }
  0x6c   : > { %2665 = vmatpush1.xpose.msra.mxu0 %v306_v62  ;;  %2735 = vmatpush1.xpose.msra.mxu1 %v308_v63  ;;  %v582_v62 = vld [vmem:[%s11865_s21 + $0x900] sm:$0x3]  ;;  %v584_v63 = vld [vmem:[%s11865_s21 + $0x910] sm:$0x3] }
  0x6d   : > { %2802 = vmatprep.subr.mxu0 %v567_v0  ;;  %2872 = vmatprep.subr.mxu1 %v569_v2  ;;  %v327_v0 = vld [vmem:[%s11865_s21 + $0x108] sm:$0xff]  ;;  %v329_v2 = vld [vmem:[%s11865_s21 + $0x118] sm:$0xff] }
  0x6f   : > { %2699 = vmatmul.mubr.f32.vlgmr.msra.gmra.mxu0 %v928_v51  ;;  %2769 = vmatmul.mubr.f32.vlgmr.msra.gmra.mxu1 %v935_v53  ;;  %v1004_v51 = vcombine.high %v996_v44, %v996_v44  ;;  %v1005_v53 = vcombine.high %v1003_v46, %v1003_v46 }
  0x70   : > { %2803 = vmatpush1.xpose.msra.mxu0 %v566_v6  ;;  %2873 = vmatpush1.xpose.msra.mxu1 %v568_v7  ;;  %v326_v6 = vld [vmem:[%s11865_s21 + $0x100] sm:$0xff]  ;;  %v328_v7 = vld [vmem:[%s11865_s21 + $0x110] sm:$0xff] }
  0x71   : > { %2804 = vmatprep.subr.mxu0 %v311_v8  ;;  %2874 = vmatprep.subr.mxu1 %v313_v10  ;;  %v587_v8 = vld [vmem:[%s11865_s21 + $0x928] sm:$0x3]  ;;  %v589_v10 = vld [vmem:[%s11865_s21 + $0x938] sm:$0x3] }
  0x72   : > { %2838 = vmatprep.mubr.f32.mxu0 %v953_v9  ;;  %2908 = vmatprep.mubr.f32.mxu1 %v954_v11  ;;  %v1030_v9 = vrot.slane %v239_v61, %v11876_v5  ;;  %v1037_v11 = vrot.slane %v1023_v4, %v11876_v5  ;;  %v1091_v61 = vcombine.high %v243_v54, %v243_v54  ;;  %v244_v4 = vld [vmem:[%s11859_s30 + $0x70] sm:$0xff] }
  0x74   : > { %2805 = vmatpush1.xpose.msra.mxu0 %v310_v13  ;;  %2875 = vmatpush1.xpose.msra.mxu1 %v312_v14  ;;  %v586_v13 = vld [vmem:[%s11865_s21 + $0x920] sm:$0x3]  ;;  %v588_v14 = vld [vmem:[%s11865_s21 + $0x930] sm:$0x3] }
  0x75   : > { %2942 = vmatprep.subr.mxu0 %v571_v15  ;;  %3012 = vmatprep.subr.mxu1 %v573_v17  ;;  %v331_v15 = vld [vmem:[%s11865_s21 + $0x128] sm:$0xff]  ;;  %v333_v17 = vld [vmem:[%s11865_s21 + $0x138] sm:$0xff] }
  0x77   : > { %2839 = vmatmul.mubr.f32.vlgmr.msra.gmra.mxu0 %v945_v1  ;;  %2909 = vmatmul.mubr.f32.vlgmr.msra.gmra.mxu1 %v952_v3  ;;  %v1021_v1 = vcombine.high %v1013_v58, %v1013_v58  ;;  %v1022_v3 = vcombine.high %v1020_v60, %v1020_v60 }
  0x78   : > { %2943 = vmatpush1.xpose.msra.mxu0 %v570_v20  ;;  %3013 = vmatpush1.xpose.msra.mxu1 %v572_v21  ;;  %v330_v20 = vld [vmem:[%s11865_s21 + $0x120] sm:$0xff]  ;;  %v332_v21 = vld [vmem:[%s11865_s21 + $0x130] sm:$0xff] }
  0x79   : > { %2944 = vmatprep.subr.mxu0 %v315_v22  ;;  %3014 = vmatprep.subr.mxu1 %v317_v24  ;;  %v591_v22 = vld [vmem:[%s11865_s21 + $0x948] sm:$0x3]  ;;  %v593_v24 = vld [vmem:[%s11865_s21 + $0x958] sm:$0x3] }
  0x7a   : > { %2978 = vmatprep.mubr.f32.mxu0 %v970_v23  ;;  %3048 = vmatprep.mubr.f32.mxu1 %v971_v25  ;;  %v1047_v23 = vrot.slane %v240_v12, %v11876_v5  ;;  %v1054_v25 = vrot.slane %v1040_v19, %v11876_v5  ;;  %v1108_v12 = vcombine.high %v244_v4, %v244_v4  ;;  %v245_v19 = vld [vmem:[%s11859_s30 + $0x78] sm:$0xff] }
  0x7c   : > { %2945 = vmatpush1.xpose.msra.mxu0 %v314_v27  ;;  %3015 = vmatpush1.xpose.msra.mxu1 %v316_v28  ;;  %v590_v27 = vld [vmem:[%s11865_s21 + $0x940] sm:$0x3]  ;;  %v592_v28 = vld [vmem:[%s11865_s21 + $0x950] sm:$0x3] }
  0x7d   : > { %3082 = vmatprep.subr.mxu0 %v575_v29  ;;  %3152 = vmatprep.subr.mxu1 %v577_v31  ;;  %v335_v29 = vld [vmem:[%s11865_s21 + $0x148] sm:$0xff]  ;;  %v337_v31 = vld [vmem:[%s11865_s21 + $0x158] sm:$0xff] }
  0x7f   : > { %2979 = vmatmul.mubr.f32.vlgmr.msra.gmra.mxu0 %v962_v16  ;;  %3049 = vmatmul.mubr.f32.vlgmr.msra.gmra.mxu1 %v969_v18  ;;  %v1038_v16 = vcombine.high %v1030_v9, %v1030_v9  ;;  %v1039_v18 = vcombine.high %v1037_v11, %v1037_v11 }
  0x80   : > { %3083 = vmatpush1.xpose.msra.mxu0 %v574_v34  ;;  %3153 = vmatpush1.xpose.msra.mxu1 %v576_v35  ;;  %v334_v34 = vld [vmem:[%s11865_s21 + $0x140] sm:$0xff]  ;;  %v336_v35 = vld [vmem:[%s11865_s21 + $0x150] sm:$0xff] }
  0x81   : > { %3084 = vmatprep.subr.mxu0 %v319_v36  ;;  %3154 = vmatprep.subr.mxu1 %v321_v38  ;;  %v595_v36 = vld [vmem:[%s11865_s21 + $0x968] sm:$0x3]  ;;  %v597_v38 = vld [vmem:[%s11865_s21 + $0x978] sm:$0x3] }
  0x82   : > { %3118 = vmatprep.mubr.f32.mxu0 %v987_v37  ;;  %3188 = vmatprep.mubr.f32.mxu1 %v988_v39  ;;  %v1064_v37 = vrot.slane %v241_v26, %v11876_v5  ;;  %v1071_v39 = vrot.slane %v1057_v33, %v11876_v5  ;;  %v1125_v26 = vcombine.high %v245_v19, %v245_v19  ;;  %v246_v33 = vld [vmem:[%s11859_s30 + $0x80] sm:$0xff] }
  0x84   : > { %3085 = vmatpush1.xpose.msra.mxu0 %v318_v41  ;;  %3155 = vmatpush1.xpose.msra.mxu1 %v320_v42  ;;  %v594_v41 = vld [vmem:[%s11865_s21 + $0x960] sm:$0x3]  ;;  %v596_v42 = vld [vmem:[%s11865_s21 + $0x970] sm:$0x3] }
  0x85   : > { %3222 = vmatprep.subr.mxu0 %v579_v43  ;;  %3292 = vmatprep.subr.mxu1 %v581_v45  ;;  %v339_v43 = vld [vmem:[%s11865_s21 + $0x168] sm:$0xff]  ;;  %v341_v45 = vld [vmem:[%s11865_s21 + $0x178] sm:$0xff] }
  0x87   : > { %3119 = vmatmul.mubr.f32.vlgmr.msra.gmra.mxu0 %v979_v30  ;;  %3189 = vmatmul.mubr.f32.vlgmr.msra.gmra.mxu1 %v986_v32  ;;  %v1055_v30 = vcombine.high %v1047_v23, %v1047_v23  ;;  %v1056_v32 = vcombine.high %v1054_v25, %v1054_v25 }
  0x88   : > { %3223 = vmatpush1.xpose.msra.mxu0 %v578_v48  ;;  %3293 = vmatpush1.xpose.msra.mxu1 %v580_v49  ;;  %v338_v48 = vld [vmem:[%s11865_s21 + $0x160] sm:$0xff]  ;;  %v340_v49 = vld [vmem:[%s11865_s21 + $0x170] sm:$0xff] }
  0x89   : > { %3224 = vmatprep.subr.mxu0 %v323_v50  ;;  %3294 = vmatprep.subr.mxu1 %v325_v52  ;;  %v599_v50 = vld [vmem:[%s11865_s21 + $0x988] sm:$0x3]  ;;  %v601_v52 = vld [vmem:[%s11865_s21 + $0x998] sm:$0x3] }
  0x8a   : > { %3258 = vmatprep.mubr.f32.mxu0 %v1004_v51  ;;  %3328 = vmatprep.mubr.f32.mxu1 %v1005_v53  ;;  %v1081_v51 = vrot.slane %v242_v40, %v11876_v5  ;;  %v1088_v53 = vrot.slane %v1074_v47, %v11876_v5  ;;  %v1142_v40 = vcombine.high %v246_v33, %v246_v33  ;;  %v247_v47 = vld [vmem:[%s11859_s30 + $0x88] sm:$0xff] }
  0x8c   : > { %3225 = vmatpush1.xpose.msra.mxu0 %v322_v55  ;;  %3295 = vmatpush1.xpose.msra.mxu1 %v324_v56  ;;  %v598_v55 = vld [vmem:[%s11865_s21 + $0x980] sm:$0x3]  ;;  %v600_v56 = vld [vmem:[%s11865_s21 + $0x990] sm:$0x3] }
  0x8d   : > { %3362 = vmatprep.subr.mxu0 %v583_v57  ;;  %3432 = vmatprep.subr.mxu1 %v585_v59  ;;  %v343_v57 = vld [vmem:[%s11865_s21 + $0x188] sm:$0xff]  ;;  %v345_v59 = vld [vmem:[%s11865_s21 + $0x198] sm:$0xff] }
  0x8f   : > { %3259 = vmatmul.mubr.f32.vlgmr.msra.gmra.mxu0 %v996_v44  ;;  %3329 = vmatmul.mubr.f32.vlgmr.msra.gmra.mxu1 %v1003_v46  ;;  %v1072_v44 = vcombine.high %v1064_v37, %v1064_v37  ;;  %v1073_v46 = vcombine.high %v1071_v39, %v1071_v39 }
  0x90   : > { %3363 = vmatpush1.xpose.msra.mxu0 %v582_v62  ;;  %3433 = vmatpush1.xpose.msra.mxu1 %v584_v63  ;;  %v342_v62 = vld [vmem:[%s11865_s21 + $0x180] sm:$0xff]  ;;  %v344_v63 = vld [vmem:[%s11865_s21 + $0x190] sm:$0xff] }
  0x91   : > { %3364 = vmatprep.subr.mxu0 %v327_v0  ;;  %3434 = vmatprep.subr.mxu1 %v329_v2  ;;  %v603_v0 = vld [vmem:[%s11865_s21 + $0x9a8] sm:$0x3]  ;;  %v605_v2 = vld [vmem:[%s11865_s21 + $0x9b8] sm:$0x3] }
  0x92   : > { %3398 = vmatprep.mubr.f32.mxu0 %v1021_v1  ;;  %3468 = vmatprep.mubr.f32.mxu1 %v1022_v3  ;;  %v1098_v1 = vrot.slane %v243_v54, %v11876_v5  ;;  %v1105_v3 = vrot.slane %v1091_v61, %v11876_v5  ;;  %v1159_v54 = vcombine.high %v247_v47, %v247_v47  ;;  %v248_v61 = vld [vmem:[%s11859_s30 + $0x90] sm:$0xff] }
  0x94   : > { %3365 = vmatpush1.xpose.msra.mxu0 %v326_v6  ;;  %3435 = vmatpush1.xpose.msra.mxu1 %v328_v7  ;;  %v602_v6 = vld [vmem:[%s11865_s21 + $0x9a0] sm:$0x3]  ;;  %v604_v7 = vld [vmem:[%s11865_s21 + $0x9b0] sm:$0x3] }
  0x95   : > { %3502 = vmatprep.subr.mxu0 %v587_v8  ;;  %3572 = vmatprep.subr.mxu1 %v589_v10  ;;  %v347_v8 = vld [vmem:[%s11865_s21 + $0x1a8] sm:$0xff]  ;;  %v349_v10 = vld [vmem:[%s11865_s21 + $0x1b8] sm:$0xff] }
  0x97   : > { %3399 = vmatmul.mubr.f32.vlgmr.msra.gmra.mxu0 %v1013_v58  ;;  %3469 = vmatmul.mubr.f32.vlgmr.msra.gmra.mxu1 %v1020_v60  ;;  %v1089_v58 = vcombine.high %v1081_v51, %v1081_v51  ;;  %v1090_v60 = vcombine.high %v1088_v53, %v1088_v53 }
  0x98   : > { %3503 = vmatpush1.xpose.msra.mxu0 %v586_v13  ;;  %3573 = vmatpush1.xpose.msra.mxu1 %v588_v14  ;;  %v346_v13 = vld [vmem:[%s11865_s21 + $0x1a0] sm:$0xff]  ;;  %v348_v14 = vld [vmem:[%s11865_s21 + $0x1b0] sm:$0xff] }
  0x99   : > { %3504 = vmatprep.subr.mxu0 %v331_v15  ;;  %3574 = vmatprep.subr.mxu1 %v333_v17  ;;  %v607_v15 = vld [vmem:[%s11865_s21 + $0x9c8] sm:$0x3]  ;;  %v609_v17 = vld [vmem:[%s11865_s21 + $0x9d8] sm:$0x3] }
  0x9a   : > { %3538 = vmatprep.mubr.f32.mxu0 %v1038_v16  ;;  %3608 = vmatprep.mubr.f32.mxu1 %v1039_v18  ;;  %v1115_v16 = vrot.slane %v244_v4, %v11876_v5  ;;  %v1122_v18 = vrot.slane %v1108_v12, %v11876_v5  ;;  %v1176_v4 = vcombine.high %v248_v61, %v248_v61  ;;  %v249_v12 = vld [vmem:[%s11859_s30 + $0x98] sm:$0xff] }
  0x9c   : > { %3505 = vmatpush1.xpose.msra.mxu0 %v330_v20  ;;  %3575 = vmatpush1.xpose.msra.mxu1 %v332_v21  ;;  %v606_v20 = vld [vmem:[%s11865_s21 + $0x9c0] sm:$0x3]  ;;  %v608_v21 = vld [vmem:[%s11865_s21 + $0x9d0] sm:$0x3] }
  0x9d   : > { %3642 = vmatprep.subr.mxu0 %v591_v22  ;;  %3712 = vmatprep.subr.mxu1 %v593_v24  ;;  %v351_v22 = vld [vmem:[%s11865_s21 + $0x1c8] sm:$0xff]  ;;  %v353_v24 = vld [vmem:[%s11865_s21 + $0x1d8] sm:$0xff] }
  0x9f   : > { %3539 = vmatmul.mubr.f32.vlgmr.msra.gmra.mxu0 %v1030_v9  ;;  %3609 = vmatmul.mubr.f32.vlgmr.msra.gmra.mxu1 %v1037_v11  ;;  %v1106_v9 = vcombine.high %v1098_v1, %v1098_v1  ;;  %v1107_v11 = vcombine.high %v1105_v3, %v1105_v3 }
  0xa0   : > { %3643 = vmatpush1.xpose.msra.mxu0 %v590_v27  ;;  %3713 = vmatpush1.xpose.msra.mxu1 %v592_v28  ;;  %v350_v27 = vld [vmem:[%s11865_s21 + $0x1c0] sm:$0xff]  ;;  %v352_v28 = vld [vmem:[%s11865_s21 + $0x1d0] sm:$0xff] }
  0xa1   : > { %3644 = vmatprep.subr.mxu0 %v335_v29  ;;  %3714 = vmatprep.subr.mxu1 %v337_v31  ;;  %v611_v29 = vld [vmem:[%s11865_s21 + $0x9e8] sm:$0x3]  ;;  %v613_v31 = vld [vmem:[%s11865_s21 + $0x9f8] sm:$0x3] }
  0xa2   : > { %3678 = vmatprep.mubr.f32.mxu0 %v1055_v30  ;;  %3748 = vmatprep.mubr.f32.mxu1 %v1056_v32  ;;  %v1132_v30 = vrot.slane %v245_v19, %v11876_v5  ;;  %v1139_v32 = vrot.slane %v1125_v26, %v11876_v5  ;;  %v1193_v19 = vcombine.high %v249_v12, %v249_v12  ;;  %v250_v26 = vld [vmem:[%s11859_s30 + $0xa0] sm:$0xff] }
  0xa4   : > { %3645 = vmatpush1.xpose.msra.mxu0 %v334_v34  ;;  %3715 = vmatpush1.xpose.msra.mxu1 %v336_v35  ;;  %v610_v34 = vld [vmem:[%s11865_s21 + $0x9e0] sm:$0x3]  ;;  %v612_v35 = vld [vmem:[%s11865_s21 + $0x9f0] sm:$0x3] }
  0xa5   : > { %3782 = vmatprep.subr.mxu0 %v595_v36  ;;  %3852 = vmatprep.subr.mxu1 %v597_v38  ;;  %v355_v36 = vld [vmem:[%s11865_s21 + $0x1e8] sm:$0xff]  ;;  %v357_v38 = vld [vmem:[%s11865_s21 + $0x1f8] sm:$0xff] }
  0xa7   : > { %3679 = vmatmul.mubr.f32.vlgmr.msra.gmra.mxu0 %v1047_v23  ;;  %3749 = vmatmul.mubr.f32.vlgmr.msra.gmra.mxu1 %v1054_v25  ;;  %v1123_v23 = vcombine.high %v1115_v16, %v1115_v16  ;;  %v1124_v25 = vcombine.high %v1122_v18, %v1122_v18 }
  0xa8   : > { %3783 = vmatpush1.xpose.msra.mxu0 %v594_v41  ;;  %3853 = vmatpush1.xpose.msra.mxu1 %v596_v42  ;;  %v354_v41 = vld [vmem:[%s11865_s21 + $0x1e0] sm:$0xff]  ;;  %v356_v42 = vld [vmem:[%s11865_s21 + $0x1f0] sm:$0xff] }
  0xa9   : > { %3784 = vmatprep.subr.mxu0 %v339_v43  ;;  %3854 = vmatprep.subr.mxu1 %v341_v45  ;;  %v615_v43 = vld [vmem:[%s11865_s21 + $0xa08] sm:$0x3]  ;;  %v617_v45 = vld [vmem:[%s11865_s21 + $0xa18] sm:$0x3] }
  0xaa   : > { %3818 = vmatprep.mubr.f32.mxu0 %v1072_v44  ;;  %3888 = vmatprep.mubr.f32.mxu1 %v1073_v46  ;;  %v1149_v44 = vrot.slane %v246_v33, %v11876_v5  ;;  %v1156_v46 = vrot.slane %v1142_v40, %v11876_v5  ;;  %v1210_v33 = vcombine.high %v250_v26, %v250_v26  ;;  %v251_v40 = vld [vmem:[%s11859_s30 + $0xa8] sm:$0xff] }
  0xac   : > { %3785 = vmatpush1.xpose.msra.mxu0 %v338_v48  ;;  %3855 = vmatpush1.xpose.msra.mxu1 %v340_v49  ;;  %v614_v48 = vld [vmem:[%s11865_s21 + $0xa00] sm:$0x3]  ;;  %v616_v49 = vld [vmem:[%s11865_s21 + $0xa10] sm:$0x3] }
  0xad   : > { %3922 = vmatprep.subr.mxu0 %v599_v50  ;;  %3992 = vmatprep.subr.mxu1 %v601_v52  ;;  %v359_v50 = vld [vmem:[%s11865_s21 + $0x208] sm:$0xff]  ;;  %v361_v52 = vld [vmem:[%s11865_s21 + $0x218] sm:$0xff] }
  0xaf   : > { %3819 = vmatmul.mubr.f32.vlgmr.msra.gmra.mxu0 %v1064_v37  ;;  %3889 = vmatmul.mubr.f32.vlgmr.msra.gmra.mxu1 %v1071_v39  ;;  %v1140_v37 = vcombine.high %v1132_v30, %v1132_v30  ;;  %v1141_v39 = vcombine.high %v1139_v32, %v1139_v32 }
  0xb0   : > { %3923 = vmatpush1.xpose.msra.mxu0 %v598_v55  ;;  %3993 = vmatpush1.xpose.msra.mxu1 %v600_v56  ;;  %v358_v55 = vld [vmem:[%s11865_s21 + $0x200] sm:$0xff]  ;;  %v360_v56 = vld [vmem:[%s11865_s21 + $0x210] sm:$0xff] }
  0xb1   : > { %3924 = vmatprep.subr.mxu0 %v343_v57  ;;  %3994 = vmatprep.subr.mxu1 %v345_v59  ;;  %v619_v57 = vld [vmem:[%s11865_s21 + $0xa28] sm:$0x3]  ;;  %v621_v59 = vld [vmem:[%s11865_s21 + $0xa38] sm:$0x3] }
  0xb2   : > { %3958 = vmatprep.mubr.f32.mxu0 %v1089_v58  ;;  %4028 = vmatprep.mubr.f32.mxu1 %v1090_v60  ;;  %v1166_v58 = vrot.slane %v247_v47, %v11876_v5  ;;  %v1173_v60 = vrot.slane %v1159_v54, %v11876_v5  ;;  %v1227_v47 = vcombine.high %v251_v40, %v251_v40  ;;  %v252_v54 = vld [vmem:[%s11859_s30 + $0xb0] sm:$0xff] }
  0xb4   : > { %3925 = vmatpush1.xpose.msra.mxu0 %v342_v62  ;;  %3995 = vmatpush1.xpose.msra.mxu1 %v344_v63  ;;  %v618_v62 = vld [vmem:[%s11865_s21 + $0xa20] sm:$0x3]  ;;  %v620_v63 = vld [vmem:[%s11865_s21 + $0xa30] sm:$0x3] }
  0xb5   : > { %4062 = vmatprep.subr.mxu0 %v603_v0  ;;  %4132 = vmatprep.subr.mxu1 %v605_v2  ;;  %v363_v0 = vld [vmem:[%s11865_s21 + $0x228] sm:$0xff]  ;;  %v365_v2 = vld [vmem:[%s11865_s21 + $0x238] sm:$0xff] }
  0xb7   : > { %3959 = vmatmul.mubr.f32.vlgmr.msra.gmra.mxu0 %v1081_v51  ;;  %4029 = vmatmul.mubr.f32.vlgmr.msra.gmra.mxu1 %v1088_v53  ;;  %v1157_v51 = vcombine.high %v1149_v44, %v1149_v44  ;;  %v1158_v53 = vcombine.high %v1156_v46, %v1156_v46 }
  0xb8   : > { %4063 = vmatpush1.xpose.msra.mxu0 %v602_v6  ;;  %4133 = vmatpush1.xpose.msra.mxu1 %v604_v7  ;;  %v362_v6 = vld [vmem:[%s11865_s21 + $0x220] sm:$0xff]  ;;  %v364_v7 = vld [vmem:[%s11865_s21 + $0x230] sm:$0xff] }
  0xb9   : > { %4064 = vmatprep.subr.mxu0 %v347_v8  ;;  %4134 = vmatprep.subr.mxu1 %v349_v10  ;;  %v623_v8 = vld [vmem:[%s11865_s21 + $0xa48] sm:$0x3]  ;;  %v625_v10 = vld [vmem:[%s11865_s21 + $0xa58] sm:$0x3] }
  0xba   : > { %4098 = vmatprep.mubr.f32.mxu0 %v1106_v9  ;;  %4168 = vmatprep.mubr.f32.mxu1 %v1107_v11  ;;  %v1183_v9 = vrot.slane %v248_v61, %v11876_v5  ;;  %v1190_v11 = vrot.slane %v1176_v4, %v11876_v5  ;;  %v1244_v61 = vcombine.high %v252_v54, %v252_v54  ;;  %v253_v4 = vld [vmem:[%s11859_s30 + $0xb8] sm:$0xff] }
  0xbc   : > { %4065 = vmatpush1.xpose.msra.mxu0 %v346_v13  ;;  %4135 = vmatpush1.xpose.msra.mxu1 %v348_v14  ;;  %v622_v13 = vld [vmem:[%s11865_s21 + $0xa40] sm:$0x3]  ;;  %v624_v14 = vld [vmem:[%s11865_s21 + $0xa50] sm:$0x3] }
  0xbd   : > { %4202 = vmatprep.subr.mxu0 %v607_v15  ;;  %4272 = vmatprep.subr.mxu1 %v609_v17  ;;  %v367_v15 = vld [vmem:[%s11865_s21 + $0x248] sm:$0xff]  ;;  %v369_v17 = vld [vmem:[%s11865_s21 + $0x258] sm:$0xff] }
  0xbf   : > { %4099 = vmatmul.mubr.f32.vlgmr.msra.gmra.mxu0 %v1098_v1  ;;  %4169 = vmatmul.mubr.f32.vlgmr.msra.gmra.mxu1 %v1105_v3  ;;  %v1174_v1 = vcombine.high %v1166_v58, %v1166_v58  ;;  %v1175_v3 = vcombine.high %v1173_v60, %v1173_v60 }
  0xc0   : > { %4203 = vmatpush1.xpose.msra.mxu0 %v606_v20  ;;  %4273 = vmatpush1.xpose.msra.mxu1 %v608_v21  ;;  %v366_v20 = vld [vmem:[%s11865_s21 + $0x240] sm:$0xff]  ;;  %v368_v21 = vld [vmem:[%s11865_s21 + $0x250] sm:$0xff] }
  0xc1   : > { %4204 = vmatprep.subr.mxu0 %v351_v22  ;;  %4274 = vmatprep.subr.mxu1 %v353_v24  ;;  %v627_v22 = vld [vmem:[%s11865_s21 + $0xa68] sm:$0x3]  ;;  %v629_v24 = vld [vmem:[%s11865_s21 + $0xa78] sm:$0x3] }
  0xc2   : > { %4238 = vmatprep.mubr.f32.mxu0 %v1123_v23  ;;  %4308 = vmatprep.mubr.f32.mxu1 %v1124_v25  ;;  %v1200_v23 = vrot.slane %v249_v12, %v11876_v5  ;;  %v1207_v25 = vrot.slane %v1193_v19, %v11876_v5  ;;  %v1261_v12 = vcombine.high %v253_v4, %v253_v4  ;;  %v254_v19 = vld [vmem:[%s11859_s30 + $0xc0] sm:$0xff] }
  0xc4   : > { %4205 = vmatpush1.xpose.msra.mxu0 %v350_v27  ;;  %4275 = vmatpush1.xpose.msra.mxu1 %v352_v28  ;;  %v626_v27 = vld [vmem:[%s11865_s21 + $0xa60] sm:$0x3]  ;;  %v628_v28 = vld [vmem:[%s11865_s21 + $0xa70] sm:$0x3] }
  0xc5   : > { %4342 = vmatprep.subr.mxu0 %v611_v29  ;;  %4412 = vmatprep.subr.mxu1 %v613_v31  ;;  %v371_v29 = vld [vmem:[%s11865_s21 + $0x268] sm:$0xff]  ;;  %v373_v31 = vld [vmem:[%s11865_s21 + $0x278] sm:$0xff] }
  0xc7   : > { %4239 = vmatmul.mubr.f32.vlgmr.msra.gmra.mxu0 %v1115_v16  ;;  %4309 = vmatmul.mubr.f32.vlgmr.msra.gmra.mxu1 %v1122_v18  ;;  %v1191_v16 = vcombine.high %v1183_v9, %v1183_v9  ;;  %v1192_v18 = vcombine.high %v1190_v11, %v1190_v11 }
  0xc8   : > { %4343 = vmatpush1.xpose.msra.mxu0 %v610_v34  ;;  %4413 = vmatpush1.xpose.msra.mxu1 %v612_v35  ;;  %v370_v34 = vld [vmem:[%s11865_s21 + $0x260] sm:$0xff]  ;;  %v372_v35 = vld [vmem:[%s11865_s21 + $0x270] sm:$0xff] }
  0xc9   : > { %4344 = vmatprep.subr.mxu0 %v355_v36  ;;  %4414 = vmatprep.subr.mxu1 %v357_v38  ;;  %v631_v36 = vld [vmem:[%s11865_s21 + $0xa88] sm:$0x3]  ;;  %v633_v38 = vld [vmem:[%s11865_s21 + $0xa98] sm:$0x3] }
  0xca   : > { %4378 = vmatprep.mubr.f32.mxu0 %v1140_v37  ;;  %4448 = vmatprep.mubr.f32.mxu1 %v1141_v39  ;;  %v1217_v37 = vrot.slane %v250_v26, %v11876_v5  ;;  %v1224_v39 = vrot.slane %v1210_v33, %v11876_v5  ;;  %v1278_v26 = vcombine.high %v254_v19, %v254_v19  ;;  %v255_v33 = vld [vmem:[%s11859_s30 + $0xc8] sm:$0xff] }
  0xcc   : > { %4345 = vmatpush1.xpose.msra.mxu0 %v354_v41  ;;  %4415 = vmatpush1.xpose.msra.mxu1 %v356_v42  ;;  %v630_v41 = vld [vmem:[%s11865_s21 + $0xa80] sm:$0x3]  ;;  %v632_v42 = vld [vmem:[%s11865_s21 + $0xa90] sm:$0x3] }
  0xcd   : > { %4482 = vmatprep.subr.mxu0 %v615_v43  ;;  %4552 = vmatprep.subr.mxu1 %v617_v45  ;;  %v375_v43 = vld [vmem:[%s11865_s21 + $0x288] sm:$0xff]  ;;  %v377_v45 = vld [vmem:[%s11865_s21 + $0x298] sm:$0xff] }
  0xcf   : > { %4379 = vmatmul.mubr.f32.vlgmr.msra.gmra.mxu0 %v1132_v30  ;;  %4449 = vmatmul.mubr.f32.vlgmr.msra.gmra.mxu1 %v1139_v32  ;;  %v1208_v30 = vcombine.high %v1200_v23, %v1200_v23  ;;  %v1209_v32 = vcombine.high %v1207_v25, %v1207_v25 }
  0xd0   : > { %4483 = vmatpush1.xpose.msra.mxu0 %v614_v48  ;;  %4553 = vmatpush1.xpose.msra.mxu1 %v616_v49  ;;  %v374_v48 = vld [vmem:[%s11865_s21 + $0x280] sm:$0xff]  ;;  %v376_v49 = vld [vmem:[%s11865_s21 + $0x290] sm:$0xff] }
  0xd1   : > { %4484 = vmatprep.subr.mxu0 %v359_v50  ;;  %4554 = vmatprep.subr.mxu1 %v361_v52  ;;  %v635_v50 = vld [vmem:[%s11865_s21 + $0xaa8] sm:$0x3]  ;;  %v637_v52 = vld [vmem:[%s11865_s21 + $0xab8] sm:$0x3] }
  0xd2   : > { %4518 = vmatprep.mubr.f32.mxu0 %v1157_v51  ;;  %4588 = vmatprep.mubr.f32.mxu1 %v1158_v53  ;;  %v1234_v51 = vrot.slane %v251_v40, %v11876_v5  ;;  %v1241_v53 = vrot.slane %v1227_v47, %v11876_v5  ;;  %v1295_v40 = vcombine.high %v255_v33, %v255_v33  ;;  %v256_v47 = vld [vmem:[%s11859_s30 + $0xd0] sm:$0xff] }
  0xd4   : > { %4485 = vmatpush1.xpose.msra.mxu0 %v358_v55  ;;  %4555 = vmatpush1.xpose.msra.mxu1 %v360_v56  ;;  %v634_v55 = vld [vmem:[%s11865_s21 + $0xaa0] sm:$0x3]  ;;  %v636_v56 = vld [vmem:[%s11865_s21 + $0xab0] sm:$0x3] }
  0xd5   : > { %4622 = vmatprep.subr.mxu0 %v619_v57  ;;  %4692 = vmatprep.subr.mxu1 %v621_v59  ;;  %v379_v57 = vld [vmem:[%s11865_s21 + $0x2a8] sm:$0xff]  ;;  %v381_v59 = vld [vmem:[%s11865_s21 + $0x2b8] sm:$0xff] }
  0xd7   : > { %4519 = vmatmul.mubr.f32.vlgmr.msra.gmra.mxu0 %v1149_v44  ;;  %4589 = vmatmul.mubr.f32.vlgmr.msra.gmra.mxu1 %v1156_v46  ;;  %v1225_v44 = vcombine.high %v1217_v37, %v1217_v37  ;;  %v1226_v46 = vcombine.high %v1224_v39, %v1224_v39 }
  0xd8   : > { %4623 = vmatpush1.xpose.msra.mxu0 %v618_v62  ;;  %4693 = vmatpush1.xpose.msra.mxu1 %v620_v63  ;;  %v378_v62 = vld [vmem:[%s11865_s21 + $0x2a0] sm:$0xff]  ;;  %v380_v63 = vld [vmem:[%s11865_s21 + $0x2b0] sm:$0xff] }
  0xd9   : > { %4624 = vmatprep.subr.mxu0 %v363_v0  ;;  %4694 = vmatprep.subr.mxu1 %v365_v2  ;;  %v639_v0 = vld [vmem:[%s11865_s21 + $0xac8] sm:$0x3]  ;;  %v641_v2 = vld [vmem:[%s11865_s21 + $0xad8] sm:$0x3] }
  0xda   : > { %4658 = vmatprep.mubr.f32.mxu0 %v1174_v1  ;;  %4728 = vmatprep.mubr.f32.mxu1 %v1175_v3  ;;  %v1251_v1 = vrot.slane %v252_v54, %v11876_v5  ;;  %v1258_v3 = vrot.slane %v1244_v61, %v11876_v5  ;;  %v396_v61 = vld [vmem:[%s11865_s21 + $0x330] sm:$0xff] }
  0xdc   : > { %4625 = vmatpush1.xpose.msra.mxu0 %v362_v6  ;;  %4695 = vmatpush1.xpose.msra.mxu1 %v364_v7  ;;  %v638_v6 = vld [vmem:[%s11865_s21 + $0xac0] sm:$0x3]  ;;  %v640_v7 = vld [vmem:[%s11865_s21 + $0xad0] sm:$0x3] }
  0xdd   : > { %4762 = vmatprep.subr.mxu0 %v623_v8  ;;  %4832 = vmatprep.subr.mxu1 %v625_v10  ;;  %v383_v8 = vld [vmem:[%s11865_s21 + $0x2c8] sm:$0xff]  ;;  %v385_v10 = vld [vmem:[%s11865_s21 + $0x2d8] sm:$0xff] }
  0xdf   : > { %4659 = vmatmul.mubr.f32.vlgmr.msra.gmra.mxu0 %v1166_v58  ;;  %4729 = vmatmul.mubr.f32.vlgmr.msra.gmra.mxu1 %v1173_v60  ;;  %v1242_v58 = vcombine.high %v1234_v51, %v1234_v51  ;;  %v1243_v60 = vcombine.high %v1241_v53, %v1241_v53 }
  0xe0   : > { %4763 = vmatpush1.xpose.msra.mxu0 %v622_v13  ;;  %4833 = vmatpush1.xpose.msra.mxu1 %v624_v14  ;;  %v382_v13 = vld [vmem:[%s11865_s21 + $0x2c0] sm:$0xff]  ;;  %v384_v14 = vld [vmem:[%s11865_s21 + $0x2d0] sm:$0xff] }
  0xe1   : > { %4764 = vmatprep.subr.mxu0 %v367_v15  ;;  %4834 = vmatprep.subr.mxu1 %v369_v17  ;;  %v643_v15 = vld [vmem:[%s11865_s21 + $0xae8] sm:$0x3]  ;;  %v645_v17 = vld [vmem:[%s11865_s21 + $0xaf8] sm:$0x3] }
  0xe2   : > { %4798 = vmatprep.mubr.f32.mxu0 %v1191_v16  ;;  %4868 = vmatprep.mubr.f32.mxu1 %v1192_v18  ;;  %v1268_v16 = vrot.slane %v253_v4, %v11876_v5  ;;  %v1275_v18 = vrot.slane %v1261_v12, %v11876_v5  ;;  %v656_v4 = vld [vmem:[%s11865_s21 + $0xb50] sm:$0x3] }
  0xe4   : > { %4765 = vmatpush1.xpose.msra.mxu0 %v366_v20  ;;  %4835 = vmatpush1.xpose.msra.mxu1 %v368_v21  ;;  %v642_v20 = vld [vmem:[%s11865_s21 + $0xae0] sm:$0x3]  ;;  %v644_v21 = vld [vmem:[%s11865_s21 + $0xaf0] sm:$0x3] }
  0xe5   : > { %4902 = vmatprep.subr.mxu0 %v627_v22  ;;  %4972 = vmatprep.subr.mxu1 %v629_v24  ;;  %v387_v22 = vld [vmem:[%s11865_s21 + $0x2e8] sm:$0xff]  ;;  %v389_v24 = vld [vmem:[%s11865_s21 + $0x2f8] sm:$0xff] }
  0xe7   : > { %4799 = vmatmul.mubr.f32.vlgmr.msra.gmra.mxu0 %v1183_v9  ;;  %4869 = vmatmul.mubr.f32.vlgmr.msra.gmra.mxu1 %v1190_v11  ;;  %v1259_v9 = vcombine.high %v1251_v1, %v1251_v1  ;;  %v1260_v11 = vcombine.high %v1258_v3, %v1258_v3 }
  0xe8   : > { %4903 = vmatpush1.xpose.msra.mxu0 %v626_v27  ;;  %4973 = vmatpush1.xpose.msra.mxu1 %v628_v28  ;;  %v386_v27 = vld [vmem:[%s11865_s21 + $0x2e0] sm:$0xff]  ;;  %v388_v28 = vld [vmem:[%s11865_s21 + $0x2f0] sm:$0xff] }
  0xe9   : > { %4904 = vmatprep.subr.mxu0 %v371_v29  ;;  %4974 = vmatprep.subr.mxu1 %v373_v31  ;;  %v647_v29 = vld [vmem:[%s11865_s21 + $0xb08] sm:$0x3]  ;;  %v649_v31 = vld [vmem:[%s11865_s21 + $0xb18] sm:$0x3] }
  0xea   : > { %4938 = vmatprep.mubr.f32.mxu0 %v1208_v30  ;;  %5008 = vmatprep.mubr.f32.mxu1 %v1209_v32  ;;  %v1285_v30 = vrot.slane %v254_v19, %v11876_v5  ;;  %v1292_v32 = vrot.slane %v1278_v26, %v11876_v5  ;;  %v659_v19 = vld [vmem:[%s11865_s21 + $0xb68] sm:$0x3] }
  0xeb   : > { %v403_v26 = vld [vmem:[%s11865_s21 + $0x368] sm:$0xff] }
  0xec   : > { %4905 = vmatpush1.xpose.msra.mxu0 %v370_v34  ;;  %4975 = vmatpush1.xpose.msra.mxu1 %v372_v35  ;;  %v646_v34 = vld [vmem:[%s11865_s21 + $0xb00] sm:$0x3]  ;;  %v648_v35 = vld [vmem:[%s11865_s21 + $0xb10] sm:$0x3] }
  0xed   : > { %5042 = vmatprep.subr.mxu0 %v631_v36  ;;  %5112 = vmatprep.subr.mxu1 %v633_v38  ;;  %v391_v36 = vld [vmem:[%s11865_s21 + $0x308] sm:$0xff]  ;;  %v393_v38 = vld [vmem:[%s11865_s21 + $0x318] sm:$0xff] }
  0xef   : > { %4939 = vmatmul.mubr.f32.vlgmr.msra.gmra.mxu0 %v1200_v23  ;;  %5009 = vmatmul.mubr.f32.vlgmr.msra.gmra.mxu1 %v1207_v25  ;;  %v1276_v23 = vcombine.high %v1268_v16, %v1268_v16  ;;  %v1277_v25 = vcombine.high %v1275_v18, %v1275_v18 }
  0xf0   : > { %5043 = vmatpush1.xpose.msra.mxu0 %v630_v41  ;;  %5113 = vmatpush1.xpose.msra.mxu1 %v632_v42  ;;  %v390_v41 = vld [vmem:[%s11865_s21 + $0x300] sm:$0xff]  ;;  %v392_v42 = vld [vmem:[%s11865_s21 + $0x310] sm:$0xff] }
  0xf1   : > { %5044 = vmatprep.subr.mxu0 %v375_v43  ;;  %5114 = vmatprep.subr.mxu1 %v377_v45  ;;  %v651_v43 = vld [vmem:[%s11865_s21 + $0xb28] sm:$0x3]  ;;  %v653_v45 = vld [vmem:[%s11865_s21 + $0xb38] sm:$0x3] }
  0xf2   : > { %5078 = vmatprep.mubr.f32.mxu0 %v1225_v44  ;;  %5148 = vmatprep.mubr.f32.mxu1 %v1226_v46  ;;  %v1302_v44 = vrot.slane %v255_v33, %v11876_v5  ;;  %v1309_v46 = vrot.slane %v1295_v40, %v11876_v5 }
  0xf4   : > { %5045 = vmatpush1.xpose.msra.mxu0 %v374_v48  ;;  %5115 = vmatpush1.xpose.msra.mxu1 %v376_v49  ;;  %v650_v48 = vld [vmem:[%s11865_s21 + $0xb20] sm:$0x3]  ;;  %v652_v49 = vld [vmem:[%s11865_s21 + $0xb30] sm:$0x3]  ;;  %v1311_v54 = vcombine.high %v1309_v46, %v1309_v46 }
  0xf5   : > { %5182 = vmatprep.subr.mxu0 %v635_v50  ;;  %5252 = vmatprep.subr.mxu1 %v637_v52  ;;  %v395_v50 = vld [vmem:[%s11865_s21 + $0x328] sm:$0xff] }
  0xf7   : > { %5079 = vmatmul.mubr.f32.vlgmr.msra.gmra.mxu0 %v1217_v37  ;;  %5149 = vmatmul.mubr.f32.vlgmr.msra.gmra.mxu1 %v1224_v39  ;;  %v1293_v37 = vcombine.high %v1285_v30, %v1285_v30  ;;  %v1294_v39 = vcombine.high %v1292_v32, %v1292_v32 }
  0xf8   : > { %5183 = vmatpush1.xpose.msra.mxu0 %v634_v55  ;;  %5253 = vmatpush1.xpose.msra.mxu1 %v636_v56  ;;  %v1312_v55 = vcombine.high %v256_v47, %v256_v47 }
  0xf9   : > { %5184 = vmatprep.subr.mxu0 %v379_v57  ;;  %5254 = vmatprep.subr.mxu1 %v381_v59  ;;  %v394_v59 = vld [vmem:[%s11865_s21 + $0x320] sm:$0xff] }
  0xfa   : > { %5218 = vmatprep.mubr.f32.mxu0 %v1242_v58  ;;  %5288 = vmatprep.mubr.f32.mxu1 %v1243_v60 }
  0xfc   : > { %5185 = vmatpush1.xpose.msra.mxu0 %v378_v62  ;;  %5255 = vmatpush1.xpose.msra.mxu1 %v380_v63  ;;  %v655_v62 = vld [vmem:[%s11865_s21 + $0xb48] sm:$0x3]  ;;  %v1319_v63 = vrot.slane %v256_v47, %v11876_v5 }
  0xfd   : > { %5322 = vmatprep.subr.mxu0 %v639_v0  ;;  %5392 = vmatprep.subr.mxu1 %v641_v2  ;;  %v657_v0 = vld [vmem:[%s11865_s21 + $0xb58] sm:$0x3] }
  0xfe   : > { %v257_v2 = vld [vmem:[%s11859_s30 + $0xd8] sm:$0xff] }
  0xff   : > { %5219 = vmatmul.mubr.f32.vlgmr.msra.gmra.mxu0 %v1234_v51  ;;  %5289 = vmatmul.mubr.f32.vlgmr.msra.gmra.mxu1 %v1241_v53  ;;  %v1310_v51 = vcombine.high %v1302_v44, %v1302_v44  ;;  %v397_v53 = vld [vmem:[%s11865_s21 + $0x338] sm:$0xff] }
 0x100   : > { %5323 = vmatpush1.xpose.msra.mxu0 %v638_v6  ;;  %5393 = vmatpush1.xpose.msra.mxu1 %v640_v7  ;;  %v399_v6 = vld [vmem:[%s11865_s21 + $0x348] sm:$0xff]  ;;  %v1327_v7 = vcombine.high %v1319_v63, %v1319_v63 }
 0x101   : > { %5324 = vmatprep.subr.mxu0 %v383_v8  ;;  %5394 = vmatprep.subr.mxu1 %v385_v10 }
 0x102   : > { %5358 = vmatprep.mubr.f32.mxu0 %v1259_v9  ;;  %5428 = vmatprep.mubr.f32.mxu1 %v1260_v11  ;;  %v401_v9 = vld [vmem:[%s11865_s21 + $0x358] sm:$0xff]  ;;  %v1329_v11 = vcombine.high %v257_v2, %v257_v2 }
 0x104   : > { %5325 = vmatpush1.xpose.msra.mxu0 %v382_v13  ;;  %5395 = vmatpush1.xpose.msra.mxu1 %v384_v14 }
 0x105   : > { %5462 = vmatprep.subr.mxu0 %v643_v15  ;;  %5532 = vmatprep.subr.mxu1 %v645_v17  ;;  %v398_v15 = vld [vmem:[%s11865_s21 + $0x340] sm:$0xff] }
 0x107   : > { %5359 = vmatmul.mubr.f32.vlgmr.msra.gmra.mxu0 %v1251_v1  ;;  %5429 = vmatmul.mubr.f32.vlgmr.msra.gmra.mxu1 %v1258_v3  ;;  %v1326_v1 = vrot.slane %v1312_v55, %v11876_v5  ;;  %v654_v3 = vld [vmem:[%s11865_s21 + $0xb40] sm:$0x3] }
 0x108   : > { %5463 = vmatpush1.xpose.msra.mxu0 %v642_v20  ;;  %5533 = vmatpush1.xpose.msra.mxu1 %v644_v21  ;;  %v1336_v20 = vrot.slane %v257_v2, %v11876_v5  ;;  %v661_v21 = vld [vmem:[%s11865_s21 + $0xb78] sm:$0x3]  ;;  %v406_v55 = vld [vmem:[%s11865_s21 + $0x380] sm:$0xff]  ;;  %v411_v2 = vld [vmem:[%s11865_s21 + $0x3a8] sm:$0xff] }
 0x109   : > { %5464 = vmatprep.subr.mxu0 %v387_v22  ;;  %5534 = vmatprep.subr.mxu1 %v389_v24  ;;  %v1328_v10 = vcombine.high %v1326_v1, %v1326_v1  ;;  %v1343_v22 = vrot.slane %v1329_v11, %v11876_v5  ;;  %v658_v24 = vld [vmem:[%s11865_s21 + $0xb60] sm:$0x3] }
 0x10a   : > { %5498 = vmatprep.mubr.f32.mxu0 %v1276_v23  ;;  %5568 = vmatprep.mubr.f32.mxu1 %v1277_v25  ;;  %v258_v23 = vld [vmem:[%s11859_s30 + $0xe0] sm:$0xff]  ;;  %v660_v25 = vld [vmem:[%s11865_s21 + $0xb70] sm:$0x3] }
 0x10b   : > { %v1353_v40 = vrot.slane %v258_v23, %v11876_v5 }
 0x10c   : > { %5465 = vmatpush1.xpose.msra.mxu0 %v386_v27  ;;  %5535 = vmatpush1.xpose.msra.mxu1 %v388_v28  ;;  %v1344_v27 = vcombine.high %v1336_v20, %v1336_v20 }
 0x10d   : > { %5602 = vmatprep.subr.mxu0 %v647_v29  ;;  %5672 = vmatprep.subr.mxu1 %v649_v31  ;;  %v405_v29 = vld [vmem:[%s11865_s21 + $0x378] sm:$0xff]  ;;  %v1346_v31 = vcombine.high %v258_v23, %v258_v23  ;;  %v1361_v47 = vcombine.high %v1353_v40, %v1353_v40  ;;  %v415_v23 = vld [vmem:[%s11865_s21 + $0x3c8] sm:$0xff] }
 0x10f   : > { %5499 = vmatmul.mubr.f32.vlgmr.msra.gmra.mxu0 %v1268_v16  ;;  %5569 = vmatmul.mubr.f32.vlgmr.msra.gmra.mxu1 %v1275_v18  ;;  %v400_v18 = vld [vmem:[%s11865_s21 + $0x350] sm:$0xff] }
 0x110   : > { %5603 = vmatpush1.xpose.msra.mxu0 %v646_v34  ;;  %5673 = vmatpush1.xpose.msra.mxu1 %v648_v35  ;;  %v402_v35 = vld [vmem:[%s11865_s21 + $0x360] sm:$0xff] }
 0x111   : > { %5604 = vmatprep.subr.mxu0 %v391_v36  ;;  %5674 = vmatprep.subr.mxu1 %v393_v38  ;;  %v404_v38 = vld [vmem:[%s11865_s21 + $0x370] sm:$0xff] }
 0x112   : > { %5638 = vmatprep.mubr.f32.mxu0 %v1293_v37  ;;  %5708 = vmatprep.mubr.f32.mxu1 %v1294_v39  ;;  %v663_v39 = vld [vmem:[%s11865_s21 + $0xb88] sm:$0x3] }
 0x114   : > { %5605 = vmatpush1.xpose.msra.mxu0 %v390_v41  ;;  %5675 = vmatpush1.xpose.msra.mxu1 %v392_v42  ;;  %v665_v41 = vld [vmem:[%s11865_s21 + $0xb98] sm:$0x3]  ;;  %v1360_v42 = vrot.slane %v1346_v31, %v11876_v5 }
 0x115   : > { %5742 = vmatprep.subr.mxu0 %v651_v43  ;;  %5812 = vmatprep.subr.mxu1 %v653_v45  ;;  %v259_v43 = vld [vmem:[%s11859_s30 + $0xe8] sm:$0xff]  ;;  %v664_v45 = vld [vmem:[%s11865_s21 + $0xb90] sm:$0x3] }
 0x117   : > { %v2280_v52 = vpop.f32.mrf.mxu0  ;;  %5639 = vmatmul.mubr.f32.vlgmr.msra.gmra.mxu0 %v1285_v30  ;;  %v2350_v56 = vpop.f32.mrf.mxu1  ;;  %5709 = vmatmul.mubr.f32.vlgmr.msra.gmra.mxu1 %v1292_v32  ;;  %v1345_v30 = vcombine.high %v1343_v22, %v1343_v22 }
 0x118   : > { %5743 = vmatpush1.xpose.msra.mxu0 %v650_v48  ;;  %v2351_v57 = vadd.f32 %v2350_v56, %v2280_v52  ;;  %5813 = vmatpush1.xpose.msra.mxu1 %v652_v49  ;;  %v409_v49 = vld [vmem:[%s11865_s21 + $0x398] sm:$0xff] }
 0x119   : > { %v2282_v58 = vpop.f32.mrf.mxu0  ;;  %5744 = vmatprep.subr.mxu0 %v395_v50  ;;  %v2352_v60 = vpop.f32.mrf.mxu1  ;;  %5814 = vmatprep.subr.mxu1 %v397_v53  ;;  %v1362_v50 = vcombine.high %v1360_v42, %v1360_v42 }
 0x11a   : > { %5778 = vmatprep.mubr.f32.mxu0 %v1310_v51  ;;  %5848 = vmatprep.mubr.f32.mxu1 %v1311_v54  ;;  %v1363_v51 = vcombine.high %v259_v43, %v259_v43  ;;  %v408_v58 = vld [vmem:[%s11865_s21 + $0x390] sm:$0xff]  ;;  %v1370_v60 = vrot.slane %v259_v43, %v11876_v5  ;;  %v419_v43 = vld [vmem:[%s11865_s21 + $0x3e8] sm:$0xff] }
 0x11c   : > { %5745 = vmatpush1.xpose.msra.mxu0 %v394_v59  ;;  %5815 = vmatpush1.xpose.msra.mxu1 %v396_v61  ;;  %v667_v59 = vld [vmem:[%s11865_s21 + $0xba8] sm:$0x3]  ;;  %v669_v61 = vld [vmem:[%s11865_s21 + $0xbb8] sm:$0x3] }
 0x11d   : > { %5882 = vmatprep.subr.mxu0 %v655_v62  ;;  %5952 = vmatprep.subr.mxu1 %v657_v0  ;;  %v1377_v62 = vrot.slane %v1363_v51, %v11876_v5  ;;  %v666_v0 = vld [vmem:[%s11865_s21 + $0xba0] sm:$0x3] }
 0x11f   : > { %v2420_v8 = vpop.f32.mrf.mxu0  ;;  %5779 = vmatmul.mubr.f32.vlgmr.msra.gmra.mxu0 %v1302_v44  ;;  %v2490_v13 = vpop.f32.mrf.mxu1  ;;  %5849 = vmatmul.mubr.f32.vlgmr.msra.gmra.mxu1 %v1309_v46  ;;  %v662_v44 = vld [vmem:[%s11865_s21 + $0xb80] sm:$0x3]  ;;  %v407_v46 = vld [vmem:[%s11865_s21 + $0x388] sm:$0xff] }
 0x120   : > { %v2421_v12 = vadd.f32 %v2420_v8, %v2351_v57  ;;  %5883 = vmatpush1.xpose.msra.mxu0 %v654_v3  ;;  %5953 = vmatpush1.xpose.msra.mxu1 %v656_v4  ;;  %v1378_v3 = vcombine.high %v1370_v60, %v1370_v60 }
 0x121   : > { %v2422_v14 = vpop.f32.mrf.mxu0  ;;  %5884 = vmatprep.subr.mxu0 %v399_v6  ;;  %v2492_v17 = vpop.f32.mrf.mxu1  ;;  %5954 = vmatprep.subr.mxu1 %v401_v9  ;;  %v413_v6 = vld [vmem:[%s11865_s21 + $0x3b8] sm:$0xff] }
 0x122   : > { %v2491_v16 = vadd.f32 %v2490_v13, %v2421_v12  ;;  %5918 = vmatprep.mubr.f32.mxu0 %v1327_v7  ;;  %5988 = vmatprep.mubr.f32.mxu1 %v1328_v10  ;;  %v1379_v7 = vcombine.high %v1377_v62, %v1377_v62  ;;  %v410_v12 = vld [vmem:[%s11865_s21 + $0x3a0] sm:$0xff] }
 0x124   : > { %5885 = vmatpush1.xpose.msra.mxu0 %v398_v15  ;;  %5955 = vmatpush1.xpose.msra.mxu1 %v400_v18  ;;  %v412_v15 = vld [vmem:[%s11865_s21 + $0x3b0] sm:$0xff]  ;;  %v673_v18 = vld [vmem:[%s11865_s21 + $0xbd8] sm:$0x3] }
 0x125   : > { %6022 = vmatprep.subr.mxu0 %v659_v19  ;;  %6092 = vmatprep.subr.mxu1 %v661_v21  ;;  %v670_v21 = vld [vmem:[%s11865_s21 + $0xbc0] sm:$0x3] }
 0x127   : > { %v2560_v28 = vpop.f32.mrf.mxu0  ;;  %5919 = vmatmul.mubr.f32.vlgmr.msra.gmra.mxu0 %v1319_v63  ;;  %v2630_v33 = vpop.f32.mrf.mxu1  ;;  %5989 = vmatmul.mubr.f32.vlgmr.msra.gmra.mxu1 %v1326_v1  ;;  %v260_v63 = vld [vmem:[%s11859_s30 + $0xf0] sm:$0xff] }
 0x128   : > { %v2561_v32 = vadd.f32 %v2560_v28, %v2491_v16  ;;  %6023 = vmatpush1.xpose.msra.mxu0 %v658_v24  ;;  %6093 = vmatpush1.xpose.msra.mxu1 %v660_v25  ;;  %v668_v1 = vld [vmem:[%s11865_s21 + $0xbb0] sm:$0x3]  ;;  %v1380_v8 = vcombine.high %v260_v63, %v260_v63  ;;  %v671_v16 = vld [vmem:[%s11865_s21 + $0xbc8] sm:$0x3]  ;;  %v1387_v17 = vrot.slane %v260_v63, %v11876_v5 }
 0x129   : > { %v2562_v34 = vpop.f32.mrf.mxu0  ;;  %6024 = vmatprep.subr.mxu0 %v403_v26  ;;  %v2632_v37 = vpop.f32.mrf.mxu1  ;;  %6094 = vmatprep.subr.mxu1 %v405_v29  ;;  %v417_v26 = vld [vmem:[%s11865_s21 + $0x3d8] sm:$0xff]  ;;  %v423_v63 = vld [vmem:[%s11865_s21 + $0x408] sm:$0xff] }
 0x12a   : > { %v2631_v36 = vadd.f32 %v2630_v33, %v2561_v32  ;;  %6058 = vmatprep.mubr.f32.mxu0 %v1344_v27  ;;  %6128 = vmatprep.mubr.f32.mxu1 %v1345_v30  ;;  %v1394_v19 = vrot.slane %v1380_v8, %v11876_v5  ;;  %v1395_v24 = vcombine.high %v1387_v17, %v1387_v17  ;;  %v414_v32 = vld [vmem:[%s11865_s21 + $0x3c0] sm:$0xff] }
 0x12c   : > { %6025 = vmatpush1.xpose.msra.mxu0 %v402_v35  ;;  %6095 = vmatpush1.xpose.msra.mxu1 %v404_v38  ;;  %v1396_v27 = vcombine.high %v1394_v19, %v1394_v19  ;;  %v416_v35 = vld [vmem:[%s11865_s21 + $0x3d0] sm:$0xff]  ;;  %v677_v38 = vld [vmem:[%s11865_s21 + $0xbf8] sm:$0x3] }
 0x12d   : > { %6162 = vmatprep.subr.mxu0 %v663_v39  ;;  %6232 = vmatprep.subr.mxu1 %v665_v41  ;;  %v674_v41 = vld [vmem:[%s11865_s21 + $0xbe0] sm:$0x3] }
 0x12f   : > { %v2700_v48 = vpop.f32.mrf.mxu0  ;;  %6059 = vmatmul.mubr.f32.vlgmr.msra.gmra.mxu0 %v1336_v20  ;;  %v2770_v53 = vpop.f32.mrf.mxu1  ;;  %6129 = vmatmul.mubr.f32.vlgmr.msra.gmra.mxu1 %v1343_v22  ;;  %v261_v20 = vld [vmem:[%s11859_s30 + $0xf8] sm:$0xff]  ;;  %v672_v22 = vld [vmem:[%s11865_s21 + $0xbd0] sm:$0x3] }
 0x130   : > { %v2701_v52 = vadd.f32 %v2700_v48, %v2631_v36  ;;  %6163 = vmatpush1.xpose.msra.mxu0 %v662_v44  ;;  %6233 = vmatpush1.xpose.msra.mxu1 %v664_v45  ;;  %v1397_v28 = vcombine.high %v261_v20, %v261_v20  ;;  %v675_v36 = vld [vmem:[%s11865_s21 + $0xbe8] sm:$0x3]  ;;  %v1404_v37 = vrot.slane %v261_v20, %v11876_v5 }
 0x131   : > { %v2702_v54 = vpop.f32.mrf.mxu0  ;;  %6164 = vmatprep.subr.mxu0 %v407_v46  ;;  %v2772_v57 = vpop.f32.mrf.mxu1  ;;  %6234 = vmatprep.subr.mxu1 %v409_v49  ;;  %v421_v46 = vld [vmem:[%s11865_s21 + $0x3f8] sm:$0xff]  ;;  %v427_v20 = vld [vmem:[%s11865_s21 + $0x428] sm:$0xff] }
 0x132   : > { %v2771_v56 = vadd.f32 %v2770_v53, %v2701_v52  ;;  %6198 = vmatprep.mubr.f32.mxu0 %v1361_v47  ;;  %6268 = vmatprep.mubr.f32.mxu1 %v1362_v50  ;;  %v1411_v39 = vrot.slane %v1397_v28, %v11876_v5  ;;  %v1412_v44 = vcombine.high %v1404_v37, %v1404_v37  ;;  %v418_v52 = vld [vmem:[%s11865_s21 + $0x3e0] sm:$0xff] }
 0x134   : > { %6165 = vmatpush1.xpose.msra.mxu0 %v406_v55  ;;  %6235 = vmatpush1.xpose.msra.mxu1 %v408_v58  ;;  %v1413_v47 = vcombine.high %v1411_v39, %v1411_v39  ;;  %v420_v55 = vld [vmem:[%s11865_s21 + $0x3f0] sm:$0xff]  ;;  %v681_v58 = vld [vmem:[%s11865_s21 + $0xc18] sm:$0x3] }
 0x135   : > { %6302 = vmatprep.subr.mxu0 %v667_v59  ;;  %6372 = vmatprep.subr.mxu1 %v669_v61  ;;  %v678_v61 = vld [vmem:[%s11865_s21 + $0xc00] sm:$0x3] }
 0x137   : > { %v2840_v4 = vpop.f32.mrf.mxu0  ;;  %6199 = vmatmul.mubr.f32.vlgmr.msra.gmra.mxu0 %v1353_v40  ;;  %v2910_v10 = vpop.f32.mrf.mxu1  ;;  %6269 = vmatmul.mubr.f32.vlgmr.msra.gmra.mxu1 %v1360_v42  ;;  %v262_v40 = vld [vmem:[%s11859_s30 + $0x100] sm:$0xff]  ;;  %v676_v42 = vld [vmem:[%s11865_s21 + $0xbf0] sm:$0x3] }
 0x138   : > { %v2841_v9 = vadd.f32 %v2840_v4, %v2771_v56  ;;  %6303 = vmatpush1.xpose.msra.mxu0 %v666_v0  ;;  %6373 = vmatpush1.xpose.msra.mxu1 %v668_v1  ;;  %v1414_v48 = vcombine.high %v262_v40, %v262_v40  ;;  %v679_v56 = vld [vmem:[%s11865_s21 + $0xc08] sm:$0x3]  ;;  %v1421_v57 = vrot.slane %v262_v40, %v11876_v5 }
 0x139   : > { %v2842_v11 = vpop.f32.mrf.mxu0  ;;  %6304 = vmatprep.subr.mxu0 %v411_v2  ;;  %v2912_v14 = vpop.f32.mrf.mxu1  ;;  %6374 = vmatprep.subr.mxu1 %v413_v6  ;;  %v425_v2 = vld [vmem:[%s11865_s21 + $0x418] sm:$0xff]  ;;  %v431_v40 = vld [vmem:[%s11865_s21 + $0x448] sm:$0xff] }
 0x13a   : > { %v2911_v13 = vadd.f32 %v2910_v10, %v2841_v9  ;;  %6338 = vmatprep.mubr.f32.mxu0 %v1378_v3  ;;  %6408 = vmatprep.mubr.f32.mxu1 %v1379_v7  ;;  %v1428_v59 = vrot.slane %v1414_v48, %v11876_v5  ;;  %v1429_v0 = vcombine.high %v1421_v57, %v1421_v57  ;;  %v422_v9 = vld [vmem:[%s11865_s21 + $0x400] sm:$0xff] }
 0x13c   : > { %6305 = vmatpush1.xpose.msra.mxu0 %v410_v12  ;;  %6375 = vmatpush1.xpose.msra.mxu1 %v412_v15  ;;  %v1430_v3 = vcombine.high %v1428_v59, %v1428_v59  ;;  %v424_v12 = vld [vmem:[%s11865_s21 + $0x410] sm:$0xff]  ;;  %v685_v15 = vld [vmem:[%s11865_s21 + $0xc38] sm:$0x3] }
 0x13d   : > { %6442 = vmatprep.subr.mxu0 %v671_v16  ;;  %6512 = vmatprep.subr.mxu1 %v673_v18  ;;  %v682_v18 = vld [vmem:[%s11865_s21 + $0xc20] sm:$0x3] }
 0x13f   : > { %v2980_v25 = vpop.f32.mrf.mxu0  ;;  %6339 = vmatmul.mubr.f32.vlgmr.msra.gmra.mxu0 %v1370_v60  ;;  %v3050_v30 = vpop.f32.mrf.mxu1  ;;  %6409 = vmatmul.mubr.f32.vlgmr.msra.gmra.mxu1 %v1377_v62  ;;  %v263_v60 = vld [vmem:[%s11859_s30 + $0x108] sm:$0xff]  ;;  %v680_v62 = vld [vmem:[%s11865_s21 + $0xc10] sm:$0x3] }
 0x140   : > { %v2981_v29 = vadd.f32 %v2980_v25, %v2911_v13  ;;  %6443 = vmatpush1.xpose.msra.mxu0 %v670_v21  ;;  %6513 = vmatpush1.xpose.msra.mxu1 %v672_v22  ;;  %v1431_v4 = vcombine.high %v263_v60, %v263_v60  ;;  %v683_v13 = vld [vmem:[%s11865_s21 + $0xc28] sm:$0x3]  ;;  %v1438_v14 = vrot.slane %v263_v60, %v11876_v5 }
 0x141   : > { %v2982_v31 = vpop.f32.mrf.mxu0  ;;  %6444 = vmatprep.subr.mxu0 %v415_v23  ;;  %v3052_v34 = vpop.f32.mrf.mxu1  ;;  %6514 = vmatprep.subr.mxu1 %v417_v26  ;;  %v429_v23 = vld [vmem:[%s11865_s21 + $0x438] sm:$0xff]  ;;  %v435_v60 = vld [vmem:[%s11865_s21 + $0x468] sm:$0xff] }
 0x142   : > { %v3051_v33 = vadd.f32 %v3050_v30, %v2981_v29  ;;  %6478 = vmatprep.mubr.f32.mxu0 %v1395_v24  ;;  %6548 = vmatprep.mubr.f32.mxu1 %v1396_v27  ;;  %v1445_v16 = vrot.slane %v1431_v4, %v11876_v5  ;;  %v1446_v21 = vcombine.high %v1438_v14, %v1438_v14  ;;  %v426_v29 = vld [vmem:[%s11865_s21 + $0x420] sm:$0xff] }
 0x144   : > { %6445 = vmatpush1.xpose.msra.mxu0 %v414_v32  ;;  %6515 = vmatpush1.xpose.msra.mxu1 %v416_v35  ;;  %v1447_v24 = vcombine.high %v1445_v16, %v1445_v16  ;;  %v428_v32 = vld [vmem:[%s11865_s21 + $0x430] sm:$0xff]  ;;  %v689_v35 = vld [vmem:[%s11865_s21 + $0xc58] sm:$0x3] }
 0x145   : > { %6582 = vmatprep.subr.mxu0 %v675_v36  ;;  %6652 = vmatprep.subr.mxu1 %v677_v38  ;;  %v686_v38 = vld [vmem:[%s11865_s21 + $0xc40] sm:$0x3] }
 0x147   : > { %v3120_v45 = vpop.f32.mrf.mxu0  ;;  %6479 = vmatmul.mubr.f32.vlgmr.msra.gmra.mxu0 %v1387_v17  ;;  %v3190_v50 = vpop.f32.mrf.mxu1  ;;  %6549 = vmatmul.mubr.f32.vlgmr.msra.gmra.mxu1 %v1394_v19  ;;  %v264_v17 = vld [vmem:[%s11859_s30 + $0x110] sm:$0xff] }
 0x148   : > { %v3121_v49 = vadd.f32 %v3120_v45, %v3051_v33  ;;  %6583 = vmatpush1.xpose.msra.mxu0 %v674_v41  ;;  %6653 = vmatpush1.xpose.msra.mxu1 %v676_v42  ;;  %v684_v19 = vld [vmem:[%s11865_s21 + $0xc30] sm:$0x3]  ;;  %v1448_v25 = vcombine.high %v264_v17, %v264_v17  ;;  %v687_v33 = vld [vmem:[%s11865_s21 + $0xc48] sm:$0x3]  ;;  %v1455_v34 = vrot.slane %v264_v17, %v11876_v5 }
 0x149   : > { %v3122_v51 = vpop.f32.mrf.mxu0  ;;  %6584 = vmatprep.subr.mxu0 %v419_v43  ;;  %v3192_v54 = vpop.f32.mrf.mxu1  ;;  %6654 = vmatprep.subr.mxu1 %v421_v46  ;;  %v433_v43 = vld [vmem:[%s11865_s21 + $0x458] sm:$0xff]  ;;  %v439_v17 = vld [vmem:[%s11865_s21 + $0x488] sm:$0xff] }
 0x14a   : > { %v3191_v53 = vadd.f32 %v3190_v50, %v3121_v49  ;;  %6618 = vmatprep.mubr.f32.mxu0 %v1412_v44  ;;  %6688 = vmatprep.mubr.f32.mxu1 %v1413_v47  ;;  %v1462_v36 = vrot.slane %v1448_v25, %v11876_v5  ;;  %v1463_v41 = vcombine.high %v1455_v34, %v1455_v34  ;;  %v430_v49 = vld [vmem:[%s11865_s21 + $0x440] sm:$0xff] }
 0x14c   : > { %6585 = vmatpush1.xpose.msra.mxu0 %v418_v52  ;;  %6655 = vmatpush1.xpose.msra.mxu1 %v420_v55  ;;  %v1464_v44 = vcombine.high %v1462_v36, %v1462_v36  ;;  %v432_v52 = vld [vmem:[%s11865_s21 + $0x450] sm:$0xff]  ;;  %v693_v55 = vld [vmem:[%s11865_s21 + $0xc78] sm:$0x3] }
 0x14d   : > { %6722 = vmatprep.subr.mxu0 %v679_v56  ;;  %6792 = vmatprep.subr.mxu1 %v681_v58  ;;  %v690_v58 = vld [vmem:[%s11865_s21 + $0xc60] sm:$0x3] }
 0x14f   : > { %v3260_v1 = vpop.f32.mrf.mxu0  ;;  %6619 = vmatmul.mubr.f32.vlgmr.msra.gmra.mxu0 %v1404_v37  ;;  %v3330_v7 = vpop.f32.mrf.mxu1  ;;  %6689 = vmatmul.mubr.f32.vlgmr.msra.gmra.mxu1 %v1411_v39  ;;  %v265_v37 = vld [vmem:[%s11859_s30 + $0x118] sm:$0xff]  ;;  %v688_v39 = vld [vmem:[%s11865_s21 + $0xc50] sm:$0x3] }
 0x150   : > { %v3261_v6 = vadd.f32 %v3260_v1, %v3191_v53  ;;  %6723 = vmatpush1.xpose.msra.mxu0 %v678_v61  ;;  %6793 = vmatpush1.xpose.msra.mxu1 %v680_v62  ;;  %v1465_v45 = vcombine.high %v265_v37, %v265_v37  ;;  %v691_v53 = vld [vmem:[%s11865_s21 + $0xc68] sm:$0x3]  ;;  %v1472_v54 = vrot.slane %v265_v37, %v11876_v5 }
 0x151   : > { %v3262_v8 = vpop.f32.mrf.mxu0  ;;  %6724 = vmatprep.subr.mxu0 %v423_v63  ;;  %v3332_v11 = vpop.f32.mrf.mxu1  ;;  %6794 = vmatprep.subr.mxu1 %v425_v2  ;;  %v437_v63 = vld [vmem:[%s11865_s21 + $0x478] sm:$0xff]  ;;  %v443_v37 = vld [vmem:[%s11865_s21 + $0x4a8] sm:$0xff] }
 0x152   : > { %v3331_v10 = vadd.f32 %v3330_v7, %v3261_v6  ;;  %6758 = vmatprep.mubr.f32.mxu0 %v1429_v0  ;;  %6828 = vmatprep.mubr.f32.mxu1 %v1430_v3  ;;  %v1479_v56 = vrot.slane %v1465_v45, %v11876_v5  ;;  %v1480_v61 = vcombine.high %v1472_v54, %v1472_v54  ;;  %v434_v6 = vld [vmem:[%s11865_s21 + $0x460] sm:$0xff] }
 0x154   : > { %6725 = vmatpush1.xpose.msra.mxu0 %v422_v9  ;;  %6795 = vmatpush1.xpose.msra.mxu1 %v424_v12  ;;  %v1481_v0 = vcombine.high %v1479_v56, %v1479_v56  ;;  %v436_v9 = vld [vmem:[%s11865_s21 + $0x470] sm:$0xff]  ;;  %v697_v12 = vld [vmem:[%s11865_s21 + $0xc98] sm:$0x3] }
 0x155   : > { %6862 = vmatprep.subr.mxu0 %v683_v13  ;;  %6932 = vmatprep.subr.mxu1 %v685_v15  ;;  %v694_v15 = vld [vmem:[%s11865_s21 + $0xc80] sm:$0x3] }
 0x157   : > { %v3400_v22 = vpop.f32.mrf.mxu0  ;;  %6759 = vmatmul.mubr.f32.vlgmr.msra.gmra.mxu0 %v1421_v57  ;;  %v3470_v27 = vpop.f32.mrf.mxu1  ;;  %6829 = vmatmul.mubr.f32.vlgmr.msra.gmra.mxu1 %v1428_v59  ;;  %v266_v57 = vld [vmem:[%s11859_s30 + $0x120] sm:$0xff]  ;;  %v692_v59 = vld [vmem:[%s11865_s21 + $0xc70] sm:$0x3] }
 0x158   : > { %v3401_v26 = vadd.f32 %v3400_v22, %v3331_v10  ;;  %6863 = vmatpush1.xpose.msra.mxu0 %v682_v18  ;;  %6933 = vmatpush1.xpose.msra.mxu1 %v684_v19  ;;  %v1482_v1 = vcombine.high %v266_v57, %v266_v57  ;;  %v695_v10 = vld [vmem:[%s11865_s21 + $0xc88] sm:$0x3]  ;;  %v1489_v11 = vrot.slane %v266_v57, %v11876_v5 }
 0x159   : > { %v3402_v28 = vpop.f32.mrf.mxu0  ;;  %6864 = vmatprep.subr.mxu0 %v427_v20  ;;  %v3472_v31 = vpop.f32.mrf.mxu1  ;;  %6934 = vmatprep.subr.mxu1 %v429_v23  ;;  %v441_v20 = vld [vmem:[%s11865_s21 + $0x498] sm:$0xff]  ;;  %v447_v57 = vld [vmem:[%s11865_s21 + $0x4c8] sm:$0xff] }
 0x15a   : > { %v3471_v30 = vadd.f32 %v3470_v27, %v3401_v26  ;;  %6898 = vmatprep.mubr.f32.mxu0 %v1446_v21  ;;  %6968 = vmatprep.mubr.f32.mxu1 %v1447_v24  ;;  %v1496_v13 = vrot.slane %v1482_v1, %v11876_v5  ;;  %v1497_v18 = vcombine.high %v1489_v11, %v1489_v11  ;;  %v438_v26 = vld [vmem:[%s11865_s21 + $0x480] sm:$0xff] }
 0x15c   : > { %6865 = vmatpush1.xpose.msra.mxu0 %v426_v29  ;;  %6935 = vmatpush1.xpose.msra.mxu1 %v428_v32  ;;  %v1498_v21 = vcombine.high %v1496_v13, %v1496_v13  ;;  %v440_v29 = vld [vmem:[%s11865_s21 + $0x490] sm:$0xff]  ;;  %v701_v32 = vld [vmem:[%s11865_s21 + $0xcb8] sm:$0x3] }
 0x15d   : > { %7002 = vmatprep.subr.mxu0 %v687_v33  ;;  %7072 = vmatprep.subr.mxu1 %v689_v35  ;;  %v698_v35 = vld [vmem:[%s11865_s21 + $0xca0] sm:$0x3] }
 0x15f   : > { %v3540_v42 = vpop.f32.mrf.mxu0  ;;  %6899 = vmatmul.mubr.f32.vlgmr.msra.gmra.mxu0 %v1438_v14  ;;  %v3610_v47 = vpop.f32.mrf.mxu1  ;;  %6969 = vmatmul.mubr.f32.vlgmr.msra.gmra.mxu1 %v1445_v16  ;;  %v267_v14 = vld [vmem:[%s11859_s30 + $0x128] sm:$0xff]  ;;  %v696_v16 = vld [vmem:[%s11865_s21 + $0xc90] sm:$0x3] }
 0x160   : > { %v3541_v46 = vadd.f32 %v3540_v42, %v3471_v30  ;;  %7003 = vmatpush1.xpose.msra.mxu0 %v686_v38  ;;  %7073 = vmatpush1.xpose.msra.mxu1 %v688_v39  ;;  %v1499_v22 = vcombine.high %v267_v14, %v267_v14  ;;  %v699_v30 = vld [vmem:[%s11865_s21 + $0xca8] sm:$0x3]  ;;  %v1506_v31 = vrot.slane %v267_v14, %v11876_v5 }
 0x161   : > { %v3542_v48 = vpop.f32.mrf.mxu0  ;;  %7004 = vmatprep.subr.mxu0 %v431_v40  ;;  %v3612_v51 = vpop.f32.mrf.mxu1  ;;  %7074 = vmatprep.subr.mxu1 %v433_v43  ;;  %v445_v40 = vld [vmem:[%s11865_s21 + $0x4b8] sm:$0xff]  ;;  %v451_v14 = vld [vmem:[%s11865_s21 + $0x4e8] sm:$0xff] }
 0x162   : > { %v3611_v50 = vadd.f32 %v3610_v47, %v3541_v46  ;;  %7038 = vmatprep.mubr.f32.mxu0 %v1463_v41  ;;  %7108 = vmatprep.mubr.f32.mxu1 %v1464_v44  ;;  %v1513_v33 = vrot.slane %v1499_v22, %v11876_v5  ;;  %v1514_v38 = vcombine.high %v1506_v31, %v1506_v31  ;;  %v442_v46 = vld [vmem:[%s11865_s21 + $0x4a0] sm:$0xff] }
 0x164   : > { %7005 = vmatpush1.xpose.msra.mxu0 %v430_v49  ;;  %7075 = vmatpush1.xpose.msra.mxu1 %v432_v52  ;;  %v1515_v41 = vcombine.high %v1513_v33, %v1513_v33  ;;  %v444_v49 = vld [vmem:[%s11865_s21 + $0x4b0] sm:$0xff]  ;;  %v705_v52 = vld [vmem:[%s11865_s21 + $0xcd8] sm:$0x3] }
 0x165   : > { %7142 = vmatprep.subr.mxu0 %v691_v53  ;;  %7212 = vmatprep.subr.mxu1 %v693_v55  ;;  %v702_v55 = vld [vmem:[%s11865_s21 + $0xcc0] sm:$0x3] }
 0x167   : > { %v3680_v62 = vpop.f32.mrf.mxu0  ;;  %7039 = vmatmul.mubr.f32.vlgmr.msra.gmra.mxu0 %v1455_v34  ;;  %v3750_v3 = vpop.f32.mrf.mxu1  ;;  %7109 = vmatmul.mubr.f32.vlgmr.msra.gmra.mxu1 %v1462_v36  ;;  %v268_v34 = vld [vmem:[%s11859_s30 + $0x130] sm:$0xff] }
 0x168   : > { %v3681_v2 = vadd.f32 %v3680_v62, %v3611_v50  ;;  %7143 = vmatpush1.xpose.msra.mxu0 %v690_v58  ;;  %7213 = vmatpush1.xpose.msra.mxu1 %v692_v59  ;;  %v700_v36 = vld [vmem:[%s11865_s21 + $0xcb0] sm:$0x3]  ;;  %v1516_v42 = vcombine.high %v268_v34, %v268_v34  ;;  %v703_v50 = vld [vmem:[%s11865_s21 + $0xcc8] sm:$0x3]  ;;  %v1523_v51 = vrot.slane %v268_v34, %v11876_v5 }
 0x169   : > { %v3682_v4 = vpop.f32.mrf.mxu0  ;;  %7144 = vmatprep.subr.mxu0 %v435_v60  ;;  %v3752_v8 = vpop.f32.mrf.mxu1  ;;  %7214 = vmatprep.subr.mxu1 %v437_v63  ;;  %v449_v60 = vld [vmem:[%s11865_s21 + $0x4d8] sm:$0xff]  ;;  %v455_v34 = vld [vmem:[%s11865_s21 + $0x508] sm:$0xff] }
 0x16a   : > { %v3751_v7 = vadd.f32 %v3750_v3, %v3681_v2  ;;  %7178 = vmatprep.mubr.f32.mxu0 %v1480_v61  ;;  %7248 = vmatprep.mubr.f32.mxu1 %v1481_v0  ;;  %v1530_v53 = vrot.slane %v1516_v42, %v11876_v5  ;;  %v1531_v58 = vcombine.high %v1523_v51, %v1523_v51  ;;  %v446_v2 = vld [vmem:[%s11865_s21 + $0x4c0] sm:$0xff] }
 0x16c   : > { %7145 = vmatpush1.xpose.msra.mxu0 %v434_v6  ;;  %7215 = vmatpush1.xpose.msra.mxu1 %v436_v9  ;;  %v1532_v61 = vcombine.high %v1530_v53, %v1530_v53  ;;  %v448_v6 = vld [vmem:[%s11865_s21 + $0x4d0] sm:$0xff]  ;;  %v709_v9 = vld [vmem:[%s11865_s21 + $0xcf8] sm:$0x3] }
 0x16d   : > { %7282 = vmatprep.subr.mxu0 %v695_v10  ;;  %7352 = vmatprep.subr.mxu1 %v697_v12  ;;  %v706_v12 = vld [vmem:[%s11865_s21 + $0xce0] sm:$0x3] }
 0x16f   : > { %v3820_v19 = vpop.f32.mrf.mxu0  ;;  %7179 = vmatmul.mubr.f32.vlgmr.msra.gmra.mxu0 %v1472_v54  ;;  %v3890_v24 = vpop.f32.mrf.mxu1  ;;  %7249 = vmatmul.mubr.f32.vlgmr.msra.gmra.mxu1 %v1479_v56  ;;  %v269_v54 = vld [vmem:[%s11859_s30 + $0x138] sm:$0xff]  ;;  %v704_v56 = vld [vmem:[%s11865_s21 + $0xcd0] sm:$0x3] }
 0x170   : > { %v3821_v23 = vadd.f32 %v3820_v19, %v3751_v7  ;;  %7283 = vmatpush1.xpose.msra.mxu0 %v694_v15  ;;  %7353 = vmatpush1.xpose.msra.mxu1 %v696_v16  ;;  %v1533_v62 = vcombine.high %v269_v54, %v269_v54  ;;  %v707_v7 = vld [vmem:[%s11865_s21 + $0xce8] sm:$0x3]  ;;  %v1540_v8 = vrot.slane %v269_v54, %v11876_v5 }
 0x171   : > { %v3822_v25 = vpop.f32.mrf.mxu0  ;;  %7284 = vmatprep.subr.mxu0 %v439_v17  ;;  %v3892_v28 = vpop.f32.mrf.mxu1  ;;  %7354 = vmatprep.subr.mxu1 %v441_v20  ;;  %v453_v17 = vld [vmem:[%s11865_s21 + $0x4f8] sm:$0xff]  ;;  %v459_v54 = vld [vmem:[%s11865_s21 + $0x528] sm:$0xff] }
 0x172   : > { %v3891_v27 = vadd.f32 %v3890_v24, %v3821_v23  ;;  %7318 = vmatprep.mubr.f32.mxu0 %v1497_v18  ;;  %7388 = vmatprep.mubr.f32.mxu1 %v1498_v21  ;;  %v1547_v10 = vrot.slane %v1533_v62, %v11876_v5  ;;  %v1548_v15 = vcombine.high %v1540_v8, %v1540_v8  ;;  %v450_v23 = vld [vmem:[%s11865_s21 + $0x4e0] sm:$0xff] }
 0x174   : > { %7285 = vmatpush1.xpose.msra.mxu0 %v438_v26  ;;  %7355 = vmatpush1.xpose.msra.mxu1 %v440_v29  ;;  %v1549_v18 = vcombine.high %v1547_v10, %v1547_v10  ;;  %v452_v26 = vld [vmem:[%s11865_s21 + $0x4f0] sm:$0xff]  ;;  %v713_v29 = vld [vmem:[%s11865_s21 + $0xd18] sm:$0x3] }
 0x175   : > { %7422 = vmatprep.subr.mxu0 %v699_v30  ;;  %7492 = vmatprep.subr.mxu1 %v701_v32  ;;  %v710_v32 = vld [vmem:[%s11865_s21 + $0xd00] sm:$0x3] }
 0x177   : > { %v3960_v39 = vpop.f32.mrf.mxu0  ;;  %7319 = vmatmul.mubr.f32.vlgmr.msra.gmra.mxu0 %v1489_v11  ;;  %v4030_v44 = vpop.f32.mrf.mxu1  ;;  %7389 = vmatmul.mubr.f32.vlgmr.msra.gmra.mxu1 %v1496_v13  ;;  %v270_v11 = vld [vmem:[%s11859_s30 + $0x140] sm:$0xff]  ;;  %v708_v13 = vld [vmem:[%s11865_s21 + $0xcf0] sm:$0x3] }
 0x178   : > { %v3961_v43 = vadd.f32 %v3960_v39, %v3891_v27  ;;  %7423 = vmatpush1.xpose.msra.mxu0 %v698_v35  ;;  %7493 = vmatpush1.xpose.msra.mxu1 %v700_v36  ;;  %v1550_v19 = vcombine.high %v270_v11, %v270_v11  ;;  %v711_v27 = vld [vmem:[%s11865_s21 + $0xd08] sm:$0x3]  ;;  %v1557_v28 = vrot.slane %v270_v11, %v11876_v5 }
 0x179   : > { %v3962_v45 = vpop.f32.mrf.mxu0  ;;  %7424 = vmatprep.subr.mxu0 %v443_v37  ;;  %v4032_v48 = vpop.f32.mrf.mxu1  ;;  %7494 = vmatprep.subr.mxu1 %v445_v40  ;;  %v457_v37 = vld [vmem:[%s11865_s21 + $0x518] sm:$0xff]  ;;  %v463_v11 = vld [vmem:[%s11865_s21 + $0x548] sm:$0xff] }
 0x17a   : > { %v4031_v47 = vadd.f32 %v4030_v44, %v3961_v43  ;;  %7458 = vmatprep.mubr.f32.mxu0 %v1514_v38  ;;  %7528 = vmatprep.mubr.f32.mxu1 %v1515_v41  ;;  %v1564_v30 = vrot.slane %v1550_v19, %v11876_v5  ;;  %v1565_v35 = vcombine.high %v1557_v28, %v1557_v28  ;;  %v454_v43 = vld [vmem:[%s11865_s21 + $0x500] sm:$0xff] }
 0x17c   : > { %7425 = vmatpush1.xpose.msra.mxu0 %v442_v46  ;;  %7495 = vmatpush1.xpose.msra.mxu1 %v444_v49  ;;  %v1566_v38 = vcombine.high %v1564_v30, %v1564_v30  ;;  %v456_v46 = vld [vmem:[%s11865_s21 + $0x510] sm:$0xff]  ;;  %v717_v49 = vld [vmem:[%s11865_s21 + $0xd38] sm:$0x3] }
 0x17d   : > { %7562 = vmatprep.subr.mxu0 %v703_v50  ;;  %7632 = vmatprep.subr.mxu1 %v705_v52  ;;  %v714_v52 = vld [vmem:[%s11865_s21 + $0xd20] sm:$0x3] }
 0x17f   : > { %v4100_v59 = vpop.f32.mrf.mxu0  ;;  %7459 = vmatmul.mubr.f32.vlgmr.msra.gmra.mxu0 %v1506_v31  ;;  %v4170_v0 = vpop.f32.mrf.mxu1  ;;  %7529 = vmatmul.mubr.f32.vlgmr.msra.gmra.mxu1 %v1513_v33  ;;  %v271_v31 = vld [vmem:[%s11859_s30 + $0x148] sm:$0xff]  ;;  %v712_v33 = vld [vmem:[%s11865_s21 + $0xd10] sm:$0x3] }
 0x180   : > { %v4101_v63 = vadd.f32 %v4100_v59, %v4031_v47  ;;  %7563 = vmatpush1.xpose.msra.mxu0 %v702_v55  ;;  %7633 = vmatpush1.xpose.msra.mxu1 %v704_v56  ;;  %v1567_v39 = vcombine.high %v271_v31, %v271_v31  ;;  %v715_v47 = vld [vmem:[%s11865_s21 + $0xd28] sm:$0x3]  ;;  %v1574_v48 = vrot.slane %v271_v31, %v11876_v5 }
 0x181   : > { %v4102_v1 = vpop.f32.mrf.mxu0  ;;  %7564 = vmatprep.subr.mxu0 %v447_v57  ;;  %v4172_v4 = vpop.f32.mrf.mxu1  ;;  %7634 = vmatprep.subr.mxu1 %v449_v60  ;;  %v461_v57 = vld [vmem:[%s11865_s21 + $0x538] sm:$0xff]  ;;  %v467_v31 = vld [vmem:[%s11865_s21 + $0x568] sm:$0xff] }
 0x182   : > { %v4171_v3 = vadd.f32 %v4170_v0, %v4101_v63  ;;  %7598 = vmatprep.mubr.f32.mxu0 %v1531_v58  ;;  %7668 = vmatprep.mubr.f32.mxu1 %v1532_v61  ;;  %v1581_v50 = vrot.slane %v1567_v39, %v11876_v5  ;;  %v1582_v55 = vcombine.high %v1574_v48, %v1574_v48  ;;  %v458_v63 = vld [vmem:[%s11865_s21 + $0x520] sm:$0xff] }
 0x184   : > { %7565 = vmatpush1.xpose.msra.mxu0 %v446_v2  ;;  %7635 = vmatpush1.xpose.msra.mxu1 %v448_v6  ;;  %v1583_v58 = vcombine.high %v1581_v50, %v1581_v50  ;;  %v460_v2 = vld [vmem:[%s11865_s21 + $0x530] sm:$0xff]  ;;  %v721_v6 = vld [vmem:[%s11865_s21 + $0xd58] sm:$0x3] }
 0x185   : > { %7702 = vmatprep.subr.mxu0 %v707_v7  ;;  %7772 = vmatprep.subr.mxu1 %v709_v9  ;;  %v718_v9 = vld [vmem:[%s11865_s21 + $0xd40] sm:$0x3] }
 0x187   : > { %v4240_v16 = vpop.f32.mrf.mxu0  ;;  %7599 = vmatmul.mubr.f32.vlgmr.msra.gmra.mxu0 %v1523_v51  ;;  %v4310_v21 = vpop.f32.mrf.mxu1  ;;  %7669 = vmatmul.mubr.f32.vlgmr.msra.gmra.mxu1 %v1530_v53  ;;  %v272_v51 = vld [vmem:[%s11859_s30 + $0x150] sm:$0xff] }
 0x188   : > { %v4241_v20 = vadd.f32 %v4240_v16, %v4171_v3  ;;  %7703 = vmatpush1.xpose.msra.mxu0 %v706_v12  ;;  %7773 = vmatpush1.xpose.msra.mxu1 %v708_v13  ;;  %v716_v53 = vld [vmem:[%s11865_s21 + $0xd30] sm:$0x3]  ;;  %v1584_v59 = vcombine.high %v272_v51, %v272_v51  ;;  %v719_v3 = vld [vmem:[%s11865_s21 + $0xd48] sm:$0x3]  ;;  %v1591_v4 = vrot.slane %v272_v51, %v11876_v5 }
 0x189   : > { %v4242_v22 = vpop.f32.mrf.mxu0  ;;  %7704 = vmatprep.subr.mxu0 %v451_v14  ;;  %v4312_v25 = vpop.f32.mrf.mxu1  ;;  %7774 = vmatprep.subr.mxu1 %v453_v17  ;;  %v465_v14 = vld [vmem:[%s11865_s21 + $0x558] sm:$0xff]  ;;  %v471_v51 = vld [vmem:[%s11865_s21 + $0x588] sm:$0xff] }
 0x18a   : > { %v4311_v24 = vadd.f32 %v4310_v21, %v4241_v20  ;;  %7738 = vmatprep.mubr.f32.mxu0 %v1548_v15  ;;  %7808 = vmatprep.mubr.f32.mxu1 %v1549_v18  ;;  %v1598_v7 = vrot.slane %v1584_v59, %v11876_v5  ;;  %v1599_v12 = vcombine.high %v1591_v4, %v1591_v4  ;;  %v462_v20 = vld [vmem:[%s11865_s21 + $0x540] sm:$0xff] }
 0x18c   : > { %7705 = vmatpush1.xpose.msra.mxu0 %v450_v23  ;;  %7775 = vmatpush1.xpose.msra.mxu1 %v452_v26  ;;  %v1600_v15 = vcombine.high %v1598_v7, %v1598_v7  ;;  %v464_v23 = vld [vmem:[%s11865_s21 + $0x550] sm:$0xff]  ;;  %v725_v26 = vld [vmem:[%s11865_s21 + $0xd78] sm:$0x3] }
 0x18d   : > { %7842 = vmatprep.subr.mxu0 %v711_v27  ;;  %7912 = vmatprep.subr.mxu1 %v713_v29  ;;  %v722_v29 = vld [vmem:[%s11865_s21 + $0xd60] sm:$0x3] }
 0x18f   : > { %v4380_v36 = vpop.f32.mrf.mxu0  ;;  %7739 = vmatmul.mubr.f32.vlgmr.msra.gmra.mxu0 %v1540_v8  ;;  %v4450_v41 = vpop.f32.mrf.mxu1  ;;  %7809 = vmatmul.mubr.f32.vlgmr.msra.gmra.mxu1 %v1547_v10  ;;  %v273_v8 = vld [vmem:[%s11859_s30 + $0x158] sm:$0xff]  ;;  %v720_v10 = vld [vmem:[%s11865_s21 + $0xd50] sm:$0x3] }
 0x190   : > { %v4381_v40 = vadd.f32 %v4380_v36, %v4311_v24  ;;  %7843 = vmatpush1.xpose.msra.mxu0 %v710_v32  ;;  %7913 = vmatpush1.xpose.msra.mxu1 %v712_v33  ;;  %v1601_v16 = vcombine.high %v273_v8, %v273_v8  ;;  %v723_v24 = vld [vmem:[%s11865_s21 + $0xd68] sm:$0x3]  ;;  %v1608_v25 = vrot.slane %v273_v8, %v11876_v5 }
 0x191   : > { %v4382_v42 = vpop.f32.mrf.mxu0  ;;  %7844 = vmatprep.subr.mxu0 %v455_v34  ;;  %v4452_v45 = vpop.f32.mrf.mxu1  ;;  %7914 = vmatprep.subr.mxu1 %v457_v37  ;;  %v469_v34 = vld [vmem:[%s11865_s21 + $0x578] sm:$0xff]  ;;  %v475_v8 = vld [vmem:[%s11865_s21 + $0x5a8] sm:$0xff] }
 0x192   : > { %v4451_v44 = vadd.f32 %v4450_v41, %v4381_v40  ;;  %7878 = vmatprep.mubr.f32.mxu0 %v1565_v35  ;;  %7948 = vmatprep.mubr.f32.mxu1 %v1566_v38  ;;  %v1615_v27 = vrot.slane %v1601_v16, %v11876_v5  ;;  %v1616_v32 = vcombine.high %v1608_v25, %v1608_v25  ;;  %v466_v40 = vld [vmem:[%s11865_s21 + $0x560] sm:$0xff] }
 0x194   : > { %7845 = vmatpush1.xpose.msra.mxu0 %v454_v43  ;;  %7915 = vmatpush1.xpose.msra.mxu1 %v456_v46  ;;  %v1617_v35 = vcombine.high %v1615_v27, %v1615_v27  ;;  %v468_v43 = vld [vmem:[%s11865_s21 + $0x570] sm:$0xff]  ;;  %v729_v46 = vld [vmem:[%s11865_s21 + $0xd98] sm:$0x3] }
 0x195   : > { %7982 = vmatprep.subr.mxu0 %v715_v47  ;;  %8052 = vmatprep.subr.mxu1 %v717_v49  ;;  %v726_v49 = vld [vmem:[%s11865_s21 + $0xd80] sm:$0x3] }
 0x197   : > { %v4520_v56 = vpop.f32.mrf.mxu0  ;;  %7879 = vmatmul.mubr.f32.vlgmr.msra.gmra.mxu0 %v1557_v28  ;;  %v4590_v61 = vpop.f32.mrf.mxu1  ;;  %7949 = vmatmul.mubr.f32.vlgmr.msra.gmra.mxu1 %v1564_v30  ;;  %v274_v28 = vld [vmem:[%s11859_s30 + $0x160] sm:$0xff]  ;;  %v724_v30 = vld [vmem:[%s11865_s21 + $0xd70] sm:$0x3] }
 0x198   : > { %v4521_v60 = vadd.f32 %v4520_v56, %v4451_v44  ;;  %7983 = vmatpush1.xpose.msra.mxu0 %v714_v52  ;;  %8053 = vmatpush1.xpose.msra.mxu1 %v716_v53  ;;  %v1618_v36 = vcombine.high %v274_v28, %v274_v28  ;;  %v727_v44 = vld [vmem:[%s11865_s21 + $0xd88] sm:$0x3]  ;;  %v1625_v45 = vrot.slane %v274_v28, %v11876_v5 }
 0x199   : > { %v4522_v62 = vpop.f32.mrf.mxu0  ;;  %7984 = vmatprep.subr.mxu0 %v459_v54  ;;  %v4592_v1 = vpop.f32.mrf.mxu1  ;;  %8054 = vmatprep.subr.mxu1 %v461_v57  ;;  %v473_v54 = vld [vmem:[%s11865_s21 + $0x598] sm:$0xff]  ;;  %v479_v28 = vld [vmem:[%s11865_s21 + $0x5c8] sm:$0xff] }
 0x19a   : > { %v4591_v0 = vadd.f32 %v4590_v61, %v4521_v60  ;;  %8018 = vmatprep.mubr.f32.mxu0 %v1582_v55  ;;  %8088 = vmatprep.mubr.f32.mxu1 %v1583_v58  ;;  %v1632_v47 = vrot.slane %v1618_v36, %v11876_v5  ;;  %v1633_v52 = vcombine.high %v1625_v45, %v1625_v45  ;;  %v470_v60 = vld [vmem:[%s11865_s21 + $0x580] sm:$0xff] }
 0x19c   : > { %7985 = vmatpush1.xpose.msra.mxu0 %v458_v63  ;;  %8055 = vmatpush1.xpose.msra.mxu1 %v460_v2  ;;  %v1634_v55 = vcombine.high %v1632_v47, %v1632_v47  ;;  %v472_v63 = vld [vmem:[%s11865_s21 + $0x590] sm:$0xff]  ;;  %v733_v2 = vld [vmem:[%s11865_s21 + $0xdb8] sm:$0x3] }
 0x19d   : > { %8122 = vmatprep.subr.mxu0 %v719_v3  ;;  %8192 = vmatprep.subr.mxu1 %v721_v6  ;;  %v730_v6 = vld [vmem:[%s11865_s21 + $0xda0] sm:$0x3] }
 0x19f   : > { %v4660_v13 = vpop.f32.mrf.mxu0  ;;  %8019 = vmatmul.mubr.f32.vlgmr.msra.gmra.mxu0 %v1574_v48  ;;  %v4730_v18 = vpop.f32.mrf.mxu1  ;;  %8089 = vmatmul.mubr.f32.vlgmr.msra.gmra.mxu1 %v1581_v50  ;;  %v275_v48 = vld [vmem:[%s11859_s30 + $0x168] sm:$0xff]  ;;  %v728_v50 = vld [vmem:[%s11865_s21 + $0xd90] sm:$0x3] }
 0x1a0   : > { %v4661_v17 = vadd.f32 %v4660_v13, %v4591_v0  ;;  %8123 = vmatpush1.xpose.msra.mxu0 %v718_v9  ;;  %8193 = vmatpush1.xpose.msra.mxu1 %v720_v10  ;;  %v1635_v56 = vcombine.high %v275_v48, %v275_v48  ;;  %v731_v0 = vld [vmem:[%s11865_s21 + $0xda8] sm:$0x3]  ;;  %v1642_v1 = vrot.slane %v275_v48, %v11876_v5 }
 0x1a1   : > { %v4662_v19 = vpop.f32.mrf.mxu0  ;;  %8124 = vmatprep.subr.mxu0 %v463_v11  ;;  %v4732_v22 = vpop.f32.mrf.mxu1  ;;  %8194 = vmatprep.subr.mxu1 %v465_v14  ;;  %v477_v11 = vld [vmem:[%s11865_s21 + $0x5b8] sm:$0xff]  ;;  %v483_v48 = vld [vmem:[%s11865_s21 + $0x5e8] sm:$0xff] }
 0x1a2   : > { %v4731_v21 = vadd.f32 %v4730_v18, %v4661_v17  ;;  %8158 = vmatprep.mubr.f32.mxu0 %v1599_v12  ;;  %8228 = vmatprep.mubr.f32.mxu1 %v1600_v15  ;;  %v1649_v3 = vrot.slane %v1635_v56, %v11876_v5  ;;  %v1650_v9 = vcombine.high %v1642_v1, %v1642_v1  ;;  %v474_v17 = vld [vmem:[%s11865_s21 + $0x5a0] sm:$0xff] }
 0x1a4   : > { %8125 = vmatpush1.xpose.msra.mxu0 %v462_v20  ;;  %8195 = vmatpush1.xpose.msra.mxu1 %v464_v23  ;;  %v1651_v12 = vcombine.high %v1649_v3, %v1649_v3  ;;  %v476_v20 = vld [vmem:[%s11865_s21 + $0x5b0] sm:$0xff]  ;;  %v737_v23 = vld [vmem:[%s11865_s21 + $0xdd8] sm:$0x3] }
 0x1a5   : > { %8262 = vmatprep.subr.mxu0 %v723_v24  ;;  %8332 = vmatprep.subr.mxu1 %v725_v26  ;;  %v734_v26 = vld [vmem:[%s11865_s21 + $0xdc0] sm:$0x3] }
 0x1a7   : > { %v4800_v33 = vpop.f32.mrf.mxu0  ;;  %8159 = vmatmul.mubr.f32.vlgmr.msra.gmra.mxu0 %v1591_v4  ;;  %v4870_v38 = vpop.f32.mrf.mxu1  ;;  %8229 = vmatmul.mubr.f32.vlgmr.msra.gmra.mxu1 %v1598_v7  ;;  %v276_v4 = vld [vmem:[%s11859_s30 + $0x170] sm:$0xff] }
 0x1a8   : > { %v4801_v37 = vadd.f32 %v4800_v33, %v4731_v21  ;;  %8263 = vmatpush1.xpose.msra.mxu0 %v722_v29  ;;  %8333 = vmatpush1.xpose.msra.mxu1 %v724_v30  ;;  %v732_v7 = vld [vmem:[%s11865_s21 + $0xdb0] sm:$0x3]  ;;  %v1652_v13 = vcombine.high %v276_v4, %v276_v4  ;;  %v735_v21 = vld [vmem:[%s11865_s21 + $0xdc8] sm:$0x3]  ;;  %v1659_v22 = vrot.slane %v276_v4, %v11876_v5 }
 0x1a9   : > { %v4802_v39 = vpop.f32.mrf.mxu0  ;;  %8264 = vmatprep.subr.mxu0 %v467_v31  ;;  %v4872_v42 = vpop.f32.mrf.mxu1  ;;  %8334 = vmatprep.subr.mxu1 %v469_v34  ;;  %v481_v31 = vld [vmem:[%s11865_s21 + $0x5d8] sm:$0xff]  ;;  %v487_v4 = vld [vmem:[%s11865_s21 + $0x608] sm:$0xff] }
 0x1aa   : > { %v4871_v41 = vadd.f32 %v4870_v38, %v4801_v37  ;;  %8298 = vmatprep.mubr.f32.mxu0 %v1616_v32  ;;  %8368 = vmatprep.mubr.f32.mxu1 %v1617_v35  ;;  %v1666_v24 = vrot.slane %v1652_v13, %v11876_v5  ;;  %v1667_v29 = vcombine.high %v1659_v22, %v1659_v22  ;;  %v478_v37 = vld [vmem:[%s11865_s21 + $0x5c0] sm:$0xff] }
 0x1ac   : > { %8265 = vmatpush1.xpose.msra.mxu0 %v466_v40  ;;  %8335 = vmatpush1.xpose.msra.mxu1 %v468_v43  ;;  %v1668_v32 = vcombine.high %v1666_v24, %v1666_v24  ;;  %v480_v40 = vld [vmem:[%s11865_s21 + $0x5d0] sm:$0xff]  ;;  %v741_v43 = vld [vmem:[%s11865_s21 + $0xdf8] sm:$0x3] }
 0x1ad   : > { %8402 = vmatprep.subr.mxu0 %v727_v44  ;;  %8472 = vmatprep.subr.mxu1 %v729_v46  ;;  %v738_v46 = vld [vmem:[%s11865_s21 + $0xde0] sm:$0x3] }
 0x1af   : > { %v4940_v53 = vpop.f32.mrf.mxu0  ;;  %8299 = vmatmul.mubr.f32.vlgmr.msra.gmra.mxu0 %v1608_v25  ;;  %v5010_v58 = vpop.f32.mrf.mxu1  ;;  %8369 = vmatmul.mubr.f32.vlgmr.msra.gmra.mxu1 %v1615_v27  ;;  %v277_v25 = vld [vmem:[%s11859_s30 + $0x178] sm:$0xff]  ;;  %v736_v27 = vld [vmem:[%s11865_s21 + $0xdd0] sm:$0x3] }
 0x1b0   : > { %v4941_v57 = vadd.f32 %v4940_v53, %v4871_v41  ;;  %8403 = vmatpush1.xpose.msra.mxu0 %v726_v49  ;;  %8473 = vmatpush1.xpose.msra.mxu1 %v728_v50  ;;  %v1669_v33 = vcombine.high %v277_v25, %v277_v25  ;;  %v739_v41 = vld [vmem:[%s11865_s21 + $0xde8] sm:$0x3]  ;;  %v1676_v42 = vrot.slane %v277_v25, %v11876_v5 }
 0x1b1   : > { %v4942_v59 = vpop.f32.mrf.mxu0  ;;  %8404 = vmatprep.subr.mxu0 %v471_v51  ;;  %v5012_v62 = vpop.f32.mrf.mxu1  ;;  %8474 = vmatprep.subr.mxu1 %v473_v54  ;;  %v485_v51 = vld [vmem:[%s11865_s21 + $0x5f8] sm:$0xff]  ;;  %v491_v25 = vld [vmem:[%s11865_s21 + $0x628] sm:$0xff] }
 0x1b2   : > { %v5011_v61 = vadd.f32 %v5010_v58, %v4941_v57  ;;  %8438 = vmatprep.mubr.f32.mxu0 %v1633_v52  ;;  %8508 = vmatprep.mubr.f32.mxu1 %v1634_v55  ;;  %v1683_v44 = vrot.slane %v1669_v33, %v11876_v5  ;;  %v1684_v49 = vcombine.high %v1676_v42, %v1676_v42  ;;  %v482_v57 = vld [vmem:[%s11865_s21 + $0x5e0] sm:$0xff] }
 0x1b4   : > { %8405 = vmatpush1.xpose.msra.mxu0 %v470_v60  ;;  %8475 = vmatpush1.xpose.msra.mxu1 %v472_v63  ;;  %v1685_v52 = vcombine.high %v1683_v44, %v1683_v44  ;;  %v484_v60 = vld [vmem:[%s11865_s21 + $0x5f0] sm:$0xff]  ;;  %v745_v63 = vld [vmem:[%s11865_s21 + $0xe18] sm:$0x3] }
 0x1b5   : > { %8542 = vmatprep.subr.mxu0 %v731_v0  ;;  %8612 = vmatprep.subr.mxu1 %v733_v2  ;;  %v742_v2 = vld [vmem:[%s11865_s21 + $0xe00] sm:$0x3] }
 0x1b7   : > { %v5080_v10 = vpop.f32.mrf.mxu0  ;;  %8439 = vmatmul.mubr.f32.vlgmr.msra.gmra.mxu0 %v1625_v45  ;;  %v5150_v15 = vpop.f32.mrf.mxu1  ;;  %8509 = vmatmul.mubr.f32.vlgmr.msra.gmra.mxu1 %v1632_v47  ;;  %v278_v45 = vld [vmem:[%s11859_s30 + $0x180] sm:$0xff]  ;;  %v740_v47 = vld [vmem:[%s11865_s21 + $0xdf0] sm:$0x3] }
 0x1b8   : > { %v5081_v14 = vadd.f32 %v5080_v10, %v5011_v61  ;;  %8543 = vmatpush1.xpose.msra.mxu0 %v730_v6  ;;  %8613 = vmatpush1.xpose.msra.mxu1 %v732_v7  ;;  %v1686_v53 = vcombine.high %v278_v45, %v278_v45  ;;  %v743_v61 = vld [vmem:[%s11865_s21 + $0xe08] sm:$0x3]  ;;  %v1693_v62 = vrot.slane %v278_v45, %v11876_v5 }
 0x1b9   : > { %v5082_v16 = vpop.f32.mrf.mxu0  ;;  %8544 = vmatprep.subr.mxu0 %v475_v8  ;;  %v5152_v19 = vpop.f32.mrf.mxu1  ;;  %8614 = vmatprep.subr.mxu1 %v477_v11  ;;  %v489_v8 = vld [vmem:[%s11865_s21 + $0x618] sm:$0xff]  ;;  %v495_v45 = vld [vmem:[%s11865_s21 + $0x648] sm:$0xff] }
 0x1ba   : > { %v5151_v18 = vadd.f32 %v5150_v15, %v5081_v14  ;;  %8578 = vmatprep.mubr.f32.mxu0 %v1650_v9  ;;  %8648 = vmatprep.mubr.f32.mxu1 %v1651_v12  ;;  %v1700_v0 = vrot.slane %v1686_v53, %v11876_v5  ;;  %v1701_v6 = vcombine.high %v1693_v62, %v1693_v62  ;;  %v486_v14 = vld [vmem:[%s11865_s21 + $0x600] sm:$0xff] }
 0x1bc   : > { %8545 = vmatpush1.xpose.msra.mxu0 %v474_v17  ;;  %8615 = vmatpush1.xpose.msra.mxu1 %v476_v20  ;;  %v1702_v9 = vcombine.high %v1700_v0, %v1700_v0  ;;  %v488_v17 = vld [vmem:[%s11865_s21 + $0x610] sm:$0xff]  ;;  %v749_v20 = vld [vmem:[%s11865_s21 + $0xe38] sm:$0x3] }
 0x1bd   : > { %8682 = vmatprep.subr.mxu0 %v735_v21  ;;  %8752 = vmatprep.subr.mxu1 %v737_v23  ;;  %v746_v23 = vld [vmem:[%s11865_s21 + $0xe20] sm:$0x3] }
 0x1bf   : > { %v5220_v30 = vpop.f32.mrf.mxu0  ;;  %8579 = vmatmul.mubr.f32.vlgmr.msra.gmra.mxu0 %v1642_v1  ;;  %v5290_v35 = vpop.f32.mrf.mxu1  ;;  %8649 = vmatmul.mubr.f32.vlgmr.msra.gmra.mxu1 %v1649_v3  ;;  %v279_v1 = vld [vmem:[%s11859_s30 + $0x188] sm:$0xff]  ;;  %v744_v3 = vld [vmem:[%s11865_s21 + $0xe10] sm:$0x3] }
 0x1c0   : > { %v5221_v34 = vadd.f32 %v5220_v30, %v5151_v18  ;;  %8683 = vmatpush1.xpose.msra.mxu0 %v734_v26  ;;  %8753 = vmatpush1.xpose.msra.mxu1 %v736_v27  ;;  %v1703_v10 = vcombine.high %v279_v1, %v279_v1  ;;  %v747_v18 = vld [vmem:[%s11865_s21 + $0xe28] sm:$0x3]  ;;  %v1710_v19 = vrot.slane %v279_v1, %v11876_v5 }
 0x1c1   : > { %v5222_v36 = vpop.f32.mrf.mxu0  ;;  %8684 = vmatprep.subr.mxu0 %v479_v28  ;;  %v5292_v39 = vpop.f32.mrf.mxu1  ;;  %8754 = vmatprep.subr.mxu1 %v481_v31  ;;  %v493_v28 = vld [vmem:[%s11865_s21 + $0x638] sm:$0xff]  ;;  %v499_v1 = vld [vmem:[%s11865_s21 + $0x668] sm:$0xff] }
 0x1c2   : > { %v5291_v38 = vadd.f32 %v5290_v35, %v5221_v34  ;;  %8718 = vmatprep.mubr.f32.mxu0 %v1667_v29  ;;  %8788 = vmatprep.mubr.f32.mxu1 %v1668_v32  ;;  %v1717_v21 = vrot.slane %v1703_v10, %v11876_v5  ;;  %v1718_v26 = vcombine.high %v1710_v19, %v1710_v19  ;;  %v490_v34 = vld [vmem:[%s11865_s21 + $0x620] sm:$0xff] }
 0x1c4   : > { %8685 = vmatpush1.xpose.msra.mxu0 %v478_v37  ;;  %8755 = vmatpush1.xpose.msra.mxu1 %v480_v40  ;;  %v1719_v29 = vcombine.high %v1717_v21, %v1717_v21  ;;  %v492_v37 = vld [vmem:[%s11865_s21 + $0x630] sm:$0xff]  ;;  %v753_v40 = vld [vmem:[%s11865_s21 + $0xe58] sm:$0x3] }
 0x1c5   : > { %8822 = vmatprep.subr.mxu0 %v739_v41  ;;  %8892 = vmatprep.subr.mxu1 %v741_v43  ;;  %v750_v43 = vld [vmem:[%s11865_s21 + $0xe40] sm:$0x3] }
 0x1c7   : > { %v5360_v50 = vpop.f32.mrf.mxu0  ;;  %8719 = vmatmul.mubr.f32.vlgmr.msra.gmra.mxu0 %v1659_v22  ;;  %v5430_v55 = vpop.f32.mrf.mxu1  ;;  %8789 = vmatmul.mubr.f32.vlgmr.msra.gmra.mxu1 %v1666_v24  ;;  %v280_v22 = vld [vmem:[%s11859_s30 + $0x190] sm:$0xff] }
 0x1c8   : > { %v5361_v54 = vadd.f32 %v5360_v50, %v5291_v38  ;;  %8823 = vmatpush1.xpose.msra.mxu0 %v738_v46  ;;  %8893 = vmatpush1.xpose.msra.mxu1 %v740_v47  ;;  %v748_v24 = vld [vmem:[%s11865_s21 + $0xe30] sm:$0x3]  ;;  %v1720_v30 = vcombine.high %v280_v22, %v280_v22  ;;  %v751_v38 = vld [vmem:[%s11865_s21 + $0xe48] sm:$0x3]  ;;  %v1727_v39 = vrot.slane %v280_v22, %v11876_v5 }
 0x1c9   : > { %v5362_v56 = vpop.f32.mrf.mxu0  ;;  %8824 = vmatprep.subr.mxu0 %v483_v48  ;;  %v5432_v59 = vpop.f32.mrf.mxu1  ;;  %8894 = vmatprep.subr.mxu1 %v485_v51  ;;  %v497_v48 = vld [vmem:[%s11865_s21 + $0x658] sm:$0xff]  ;;  %v503_v22 = vld [vmem:[%s11865_s21 + $0x688] sm:$0xff] }
 0x1ca   : > { %v5431_v58 = vadd.f32 %v5430_v55, %v5361_v54  ;;  %8858 = vmatprep.mubr.f32.mxu0 %v1684_v49  ;;  %8928 = vmatprep.mubr.f32.mxu1 %v1685_v52  ;;  %v1734_v41 = vrot.slane %v1720_v30, %v11876_v5  ;;  %v1735_v46 = vcombine.high %v1727_v39, %v1727_v39  ;;  %v494_v54 = vld [vmem:[%s11865_s21 + $0x640] sm:$0xff] }
 0x1cc   : > { %8825 = vmatpush1.xpose.msra.mxu0 %v482_v57  ;;  %8895 = vmatpush1.xpose.msra.mxu1 %v484_v60  ;;  %v1736_v49 = vcombine.high %v1734_v41, %v1734_v41  ;;  %v496_v57 = vld [vmem:[%s11865_s21 + $0x650] sm:$0xff]  ;;  %v757_v60 = vld [vmem:[%s11865_s21 + $0xe78] sm:$0x3] }
 0x1cd   : > { %8962 = vmatprep.subr.mxu0 %v743_v61  ;;  %9032 = vmatprep.subr.mxu1 %v745_v63  ;;  %v754_v63 = vld [vmem:[%s11865_s21 + $0xe60] sm:$0x3] }
 0x1cf   : > { %v5500_v7 = vpop.f32.mrf.mxu0  ;;  %8859 = vmatmul.mubr.f32.vlgmr.msra.gmra.mxu0 %v1676_v42  ;;  %v5570_v12 = vpop.f32.mrf.mxu1  ;;  %8929 = vmatmul.mubr.f32.vlgmr.msra.gmra.mxu1 %v1683_v44  ;;  %v281_v42 = vld [vmem:[%s11859_s30 + $0x198] sm:$0xff]  ;;  %v752_v44 = vld [vmem:[%s11865_s21 + $0xe50] sm:$0x3] }
 0x1d0   : > { %v5501_v11 = vadd.f32 %v5500_v7, %v5431_v58  ;;  %8963 = vmatpush1.xpose.msra.mxu0 %v742_v2  ;;  %9033 = vmatpush1.xpose.msra.mxu1 %v744_v3  ;;  %v1737_v50 = vcombine.high %v281_v42, %v281_v42  ;;  %v755_v58 = vld [vmem:[%s11865_s21 + $0xe68] sm:$0x3]  ;;  %v1744_v59 = vrot.slane %v281_v42, %v11876_v5 }
 0x1d1   : > { %v5502_v13 = vpop.f32.mrf.mxu0  ;;  %8964 = vmatprep.subr.mxu0 %v487_v4  ;;  %v5572_v16 = vpop.f32.mrf.mxu1  ;;  %9034 = vmatprep.subr.mxu1 %v489_v8  ;;  %v501_v4 = vld [vmem:[%s11865_s21 + $0x678] sm:$0xff]  ;;  %v507_v42 = vld [vmem:[%s11865_s21 + $0x6a8] sm:$0xff] }
 0x1d2   : > { %v5571_v15 = vadd.f32 %v5570_v12, %v5501_v11  ;;  %8998 = vmatprep.mubr.f32.mxu0 %v1701_v6  ;;  %9068 = vmatprep.mubr.f32.mxu1 %v1702_v9  ;;  %v1751_v61 = vrot.slane %v1737_v50, %v11876_v5  ;;  %v1752_v2 = vcombine.high %v1744_v59, %v1744_v59  ;;  %v498_v11 = vld [vmem:[%s11865_s21 + $0x660] sm:$0xff] }
 0x1d4   : > { %8965 = vmatpush1.xpose.msra.mxu0 %v486_v14  ;;  %9035 = vmatpush1.xpose.msra.mxu1 %v488_v17  ;;  %v1753_v6 = vcombine.high %v1751_v61, %v1751_v61  ;;  %v500_v14 = vld [vmem:[%s11865_s21 + $0x670] sm:$0xff]  ;;  %v761_v17 = vld [vmem:[%s11865_s21 + $0xe98] sm:$0x3] }
 0x1d5   : > { %9102 = vmatprep.subr.mxu0 %v747_v18  ;;  %9172 = vmatprep.subr.mxu1 %v749_v20  ;;  %v758_v20 = vld [vmem:[%s11865_s21 + $0xe80] sm:$0x3] }
 0x1d7   : > { %v5640_v27 = vpop.f32.mrf.mxu0  ;;  %8999 = vmatmul.mubr.f32.vlgmr.msra.gmra.mxu0 %v1693_v62  ;;  %v5710_v32 = vpop.f32.mrf.mxu1  ;;  %9069 = vmatmul.mubr.f32.vlgmr.msra.gmra.mxu1 %v1700_v0  ;;  %v282_v62 = vld [vmem:[%s11859_s30 + $0x1a0] sm:$0xff]  ;;  %v756_v0 = vld [vmem:[%s11865_s21 + $0xe70] sm:$0x3] }
 0x1d8   : > { %v5641_v31 = vadd.f32 %v5640_v27, %v5571_v15  ;;  %9103 = vmatpush1.xpose.msra.mxu0 %v746_v23  ;;  %9173 = vmatpush1.xpose.msra.mxu1 %v748_v24  ;;  %v1754_v7 = vcombine.high %v282_v62, %v282_v62  ;;  %v759_v15 = vld [vmem:[%s11865_s21 + $0xe88] sm:$0x3]  ;;  %v1761_v16 = vrot.slane %v282_v62, %v11876_v5 }
 0x1d9   : > { %v5642_v33 = vpop.f32.mrf.mxu0  ;;  %9104 = vmatprep.subr.mxu0 %v491_v25  ;;  %v5712_v36 = vpop.f32.mrf.mxu1  ;;  %9174 = vmatprep.subr.mxu1 %v493_v28  ;;  %v505_v25 = vld [vmem:[%s11865_s21 + $0x698] sm:$0xff]  ;;  %v511_v62 = vld [vmem:[%s11865_s21 + $0x6c8] sm:$0xff] }
 0x1da   : > { %v5711_v35 = vadd.f32 %v5710_v32, %v5641_v31  ;;  %9138 = vmatprep.mubr.f32.mxu0 %v1718_v26  ;;  %9208 = vmatprep.mubr.f32.mxu1 %v1719_v29  ;;  %v1768_v18 = vrot.slane %v1754_v7, %v11876_v5  ;;  %v1769_v23 = vcombine.high %v1761_v16, %v1761_v16  ;;  %v502_v31 = vld [vmem:[%s11865_s21 + $0x680] sm:$0xff] }
 0x1dc   : > { %9105 = vmatpush1.xpose.msra.mxu0 %v490_v34  ;;  %9175 = vmatpush1.xpose.msra.mxu1 %v492_v37  ;;  %v1770_v26 = vcombine.high %v1768_v18, %v1768_v18  ;;  %v504_v34 = vld [vmem:[%s11865_s21 + $0x690] sm:$0xff]  ;;  %v765_v37 = vld [vmem:[%s11865_s21 + $0xeb8] sm:$0x3] }
 0x1dd   : > { %9242 = vmatprep.subr.mxu0 %v751_v38  ;;  %9312 = vmatprep.subr.mxu1 %v753_v40  ;;  %v762_v40 = vld [vmem:[%s11865_s21 + $0xea0] sm:$0x3] }
 0x1df   : > { %v5780_v47 = vpop.f32.mrf.mxu0  ;;  %9139 = vmatmul.mubr.f32.vlgmr.msra.gmra.mxu0 %v1710_v19  ;;  %v5850_v52 = vpop.f32.mrf.mxu1  ;;  %9209 = vmatmul.mubr.f32.vlgmr.msra.gmra.mxu1 %v1717_v21  ;;  %v283_v19 = vld [vmem:[%s11859_s30 + $0x1a8] sm:$0xff]  ;;  %v760_v21 = vld [vmem:[%s11865_s21 + $0xe90] sm:$0x3] }
 0x1e0   : > { %v5781_v51 = vadd.f32 %v5780_v47, %v5711_v35  ;;  %9243 = vmatpush1.xpose.msra.mxu0 %v750_v43  ;;  %9313 = vmatpush1.xpose.msra.mxu1 %v752_v44  ;;  %v1771_v27 = vcombine.high %v283_v19, %v283_v19  ;;  %v763_v35 = vld [vmem:[%s11865_s21 + $0xea8] sm:$0x3]  ;;  %v1778_v36 = vrot.slane %v283_v19, %v11876_v5 }
 0x1e1   : > { %v5782_v53 = vpop.f32.mrf.mxu0  ;;  %9244 = vmatprep.subr.mxu0 %v495_v45  ;;  %v5852_v56 = vpop.f32.mrf.mxu1  ;;  %9314 = vmatprep.subr.mxu1 %v497_v48  ;;  %v509_v45 = vld [vmem:[%s11865_s21 + $0x6b8] sm:$0xff]  ;;  %v515_v19 = vld [vmem:[%s11865_s21 + $0x6e8] sm:$0xff] }
 0x1e2   : > { %v5851_v55 = vadd.f32 %v5850_v52, %v5781_v51  ;;  %9278 = vmatprep.mubr.f32.mxu0 %v1735_v46  ;;  %9348 = vmatprep.mubr.f32.mxu1 %v1736_v49  ;;  %v1785_v38 = vrot.slane %v1771_v27, %v11876_v5  ;;  %v1786_v43 = vcombine.high %v1778_v36, %v1778_v36  ;;  %v506_v51 = vld [vmem:[%s11865_s21 + $0x6a0] sm:$0xff] }
 0x1e4   : > { %9245 = vmatpush1.xpose.msra.mxu0 %v494_v54  ;;  %9315 = vmatpush1.xpose.msra.mxu1 %v496_v57  ;;  %v1787_v46 = vcombine.high %v1785_v38, %v1785_v38  ;;  %v508_v54 = vld [vmem:[%s11865_s21 + $0x6b0] sm:$0xff]  ;;  %v769_v57 = vld [vmem:[%s11865_s21 + $0xed8] sm:$0x3] }
 0x1e5   : > { %9382 = vmatprep.subr.mxu0 %v755_v58  ;;  %9452 = vmatprep.subr.mxu1 %v757_v60  ;;  %v766_v60 = vld [vmem:[%s11865_s21 + $0xec0] sm:$0x3] }
 0x1e7   : > { %v5920_v3 = vpop.f32.mrf.mxu0  ;;  %9279 = vmatmul.mubr.f32.vlgmr.msra.gmra.mxu0 %v1727_v39  ;;  %v5990_v9 = vpop.f32.mrf.mxu1  ;;  %9349 = vmatmul.mubr.f32.vlgmr.msra.gmra.mxu1 %v1734_v41  ;;  %v284_v39 = vld [vmem:[%s11859_s30 + $0x1b0] sm:$0xff] }
 0x1e8   : > { %v5921_v8 = vadd.f32 %v5920_v3, %v5851_v55  ;;  %9383 = vmatpush1.xpose.msra.mxu0 %v754_v63  ;;  %9453 = vmatpush1.xpose.msra.mxu1 %v756_v0  ;;  %v764_v41 = vld [vmem:[%s11865_s21 + $0xeb0] sm:$0x3]  ;;  %v1788_v47 = vcombine.high %v284_v39, %v284_v39  ;;  %v767_v55 = vld [vmem:[%s11865_s21 + $0xec8] sm:$0x3]  ;;  %v1795_v56 = vrot.slane %v284_v39, %v11876_v5 }
 0x1e9   : > { %v5922_v10 = vpop.f32.mrf.mxu0  ;;  %9384 = vmatprep.subr.mxu0 %v499_v1  ;;  %v5992_v13 = vpop.f32.mrf.mxu1  ;;  %9454 = vmatprep.subr.mxu1 %v501_v4  ;;  %v513_v1 = vld [vmem:[%s11865_s21 + $0x6d8] sm:$0xff]  ;;  %v519_v39 = vld [vmem:[%s11865_s21 + $0x708] sm:$0xff] }
 0x1ea   : > { %v5991_v12 = vadd.f32 %v5990_v9, %v5921_v8  ;;  %9418 = vmatprep.mubr.f32.mxu0 %v1752_v2  ;;  %9488 = vmatprep.mubr.f32.mxu1 %v1753_v6  ;;  %v1802_v58 = vrot.slane %v1788_v47, %v11876_v5  ;;  %v1803_v63 = vcombine.high %v1795_v56, %v1795_v56  ;;  %v510_v8 = vld [vmem:[%s11865_s21 + $0x6c0] sm:$0xff] }
 0x1ec   : > { %9385 = vmatpush1.xpose.msra.mxu0 %v498_v11  ;;  %9455 = vmatpush1.xpose.msra.mxu1 %v500_v14  ;;  %v1804_v2 = vcombine.high %v1802_v58, %v1802_v58  ;;  %v512_v11 = vld [vmem:[%s11865_s21 + $0x6d0] sm:$0xff]  ;;  %v773_v14 = vld [vmem:[%s11865_s21 + $0xef8] sm:$0x3] }
 0x1ed   : > { %9522 = vmatprep.subr.mxu0 %v759_v15  ;;  %9592 = vmatprep.subr.mxu1 %v761_v17  ;;  %v770_v17 = vld [vmem:[%s11865_s21 + $0xee0] sm:$0x3] }
 0x1ef   : > { %v6060_v24 = vpop.f32.mrf.mxu0  ;;  %9419 = vmatmul.mubr.f32.vlgmr.msra.gmra.mxu0 %v1744_v59  ;;  %v6130_v29 = vpop.f32.mrf.mxu1  ;;  %9489 = vmatmul.mubr.f32.vlgmr.msra.gmra.mxu1 %v1751_v61  ;;  %v285_v59 = vld [vmem:[%s11859_s30 + $0x1b8] sm:$0xff]  ;;  %v768_v61 = vld [vmem:[%s11865_s21 + $0xed0] sm:$0x3] }
 0x1f0   : > { %v6061_v28 = vadd.f32 %v6060_v24, %v5991_v12  ;;  %9523 = vmatpush1.xpose.msra.mxu0 %v758_v20  ;;  %9593 = vmatpush1.xpose.msra.mxu1 %v760_v21  ;;  %v1805_v3 = vcombine.high %v285_v59, %v285_v59  ;;  %v771_v12 = vld [vmem:[%s11865_s21 + $0xee8] sm:$0x3]  ;;  %v1812_v13 = vrot.slane %v285_v59, %v11876_v5 }
 0x1f1   : > { %v6062_v30 = vpop.f32.mrf.mxu0  ;;  %9524 = vmatprep.subr.mxu0 %v503_v22  ;;  %v6132_v33 = vpop.f32.mrf.mxu1  ;;  %9594 = vmatprep.subr.mxu1 %v505_v25  ;;  %v517_v22 = vld [vmem:[%s11865_s21 + $0x6f8] sm:$0xff]  ;;  %v523_v59 = vld [vmem:[%s11865_s21 + $0x728] sm:$0xff] }
 0x1f2   : > { %v6131_v32 = vadd.f32 %v6130_v29, %v6061_v28  ;;  %9558 = vmatprep.mubr.f32.mxu0 %v1769_v23  ;;  %9628 = vmatprep.mubr.f32.mxu1 %v1770_v26  ;;  %v1819_v15 = vrot.slane %v1805_v3, %v11876_v5  ;;  %v1820_v20 = vcombine.high %v1812_v13, %v1812_v13  ;;  %v514_v28 = vld [vmem:[%s11865_s21 + $0x6e0] sm:$0xff] }
 0x1f4   : > { %9525 = vmatpush1.xpose.msra.mxu0 %v502_v31  ;;  %9595 = vmatpush1.xpose.msra.mxu1 %v504_v34  ;;  %v1821_v23 = vcombine.high %v1819_v15, %v1819_v15  ;;  %v516_v31 = vld [vmem:[%s11865_s21 + $0x6f0] sm:$0xff]  ;;  %v777_v34 = vld [vmem:[%s11865_s21 + $0xf18] sm:$0x3] }
 0x1f5   : > { %9662 = vmatprep.subr.mxu0 %v763_v35  ;;  %9732 = vmatprep.subr.mxu1 %v765_v37  ;;  %v774_v37 = vld [vmem:[%s11865_s21 + $0xf00] sm:$0x3] }
 0x1f7   : > { %v6200_v44 = vpop.f32.mrf.mxu0  ;;  %9559 = vmatmul.mubr.f32.vlgmr.msra.gmra.mxu0 %v1761_v16  ;;  %v6270_v49 = vpop.f32.mrf.mxu1  ;;  %9629 = vmatmul.mubr.f32.vlgmr.msra.gmra.mxu1 %v1768_v18  ;;  %v286_v16 = vld [vmem:[%s11859_s30 + $0x1c0] sm:$0xff]  ;;  %v772_v18 = vld [vmem:[%s11865_s21 + $0xef0] sm:$0x3] }
 0x1f8   : > { %v6201_v48 = vadd.f32 %v6200_v44, %v6131_v32  ;;  %9663 = vmatpush1.xpose.msra.mxu0 %v762_v40  ;;  %9733 = vmatpush1.xpose.msra.mxu1 %v764_v41  ;;  %v1822_v24 = vcombine.high %v286_v16, %v286_v16  ;;  %v775_v32 = vld [vmem:[%s11865_s21 + $0xf08] sm:$0x3]  ;;  %v1829_v33 = vrot.slane %v286_v16, %v11876_v5 }
 0x1f9   : > { %v6202_v50 = vpop.f32.mrf.mxu0  ;;  %9664 = vmatprep.subr.mxu0 %v507_v42  ;;  %v6272_v53 = vpop.f32.mrf.mxu1  ;;  %9734 = vmatprep.subr.mxu1 %v509_v45  ;;  %v521_v42 = vld [vmem:[%s11865_s21 + $0x718] sm:$0xff]  ;;  %v527_v16 = vld [vmem:[%s11865_s21 + $0x748] sm:$0xff] }
 0x1fa   : > { %v6271_v52 = vadd.f32 %v6270_v49, %v6201_v48  ;;  %9698 = vmatprep.mubr.f32.mxu0 %v1786_v43  ;;  %9768 = vmatprep.mubr.f32.mxu1 %v1787_v46  ;;  %v1836_v35 = vrot.slane %v1822_v24, %v11876_v5  ;;  %v1837_v40 = vcombine.high %v1829_v33, %v1829_v33  ;;  %v518_v48 = vld [vmem:[%s11865_s21 + $0x700] sm:$0xff] }
 0x1fc   : > { %9665 = vmatpush1.xpose.msra.mxu0 %v506_v51  ;;  %9735 = vmatpush1.xpose.msra.mxu1 %v508_v54  ;;  %v1838_v43 = vcombine.high %v1836_v35, %v1836_v35  ;;  %v520_v51 = vld [vmem:[%s11865_s21 + $0x710] sm:$0xff]  ;;  %v781_v54 = vld [vmem:[%s11865_s21 + $0xf38] sm:$0x3] }
 0x1fd   : > { %9802 = vmatprep.subr.mxu0 %v767_v55  ;;  %9872 = vmatprep.subr.mxu1 %v769_v57  ;;  %v778_v57 = vld [vmem:[%s11865_s21 + $0xf20] sm:$0x3] }
 0x1ff   : > { %v6340_v0 = vpop.f32.mrf.mxu0  ;;  %9699 = vmatmul.mubr.f32.vlgmr.msra.gmra.mxu0 %v1778_v36  ;;  %v6410_v6 = vpop.f32.mrf.mxu1  ;;  %9769 = vmatmul.mubr.f32.vlgmr.msra.gmra.mxu1 %v1785_v38  ;;  %v287_v36 = vld [vmem:[%s11859_s30 + $0x1c8] sm:$0xff]  ;;  %v776_v38 = vld [vmem:[%s11865_s21 + $0xf10] sm:$0x3] }
 0x200   : > { %v6341_v4 = vadd.f32 %v6340_v0, %v6271_v52  ;;  %9803 = vmatpush1.xpose.msra.mxu0 %v766_v60  ;;  %9873 = vmatpush1.xpose.msra.mxu1 %v768_v61  ;;  %v1839_v44 = vcombine.high %v287_v36, %v287_v36  ;;  %v779_v52 = vld [vmem:[%s11865_s21 + $0xf28] sm:$0x3]  ;;  %v1846_v53 = vrot.slane %v287_v36, %v11876_v5 }
 0x201   : > { %v6342_v7 = vpop.f32.mrf.mxu0  ;;  %9804 = vmatprep.subr.mxu0 %v511_v62  ;;  %v6412_v10 = vpop.f32.mrf.mxu1  ;;  %9874 = vmatprep.subr.mxu1 %v513_v1  ;;  %v525_v62 = vld [vmem:[%s11865_s21 + $0x738] sm:$0xff]  ;;  %v531_v36 = vld [vmem:[%s11865_s21 + $0x768] sm:$0xff] }
 0x202   : > { %v6411_v9 = vadd.f32 %v6410_v6, %v6341_v4  ;;  %9838 = vmatprep.mubr.f32.mxu0 %v1803_v63  ;;  %9908 = vmatprep.mubr.f32.mxu1 %v1804_v2  ;;  %v1853_v55 = vrot.slane %v1839_v44, %v11876_v5  ;;  %v1854_v60 = vcombine.high %v1846_v53, %v1846_v53  ;;  %v522_v4 = vld [vmem:[%s11865_s21 + $0x720] sm:$0xff] }
 0x204   : > { %9805 = vmatpush1.xpose.msra.mxu0 %v510_v8  ;;  %9875 = vmatpush1.xpose.msra.mxu1 %v512_v11  ;;  %v1855_v63 = vcombine.high %v1853_v55, %v1853_v55  ;;  %v524_v8 = vld [vmem:[%s11865_s21 + $0x730] sm:$0xff]  ;;  %v785_v11 = vld [vmem:[%s11865_s21 + $0xf58] sm:$0x3] }
 0x205   : > { %9942 = vmatprep.subr.mxu0 %v771_v12  ;;  %10012 = vmatprep.subr.mxu1 %v773_v14  ;;  %v782_v14 = vld [vmem:[%s11865_s21 + $0xf40] sm:$0x3] }
 0x207   : > { %v6480_v21 = vpop.f32.mrf.mxu0  ;;  %9839 = vmatmul.mubr.f32.vlgmr.msra.gmra.mxu0 %v1795_v56  ;;  %v6550_v26 = vpop.f32.mrf.mxu1  ;;  %9909 = vmatmul.mubr.f32.vlgmr.msra.gmra.mxu1 %v1802_v58  ;;  %v288_v56 = vld [vmem:[%s11859_s30 + $0x1d0] sm:$0xff] }
 0x208   : > { %v6481_v25 = vadd.f32 %v6480_v21, %v6411_v9  ;;  %9943 = vmatpush1.xpose.msra.mxu0 %v770_v17  ;;  %10013 = vmatpush1.xpose.msra.mxu1 %v772_v18  ;;  %v780_v58 = vld [vmem:[%s11865_s21 + $0xf30] sm:$0x3]  ;;  %v1856_v0 = vcombine.high %v288_v56, %v288_v56  ;;  %v783_v9 = vld [vmem:[%s11865_s21 + $0xf48] sm:$0x3]  ;;  %v1863_v10 = vrot.slane %v288_v56, %v11876_v5 }
 0x209   : > { %v6482_v27 = vpop.f32.mrf.mxu0  ;;  %9944 = vmatprep.subr.mxu0 %v515_v19  ;;  %v6552_v30 = vpop.f32.mrf.mxu1  ;;  %10014 = vmatprep.subr.mxu1 %v517_v22  ;;  %v529_v19 = vld [vmem:[%s11865_s21 + $0x758] sm:$0xff]  ;;  %v535_v56 = vld [vmem:[%s11865_s21 + $0x788] sm:$0xff] }
 0x20a   : > { %v6551_v29 = vadd.f32 %v6550_v26, %v6481_v25  ;;  %9978 = vmatprep.mubr.f32.mxu0 %v1820_v20  ;;  %10048 = vmatprep.mubr.f32.mxu1 %v1821_v23  ;;  %v1870_v12 = vrot.slane %v1856_v0, %v11876_v5  ;;  %v1871_v17 = vcombine.high %v1863_v10, %v1863_v10  ;;  %v526_v25 = vld [vmem:[%s11865_s21 + $0x740] sm:$0xff] }
 0x20c   : > { %9945 = vmatpush1.xpose.msra.mxu0 %v514_v28  ;;  %10015 = vmatpush1.xpose.msra.mxu1 %v516_v31  ;;  %v1872_v20 = vcombine.high %v1870_v12, %v1870_v12  ;;  %v528_v28 = vld [vmem:[%s11865_s21 + $0x750] sm:$0xff]  ;;  %v789_v31 = vld [vmem:[%s11865_s21 + $0xf78] sm:$0x3] }
 0x20d   : > { %10082 = vmatprep.subr.mxu0 %v775_v32  ;;  %10152 = vmatprep.subr.mxu1 %v777_v34  ;;  %v786_v34 = vld [vmem:[%s11865_s21 + $0xf60] sm:$0x3] }
 0x20f   : > { %v6620_v41 = vpop.f32.mrf.mxu0  ;;  %9979 = vmatmul.mubr.f32.vlgmr.msra.gmra.mxu0 %v1812_v13  ;;  %v6690_v46 = vpop.f32.mrf.mxu1  ;;  %10049 = vmatmul.mubr.f32.vlgmr.msra.gmra.mxu1 %v1819_v15  ;;  %v289_v13 = vld [vmem:[%s11859_s30 + $0x1d8] sm:$0xff]  ;;  %v784_v15 = vld [vmem:[%s11865_s21 + $0xf50] sm:$0x3] }
 0x210   : > { %v6621_v45 = vadd.f32 %v6620_v41, %v6551_v29  ;;  %10083 = vmatpush1.xpose.msra.mxu0 %v774_v37  ;;  %10153 = vmatpush1.xpose.msra.mxu1 %v776_v38  ;;  %v1873_v21 = vcombine.high %v289_v13, %v289_v13  ;;  %v787_v29 = vld [vmem:[%s11865_s21 + $0xf68] sm:$0x3]  ;;  %v1880_v30 = vrot.slane %v289_v13, %v11876_v5 }
 0x211   : > { %v6622_v47 = vpop.f32.mrf.mxu0  ;;  %10084 = vmatprep.subr.mxu0 %v519_v39  ;;  %v6692_v50 = vpop.f32.mrf.mxu1  ;;  %10154 = vmatprep.subr.mxu1 %v521_v42  ;;  %v533_v39 = vld [vmem:[%s11865_s21 + $0x778] sm:$0xff]  ;;  %v539_v13 = vld [vmem:[%s11865_s21 + $0x7a8] sm:$0xff] }
 0x212   : > { %v6691_v49 = vadd.f32 %v6690_v46, %v6621_v45  ;;  %10118 = vmatprep.mubr.f32.mxu0 %v1837_v40  ;;  %10188 = vmatprep.mubr.f32.mxu1 %v1838_v43  ;;  %v1887_v32 = vrot.slane %v1873_v21, %v11876_v5  ;;  %v1888_v37 = vcombine.high %v1880_v30, %v1880_v30  ;;  %v530_v45 = vld [vmem:[%s11865_s21 + $0x760] sm:$0xff] }
 0x214   : > { %10085 = vmatpush1.xpose.msra.mxu0 %v518_v48  ;;  %10155 = vmatpush1.xpose.msra.mxu1 %v520_v51  ;;  %v1889_v40 = vcombine.high %v1887_v32, %v1887_v32  ;;  %v532_v48 = vld [vmem:[%s11865_s21 + $0x770] sm:$0xff]  ;;  %v793_v51 = vld [vmem:[%s11865_s21 + $0xf98] sm:$0x3] }
 0x215   : > { %10222 = vmatprep.subr.mxu0 %v779_v52  ;;  %10292 = vmatprep.subr.mxu1 %v781_v54  ;;  %v790_v54 = vld [vmem:[%s11865_s21 + $0xf80] sm:$0x3] }
 0x217   : > { %v6760_v61 = vpop.f32.mrf.mxu0  ;;  %10119 = vmatmul.mubr.f32.vlgmr.msra.gmra.mxu0 %v1829_v33  ;;  %v6830_v2 = vpop.f32.mrf.mxu1  ;;  %10189 = vmatmul.mubr.f32.vlgmr.msra.gmra.mxu1 %v1836_v35  ;;  %v290_v33 = vld [vmem:[%s11859_s30 + $0x1e0] sm:$0xff]  ;;  %v788_v35 = vld [vmem:[%s11865_s21 + $0xf70] sm:$0x3] }
 0x218   : > { %v6761_v1 = vadd.f32 %v6760_v61, %v6691_v49  ;;  %10223 = vmatpush1.xpose.msra.mxu0 %v778_v57  ;;  %10293 = vmatpush1.xpose.msra.mxu1 %v780_v58  ;;  %v1890_v41 = vcombine.high %v290_v33, %v290_v33  ;;  %v791_v49 = vld [vmem:[%s11865_s21 + $0xf88] sm:$0x3]  ;;  %v1897_v50 = vrot.slane %v290_v33, %v11876_v5 }
 0x219   : > { %v6762_v3 = vpop.f32.mrf.mxu0  ;;  %10224 = vmatprep.subr.mxu0 %v523_v59  ;;  %v6832_v7 = vpop.f32.mrf.mxu1  ;;  %10294 = vmatprep.subr.mxu1 %v525_v62  ;;  %v537_v59 = vld [vmem:[%s11865_s21 + $0x798] sm:$0xff]  ;;  %v543_v33 = vld [vmem:[%s11865_s21 + $0x7c8] sm:$0xff] }
 0x21a   : > { %v6831_v6 = vadd.f32 %v6830_v2, %v6761_v1  ;;  %10258 = vmatprep.mubr.f32.mxu0 %v1854_v60  ;;  %10328 = vmatprep.mubr.f32.mxu1 %v1855_v63  ;;  %v1904_v52 = vrot.slane %v1890_v41, %v11876_v5  ;;  %v1905_v57 = vcombine.high %v1897_v50, %v1897_v50  ;;  %v534_v1 = vld [vmem:[%s11865_s21 + $0x780] sm:$0xff] }
 0x21c   : > { %10225 = vmatpush1.xpose.msra.mxu0 %v522_v4  ;;  %10295 = vmatpush1.xpose.msra.mxu1 %v524_v8  ;;  %v1906_v60 = vcombine.high %v1904_v52, %v1904_v52  ;;  %v536_v4 = vld [vmem:[%s11865_s21 + $0x790] sm:$0xff]  ;;  %v797_v8 = vld [vmem:[%s11865_s21 + $0xfb8] sm:$0x3] }
 0x21d   : > { %10362 = vmatprep.subr.mxu0 %v783_v9  ;;  %10432 = vmatprep.subr.mxu1 %v785_v11  ;;  %v794_v11 = vld [vmem:[%s11865_s21 + $0xfa0] sm:$0x3] }
 0x21f   : > { %v6900_v18 = vpop.f32.mrf.mxu0  ;;  %10259 = vmatmul.mubr.f32.vlgmr.msra.gmra.mxu0 %v1846_v53  ;;  %v6970_v23 = vpop.f32.mrf.mxu1  ;;  %10329 = vmatmul.mubr.f32.vlgmr.msra.gmra.mxu1 %v1853_v55  ;;  %v291_v53 = vld [vmem:[%s11859_s30 + $0x1e8] sm:$0xff]  ;;  %v792_v55 = vld [vmem:[%s11865_s21 + $0xf90] sm:$0x3] }
 0x220   : > { %v6901_v22 = vadd.f32 %v6900_v18, %v6831_v6  ;;  %10363 = vmatpush1.xpose.msra.mxu0 %v782_v14  ;;  %10433 = vmatpush1.xpose.msra.mxu1 %v784_v15  ;;  %v1907_v61 = vcombine.high %v291_v53, %v291_v53  ;;  %v795_v6 = vld [vmem:[%s11865_s21 + $0xfa8] sm:$0x3]  ;;  %v1914_v7 = vrot.slane %v291_v53, %v11876_v5 }
 0x221   : > { %v6902_v24 = vpop.f32.mrf.mxu0  ;;  %10364 = vmatprep.subr.mxu0 %v527_v16  ;;  %v6972_v27 = vpop.f32.mrf.mxu1  ;;  %10434 = vmatprep.subr.mxu1 %v529_v19  ;;  %v541_v16 = vld [vmem:[%s11865_s21 + $0x7b8] sm:$0xff] }
 0x222   : > { %v6971_v26 = vadd.f32 %v6970_v23, %v6901_v22  ;;  %10398 = vmatprep.mubr.f32.mxu0 %v1871_v17  ;;  %10468 = vmatprep.mubr.f32.mxu1 %v1872_v20  ;;  %v1921_v9 = vrot.slane %v1907_v61, %v11876_v5  ;;  %v1922_v14 = vcombine.high %v1914_v7, %v1914_v7  ;;  %v538_v22 = vld [vmem:[%s11865_s21 + $0x7a0] sm:$0xff] }
 0x224   : > { %10365 = vmatpush1.xpose.msra.mxu0 %v526_v25  ;;  %10435 = vmatpush1.xpose.msra.mxu1 %v528_v28  ;;  %v1923_v17 = vcombine.high %v1921_v9, %v1921_v9  ;;  %v540_v25 = vld [vmem:[%s11865_s21 + $0x7b0] sm:$0xff]  ;;  %v801_v28 = vld [vmem:[%s11865_s21 + $0xfd8] sm:$0x3] }
 0x225   : > { %10502 = vmatprep.subr.mxu0 %v787_v29  ;;  %10572 = vmatprep.subr.mxu1 %v789_v31  ;;  %v798_v31 = vld [vmem:[%s11865_s21 + $0xfc0] sm:$0x3] }
 0x227   : > { %v7040_v38 = vpop.f32.mrf.mxu0  ;;  %10399 = vmatmul.mubr.f32.vlgmr.msra.gmra.mxu0 %v1863_v10  ;;  %v7110_v43 = vpop.f32.mrf.mxu1  ;;  %10469 = vmatmul.mubr.f32.vlgmr.msra.gmra.mxu1 %v1870_v12  ;;  %v292_v10 = vld [vmem:[%s11859_s30 + $0x1f0] sm:$0xff] }
 0x228   : > { %v7041_v42 = vadd.f32 %v7040_v38, %v6971_v26  ;;  %10503 = vmatpush1.xpose.msra.mxu0 %v786_v34  ;;  %10573 = vmatpush1.xpose.msra.mxu1 %v788_v35  ;;  %v796_v12 = vld [vmem:[%s11865_s21 + $0xfb0] sm:$0x3]  ;;  %v1924_v18 = vcombine.high %v292_v10, %v292_v10  ;;  %v799_v26 = vld [vmem:[%s11865_s21 + $0xfc8] sm:$0x3]  ;;  %v1931_v27 = vrot.slane %v292_v10, %v11876_v5 }
 0x229   : > { %v7042_v44 = vpop.f32.mrf.mxu0  ;;  %10504 = vmatprep.subr.mxu0 %v531_v36  ;;  %v7112_v47 = vpop.f32.mrf.mxu1  ;;  %10574 = vmatprep.subr.mxu1 %v533_v39  ;;  %v545_v36 = vld [vmem:[%s11865_s21 + $0x7d8] sm:$0xff] }
 0x22a   : > { %v7111_v46 = vadd.f32 %v7110_v43, %v7041_v42  ;;  %10538 = vmatprep.mubr.f32.mxu0 %v1888_v37  ;;  %10608 = vmatprep.mubr.f32.mxu1 %v1889_v40  ;;  %v1938_v29 = vrot.slane %v1924_v18, %v11876_v5  ;;  %v1939_v34 = vcombine.high %v1931_v27, %v1931_v27  ;;  %v542_v42 = vld [vmem:[%s11865_s21 + $0x7c0] sm:$0xff] }
 0x22c   : > { %10505 = vmatpush1.xpose.msra.mxu0 %v530_v45  ;;  %10575 = vmatpush1.xpose.msra.mxu1 %v532_v48  ;;  %v1940_v37 = vcombine.high %v1938_v29, %v1938_v29  ;;  %v544_v45 = vld [vmem:[%s11865_s21 + $0x7d0] sm:$0xff]  ;;  %v805_v48 = vld [vmem:[%s11865_s21 + $0xff8] sm:$0x3] }
 0x22d   : > { %10642 = vmatprep.subr.mxu0 %v791_v49  ;;  %10712 = vmatprep.subr.mxu1 %v793_v51  ;;  %v804_v51 = vld [vmem:[%s11865_s21 + $0xff0] sm:$0x3] }
 0x22f   : > { %v7180_v58 = vpop.f32.mrf.mxu0  ;;  %10539 = vmatmul.mubr.f32.vlgmr.msra.gmra.mxu0 %v1880_v30  ;;  %v7250_v63 = vpop.f32.mrf.mxu1  ;;  %10609 = vmatmul.mubr.f32.vlgmr.msra.gmra.mxu1 %v1887_v32  ;;  %v293_v30 = vld [vmem:[%s11859_s30 + $0x1f8] sm:$0xff]  ;;  %v800_v32 = vld [vmem:[%s11865_s21 + $0xfd0] sm:$0x3] }
 0x230   : > { %v7181_v62 = vadd.f32 %v7180_v58, %v7111_v46  ;;  %10643 = vmatpush1.xpose.msra.mxu0 %v790_v54  ;;  %10713 = vmatpush1.xpose.msra.mxu1 %v792_v55  ;;  %v1941_v38 = vcombine.high %v293_v30, %v293_v30  ;;  %v803_v46 = vld [vmem:[%s11865_s21 + $0xfe8] sm:$0x3]  ;;  %v1948_v47 = vrot.slane %v293_v30, %v11876_v5  ;;  %v549_v55 = vld [vmem:[%s11865_s21 + $0x7f8] sm:$0xff] }
 0x231   : > { %v7182_v0 = vpop.f32.mrf.mxu0  ;;  %10644 = vmatprep.subr.mxu0 %v535_v56  ;;  %v7252_v3 = vpop.f32.mrf.mxu1  ;;  %10714 = vmatprep.subr.mxu1 %v537_v59  ;;  %v546_v59 = vld [vmem:[%s11865_s21 + $0x7e0] sm:$0xff] }
 0x232   : > { %v7251_v2 = vadd.f32 %v7250_v63, %v7181_v62  ;;  %10678 = vmatprep.mubr.f32.mxu0 %v1905_v57  ;;  %10748 = vmatprep.mubr.f32.mxu1 %v1906_v60  ;;  %v1955_v49 = vrot.slane %v1941_v38, %v11876_v5  ;;  %v1956_v53 = vcombine.high %v1948_v47, %v1948_v47  ;;  %v548_v62 = vld [vmem:[%s11865_s21 + $0x7f0] sm:$0xff] }
 0x234   : > { %10645 = vmatpush1.xpose.msra.mxu0 %v534_v1  ;;  %10715 = vmatpush1.xpose.msra.mxu1 %v536_v4  ;;  %v1957_v56 = vcombine.high %v1955_v49, %v1955_v49 }
 0x235   : > { %10782 = vmatprep.subr.mxu0 %v795_v6  ;;  %10852 = vmatprep.subr.mxu1 %v797_v8 }
 0x237   : > { %v7320_v15 = vpop.f32.mrf.mxu0  ;;  %10679 = vmatmul.mubr.f32.vlgmr.msra.gmra.mxu0 %v1897_v50  ;;  %v7390_v20 = vpop.f32.mrf.mxu1  ;;  %10749 = vmatmul.mubr.f32.vlgmr.msra.gmra.mxu1 %v1904_v52  ;;  %v802_v50 = vld [vmem:[%s11865_s21 + $0xfe0] sm:$0x3]  ;;  %v547_v52 = vld [vmem:[%s11865_s21 + $0x7e8] sm:$0xff] }
 0x238   : > { %v7321_v19 = vadd.f32 %v7320_v15, %v7251_v2  ;;  %10783 = vmatpush1.xpose.msra.mxu0 %v794_v11  ;;  %10853 = vmatpush1.xpose.msra.mxu1 %v796_v12 }
 0x239   : > { %v7322_v21 = vpop.f32.mrf.mxu0  ;;  %10784 = vmatprep.subr.mxu0 %v539_v13  ;;  %v7392_v24 = vpop.f32.mrf.mxu1  ;;  %10854 = vmatprep.subr.mxu1 %v541_v16 }
 0x23a   : > { %v7391_v23 = vadd.f32 %v7390_v20, %v7321_v19  ;;  %10818 = vmatprep.mubr.f32.mxu0 %v1922_v14  ;;  %10888 = vmatprep.mubr.f32.mxu1 %v1923_v17 }
 0x23c   : > { %10785 = vmatpush1.xpose.msra.mxu0 %v538_v22  ;;  %10855 = vmatpush1.xpose.msra.mxu1 %v540_v25 }
 0x23d   : > { %10922 = vmatprep.subr.mxu0 %v799_v26  ;;  %10992 = vmatprep.subr.mxu1 %v801_v28 }
 0x23f   : > { %v7460_v35 = vpop.f32.mrf.mxu0  ;;  %10819 = vmatmul.mubr.f32.vlgmr.msra.gmra.mxu0 %v1914_v7  ;;  %v7530_v40 = vpop.f32.mrf.mxu1  ;;  %10889 = vmatmul.mubr.f32.vlgmr.msra.gmra.mxu1 %v1921_v9 }
 0x240   : > { %v7461_v39 = vadd.f32 %v7460_v35, %v7391_v23  ;;  %10923 = vmatpush1.xpose.msra.mxu0 %v798_v31  ;;  %10993 = vmatpush1.xpose.msra.mxu1 %v800_v32 }
 0x241   : > { %v7462_v41 = vpop.f32.mrf.mxu0  ;;  %10924 = vmatprep.subr.mxu0 %v543_v33  ;;  %v7532_v44 = vpop.f32.mrf.mxu1  ;;  %10994 = vmatprep.subr.mxu1 %v545_v36 }
 0x242   : > { %v7531_v43 = vadd.f32 %v7530_v40, %v7461_v39  ;;  %10958 = vmatprep.mubr.f32.mxu0 %v1939_v34  ;;  %11028 = vmatprep.mubr.f32.mxu1 %v1940_v37 }
 0x244   : > { %10925 = vmatpush1.xpose.msra.mxu0 %v542_v42  ;;  %10995 = vmatpush1.xpose.msra.mxu1 %v544_v45 }
 0x245   : > { %11062 = vmatprep.subr.mxu0 %v803_v46  ;;  %11132 = vmatprep.subr.mxu1 %v805_v48 }
 0x247   : > { %v7600_v54 = vpop.f32.mrf.mxu0  ;;  %10959 = vmatmul.mubr.f32.vlgmr.msra.gmra.mxu0 %v1931_v27  ;;  %v7670_v58 = vpop.f32.mrf.mxu1  ;;  %11029 = vmatmul.mubr.f32.vlgmr.msra.gmra.mxu1 %v1938_v29 }
 0x248   : > { %v7601_v57 = vadd.f32 %v7600_v54, %v7531_v43  ;;  %11063 = vmatpush1.xpose.msra.mxu0 %v802_v50  ;;  %11133 = vmatpush1.xpose.msra.mxu1 %v804_v51 }
 0x249   : > { %v7602_v5 = vpop.f32.mrf.mxu0  ;;  %11064 = vmatprep.subr.mxu0 %v547_v52  ;;  %v7672_v61 = vpop.f32.mrf.mxu1  ;;  %11134 = vmatprep.subr.mxu1 %v549_v55 }
 0x24a   : > { %v7671_v60 = vadd.f32 %v7670_v58, %v7601_v57  ;;  %11098 = vmatprep.mubr.f32.mxu0 %v1956_v53  ;;  %11168 = vmatprep.mubr.f32.mxu1 %v1957_v56 }
 0x24c   : > { %11065 = vmatpush1.xpose.msra.mxu0 %v546_v59  ;;  %11135 = vmatpush1.xpose.msra.mxu1 %v548_v62 }
 0x24f   : > { %v7740_v63 = vpop.f32.mrf.mxu0  ;;  %11099 = vmatmul.mubr.f32.vlgmr.msra.gmra.mxu0 %v1948_v47  ;;  %v7810_v1 = vpop.f32.mrf.mxu1  ;;  %11169 = vmatmul.mubr.f32.vlgmr.msra.gmra.mxu1 %v1955_v49 }
 0x250   : > { %v7741_v0 = vadd.f32 %v7740_v63, %v7671_v60 }
 0x251   : > { %v7742_v2 = vpop.f32.mrf.mxu0  ;;  %v7812_v4 = vpop.f32.mrf.mxu1 }
 0x252   : > { %v7811_v3 = vadd.f32 %v7810_v1, %v7741_v0 }
 0x257   : > { %v7880_v6 = vpop.f32.mrf.mxu0  ;;  %v7950_v8 = vpop.f32.mrf.mxu1 }
 0x258   : > { %v7881_v7 = vadd.f32 %v7880_v6, %v7811_v3 }
 0x259   : > { %v7882_v9 = vpop.f32.mrf.mxu0  ;;  %v7952_v11 = vpop.f32.mrf.mxu1 }
 0x25a   : > { %v7951_v10 = vadd.f32 %v7950_v8, %v7881_v7 }
 0x25f   : > { %v8020_v12 = vpop.f32.mrf.mxu0  ;;  %v8090_v14 = vpop.f32.mrf.mxu1 }
 0x260   : > { %v8021_v13 = vadd.f32 %v8020_v12, %v7951_v10 }
 0x261   : > { %v8022_v15 = vpop.f32.mrf.mxu0  ;;  %v8092_v17 = vpop.f32.mrf.mxu1 }
 0x262   : > { %v8091_v16 = vadd.f32 %v8090_v14, %v8021_v13 }
 0x267   : > { %v8160_v18 = vpop.f32.mrf.mxu0  ;;  %v8230_v20 = vpop.f32.mrf.mxu1 }
 0x268   : > { %v8161_v19 = vadd.f32 %v8160_v18, %v8091_v16 }
 0x269   : > { %v8162_v21 = vpop.f32.mrf.mxu0  ;;  %v8232_v23 = vpop.f32.mrf.mxu1 }
 0x26a   : > { %v8231_v22 = vadd.f32 %v8230_v20, %v8161_v19 }
 0x26f   : > { %v8300_v24 = vpop.f32.mrf.mxu0  ;;  %v8370_v26 = vpop.f32.mrf.mxu1 }
 0x270   : > { %v8301_v25 = vadd.f32 %v8300_v24, %v8231_v22 }
 0x271   : > { %v8302_v27 = vpop.f32.mrf.mxu0  ;;  %v8372_v29 = vpop.f32.mrf.mxu1 }
 0x272   : > { %v8371_v28 = vadd.f32 %v8370_v26, %v8301_v25 }
 0x277   : > { %v8440_v30 = vpop.f32.mrf.mxu0  ;;  %v8510_v32 = vpop.f32.mrf.mxu1 }
 0x278   : > { %v8441_v31 = vadd.f32 %v8440_v30, %v8371_v28 }
 0x279   : > { %v8442_v33 = vpop.f32.mrf.mxu0  ;;  %v8512_v35 = vpop.f32.mrf.mxu1 }
 0x27a   : > { %v8511_v34 = vadd.f32 %v8510_v32, %v8441_v31 }
 0x27f   : > { %v8580_v36 = vpop.f32.mrf.mxu0  ;;  %v8650_v38 = vpop.f32.mrf.mxu1 }
 0x280   : > { %v8581_v37 = vadd.f32 %v8580_v36, %v8511_v34 }
 0x281   : > { %v8582_v39 = vpop.f32.mrf.mxu0  ;;  %v8652_v41 = vpop.f32.mrf.mxu1 }
 0x282   : > { %v8651_v40 = vadd.f32 %v8650_v38, %v8581_v37 }
 0x287   : > { %v8720_v42 = vpop.f32.mrf.mxu0  ;;  %v8790_v44 = vpop.f32.mrf.mxu1 }
 0x288   : > { %v8721_v43 = vadd.f32 %v8720_v42, %v8651_v40 }
 0x289   : > { %v8722_v45 = vpop.f32.mrf.mxu0  ;;  %v8792_v47 = vpop.f32.mrf.mxu1 }
 0x28a   : > { %v8791_v46 = vadd.f32 %v8790_v44, %v8721_v43 }
 0x28f   : > { %v8860_v48 = vpop.f32.mrf.mxu0  ;;  %v8930_v50 = vpop.f32.mrf.mxu1 }
 0x290   : > { %v8861_v49 = vadd.f32 %v8860_v48, %v8791_v46 }
 0x291   : > { %v8862_v51 = vpop.f32.mrf.mxu0  ;;  %v8932_v53 = vpop.f32.mrf.mxu1 }
 0x292   : > { %v8931_v52 = vadd.f32 %v8930_v50, %v8861_v49 }
 0x297   : > { %v9000_v54 = vpop.f32.mrf.mxu0  ;;  %v9070_v55 = vpop.f32.mrf.mxu1 }
 0x298   : > { %v9001_v6 = vadd.f32 %v9000_v54, %v8931_v52 }
 0x299   : > { %v9002_v56 = vpop.f32.mrf.mxu0  ;;  %v9072_v57 = vpop.f32.mrf.mxu1 }
 0x29a   : > { %v9071_v10 = vadd.f32 %v9070_v55, %v9001_v6 }
 0x29f   : > { %v9140_v58 = vpop.f32.mrf.mxu0  ;;  %v9210_v5 = vpop.f32.mrf.mxu1 }
 0x2a0   : > { %v9141_v12 = vadd.f32 %v9140_v58, %v9071_v10 }
 0x2a1   : > { %v9142_v59 = vpop.f32.mrf.mxu0  ;;  %v9212_v60 = vpop.f32.mrf.mxu1 }
 0x2a2   : > { %v9211_v14 = vadd.f32 %v9210_v5, %v9141_v12 }
 0x2a7   : > { %v9280_v61 = vpop.f32.mrf.mxu0  ;;  %v9350_v62 = vpop.f32.mrf.mxu1 }
 0x2a8   : > { %v9281_v17 = vadd.f32 %v9280_v61, %v9211_v14 }
 0x2a9   : > { %v9282_v63 = vpop.f32.mrf.mxu0  ;;  %v9352_v0 = vpop.f32.mrf.mxu1 }
 0x2aa   : > { %v9351_v19 = vadd.f32 %v9350_v62, %v9281_v17 }
 0x2af   : > { %v9420_v1 = vpop.f32.mrf.mxu0  ;;  %v9490_v2 = vpop.f32.mrf.mxu1 }
 0x2b0   : > { %v9421_v21 = vadd.f32 %v9420_v1, %v9351_v19 }
 0x2b1   : > { %v9422_v3 = vpop.f32.mrf.mxu0  ;;  %v9492_v4 = vpop.f32.mrf.mxu1 }
 0x2b2   : > { %v9491_v25 = vadd.f32 %v9490_v2, %v9421_v21 }
 0x2b7   : > { %v9560_v7 = vpop.f32.mrf.mxu0  ;;  %v9630_v8 = vpop.f32.mrf.mxu1 }
 0x2b8   : > { %v9561_v26 = vadd.f32 %v9560_v7, %v9491_v25 }
 0x2b9   : > { %v9562_v9 = vpop.f32.mrf.mxu0  ;;  %v9632_v11 = vpop.f32.mrf.mxu1 }
 0x2ba   : > { %v9631_v30 = vadd.f32 %v9630_v8, %v9561_v26 }
 0x2bf   : > { %v9700_v13 = vpop.f32.mrf.mxu0  ;;  %v9770_v15 = vpop.f32.mrf.mxu1 }
 0x2c0   : > { %v9701_v32 = vadd.f32 %v9700_v13, %v9631_v30 }
 0x2c1   : > { %v9702_v16 = vpop.f32.mrf.mxu0  ;;  %v9772_v18 = vpop.f32.mrf.mxu1 }
 0x2c2   : > { %v9771_v34 = vadd.f32 %v9770_v15, %v9701_v32 }
 0x2c7   : > { %v9840_v20 = vpop.f32.mrf.mxu0  ;;  %v9910_v22 = vpop.f32.mrf.mxu1 }
 0x2c8   : > { %v9841_v37 = vadd.f32 %v9840_v20, %v9771_v34 }
 0x2c9   : > { %v9842_v23 = vpop.f32.mrf.mxu0  ;;  %v9912_v24 = vpop.f32.mrf.mxu1 }
 0x2ca   : > { %v9911_v39 = vadd.f32 %v9910_v22, %v9841_v37 }
 0x2cf   : > { %v9980_v27 = vpop.f32.mrf.mxu0  ;;  %v10050_v28 = vpop.f32.mrf.mxu1 }
 0x2d0   : > { %v9981_v41 = vadd.f32 %v9980_v27, %v9911_v39 }
 0x2d1   : > { %v9982_v29 = vpop.f32.mrf.mxu0  ;;  %v10052_v31 = vpop.f32.mrf.mxu1 }
 0x2d2   : > { %v10051_v45 = vadd.f32 %v10050_v28, %v9981_v41 }
 0x2d7   : > { %v10120_v33 = vpop.f32.mrf.mxu0  ;;  %v10190_v35 = vpop.f32.mrf.mxu1 }
 0x2d8   : > { %v10121_v46 = vadd.f32 %v10120_v33, %v10051_v45 }
 0x2d9   : > { %v10122_v36 = vpop.f32.mrf.mxu0  ;;  %v10192_v38 = vpop.f32.mrf.mxu1 }
 0x2da   : > { %v10191_v50 = vadd.f32 %v10190_v35, %v10121_v46 }
 0x2df   : > { %v10260_v40 = vpop.f32.mrf.mxu0  ;;  %v10330_v42 = vpop.f32.mrf.mxu1 }
 0x2e0   : > { %v10261_v52 = vadd.f32 %v10260_v40, %v10191_v50 }
 0x2e1   : > { %v10262_v43 = vpop.f32.mrf.mxu0  ;;  %v10332_v44 = vpop.f32.mrf.mxu1 }
 0x2e2   : > { %v10331_v54 = vadd.f32 %v10330_v42, %v10261_v52 }
 0x2e7   : > { %v10400_v47 = vpop.f32.mrf.mxu0  ;;  %v10470_v48 = vpop.f32.mrf.mxu1 }
 0x2e8   : > { %v10401_v57 = vadd.f32 %v10400_v47, %v10331_v54 }
 0x2e9   : > { %v10402_v49 = vpop.f32.mrf.mxu0  ;;  %v10472_v51 = vpop.f32.mrf.mxu1 }
 0x2ea   : > { %v10471_v5 = vadd.f32 %v10470_v48, %v10401_v57 }
 0x2ef   : > { %v10540_v53 = vpop.f32.mrf.mxu0  ;;  %v10610_v55 = vpop.f32.mrf.mxu1 }
 0x2f0   : > { %v10541_v60 = vadd.f32 %v10540_v53, %v10471_v5 }
 0x2f1   : > { %v10542_v56 = vpop.f32.mrf.mxu0  ;;  %v10612_v58 = vpop.f32.mrf.mxu1 }
 0x2f2   : > { %v10611_v0 = vadd.f32 %v10610_v55, %v10541_v60 }
 0x2f7   : > { %v10680_v59 = vpop.f32.mrf.mxu0  ;;  %v10750_v61 = vpop.f32.mrf.mxu1 }
 0x2f8   : > { %v10681_v1 = vadd.f32 %v10680_v59, %v10611_v0 }
 0x2f9   : > { %v10682_v62 = vpop.f32.mrf.mxu0  ;;  %v10752_v63 = vpop.f32.mrf.mxu1 }
 0x2fa   : > { %v10751_v6 = vadd.f32 %v10750_v61, %v10681_v1 }
 0x2ff   : > { %v10820_v2 = vpop.f32.mrf.mxu0  ;;  %v10890_v3 = vpop.f32.mrf.mxu1 }
 0x300   : > { %v10821_v8 = vadd.f32 %v10820_v2, %v10751_v6 }
 0x301   : > { %v10822_v4 = vpop.f32.mrf.mxu0  ;;  %v10892_v7 = vpop.f32.mrf.mxu1 }
 0x302   : > { %v10891_v10 = vadd.f32 %v10890_v3, %v10821_v8 }
 0x307   : > { %v10960_v9 = vpop.f32.mrf.mxu0  ;;  %v11030_v11 = vpop.f32.mrf.mxu1 }
 0x308   : > { %v10961_v13 = vadd.f32 %v10960_v9, %v10891_v10 }
 0x309   : > { %v10962_v12 = vpop.f32.mrf.mxu0  ;;  %v11032_v14 = vpop.f32.mrf.mxu1 }
 0x30a   : > { %v11031_v15 = vadd.f32 %v11030_v11, %v10961_v13 }
 0x30e   : > { %11177 = sbr.rel (%p11324_p7) target bundleno = 789 (0x315), region = 40 }
 0x30f   : > { %v11100_v16 = vpop.f32.mrf.mxu0  ;;  %v11170_v18 = vpop.f32.mrf.mxu1 }
 0x310   : > { %v11101_v17 = vadd.f32 %v11100_v16, %v11031_v15 }
 0x311   : > { %v11102_v19 = vpop.f32.mrf.mxu0  ;;  %v11172_v21 = vpop.f32.mrf.mxu1 }
 0x312   : > { %v11171_v20 = vadd.f32 %v11170_v18, %v11101_v17 }
 0x313   : > { %vm11178_vm0 = vcmask 74752  }
 0x314   : > { %11179 = vst.msk [vmem:[%s223_s28] sm:$0x3] %vm11178_vm0, %v11171_v20 }
 0x315 PF: > { %p11325_p2 = scmp.eq.s32.totalorder %s11671_s15, 0 }
 0x317   : > { %11183 = sbr.rel (%p11325_p2) target bundleno = 800 (0x320), region = 44 }
 0x31c   : > { %v11184_v22 = vld [vmem:[%s223_s28] sm:$0x3]  ;;  %vm11186_vm1 = vcmask 74752  }
 0x31d   : > { %v11185_v23 = vadd.f32 %v11184_v22, %v11171_v20 }
 0x31f   : > { %11187 = vst.msk [vmem:[%s223_s28] sm:$0x3] %vm11186_vm1, %v11185_v23 }
 0x320 PF: > { %s11327_s18 = sshll.u32 %s11675_s16, 5  ;;  %s11202_s23 = sshll.u32 %s223_s28, 4  ;;  %s11203_s23 = int_to_ptr.vmem [resolvable:$true] %s11202_s23 }
 0x321   : > { %s11200_s29 = scalar_lea.hbm %s12642_s2, %s11327_s18  ;;  %s11189_s5 = scalar_lea.sflag [#allocation4], %s221_s0 }
 0x322   : > { %s11563_s3 = scalar_lea.vmem %s11203_s23, 32  ;;  %s11695_s15 = smov [#allocation7]  }
 0x323   : > { %p11564_p3 = scmp.ne.s32.totalorder %s11203_s23, %s11563_s3  ;;  %s11567_s12 = sshll.u32 %s11695_s15, 4  ;;  %s11568_s12 = int_to_ptr.vmem [resolvable:$false] %s11567_s12 }
 0x324   : > { %s11569_s4 = scalar_lea.vmem %s11568_s12, 64  ;;  %p11570_p1 = scmp.lt.s32.totalorder %s11203_s23, %s11568_s12 }
 0x325   : > { %p11565_p4 = pnand %p11564_p3, %p11800_p13  ;;  %p11571_p6 = scmp.lt.s32.totalorder %s11569_s4, %s11563_s3 }
 0x327   : > { %p11566_p0 = pneg %p11565_p4  ;;  %p11572_p8 = por %p11571_p6, %p11570_p1 }
 0x329   : > { %p11573_p9 = pnand %p11572_p8, %p11566_p0 }
 0x32b   : > { %11576 = shalt.err (!%p11573_p9)
}
 0x32c   : > { %s11577_s16 = scalar_lea.hbm %s11200_s29, 32  ;;  %s11581_s17 = scalar_lea.hbm %s12642_s2, 64 }
 0x32d   : > { %p11578_p5 = scmp.ne.s32.totalorder %s11200_s29, %s11577_s16  ;;  %p11582_p12 = scmp.lt.s32.totalorder %s11200_s29, %s12642_s2 }
 0x32e   : > { %p11583_p7 = scmp.lt.s32.totalorder %s11581_s17, %s11577_s16 }
 0x32f   : > { %p11579_p10 = pnand %p11578_p5, %p11800_p13 }
 0x330   : > { %p11584_p2 = por %p11583_p7, %p11582_p12 }
 0x331   : > { %p11580_p11 = pneg %p11579_p10 }
 0x333   : > { %p11585_p3 = pnand %p11584_p2, %p11580_p11 }
 0x335   : > { %11588 = shalt.err (!%p11585_p3)
}
 0x336   : > { %11336 = dma.vmem_to_hbm [thread:$0]  (%p11800_p13), %s11203_s23, 32, %s11200_s29, %s11189_s5  }
 0x337 PF: > { %p11350_p4 = scmp.ge.s32.totalorder %s11687_s19, 2  ;;  %s11214_s0 = sand.u32 1, %s11647_s9  }
 0x338   : > { %p12659_p0 = scmp.ne.s32.totalorder %s12655_s20, 0  ;;  %s11215_s24 = scalar_lea.sflag [#allocation4], %s11214_s0 }
 0x33a   : > { %p11346_p1 = pnand %p11350_p4, %p12659_p0 }
 0x33c   : > { %p11347_p6 = pneg %p11346_p1 }
 0x33e   : > { %11642 = dma.done.wait (%p11347_p6), %s11215_s24, 32  }
 0x33f   : > { %11644 = vsyncadd (%p11347_p6), %s11215_s24, 4294967264  ;;  %s21_s19 = sadd.s32 1, %s11687_s19   ;;  %s12660_s15 = sld [smem:[#allocation11_spill]] }
 0x340   : > { %p18_p8 = scmp.ge.s32.totalorder %s21_s19, 8   ;;  %s12661_s16 = sld [smem:[#allocation12_spill]] }
 0x341   : > { %s12662_s17 = sld [smem:[#allocation13_spill]]  ;;  %s12664_s9 = smov %s11651_s10 }
 0x342   : > { %s12663_s18 = sld [smem:[#allocation14_spill]]  ;;  %s12665_s10 = smov %s11655_s11 }
 0x343   : > { %s12666_s11 = smov %s11805_s7  ;;  %s12667_s12 = smov %s11663_s13 }
 0x344   : > { %s12668_s13 = smov %s11667_s14  ;;  %s12669_s14 = smov %s11808_s8 }
 0x345   :  { %20 = sbr.rel (!%p18_p8) target bundleno = 13 (0xd), region = 94 }
 0x34a   :  { %11220 = vsyncpa [#allocation3], 1 }
 0x34b   :  { %11222 = vsyncpa [#allocation3 + $0x1], 1 }
 0x34c   :  { %11223 = vsyncpa [#allocation6], 1 }
 0x34d   :  { %11225 = vsyncpa [#allocation6 + $0x1], 1 }
 0x34e   :  { %11226 = vsyncpa [#allocation4], 1 }
 0x34f   :  { %11228 = vsyncpa [#allocation4 + $0x1], 1 }

</bundles_post_ra>
